<compile_context>
chip_gen: v7x
topology: tpu7x:2x2x1
jax: 0.10.0
libtpu: 0.0.40
codegen_flags: <defaults>
</compile_context>

<pallas_src>
import functools

import jax
import jax.numpy as jnp
import numpy as np
from jax.experimental import pallas as pl
from jax.experimental.pallas import tpu as pltpu

C_LOCAL = 64       # per-point features (1088 - 1024)
C_GLOBAL = 1024
C1, C2, C3 = 512, 256, 128
BN_EPS = 1e-5


# ----------------------------- Pallas kernel -------------------------------

def seg_head_kernel(x_ref, gb_ref,
                    w1_ref, w2_ref, b2_ref, w3_ref, b3_ref, w4_ref, b4_ref,
                    o_ref):
    """Per-tile fused MLP chain (all 1x1 convs + folded BN + ReLU).

    Channel-major: activations are (channels on sublanes, points on lanes).
    """
    x = x_ref[0]            # (64, tn)   bf16 local point features
    gb = gb_ref[0]          # (512, 1)   f32  per-batch g @ W1b^T + b1 (hoisted)

    # conv1 (1088 -> 512) + BN1 + ReLU.  Global part already reduced into gb.
    h1 = jnp.dot(w1_ref[...], x, preferred_element_type=jnp.float32)
    h1 = jnp.maximum(h1 + gb, 0.0).astype(jnp.bfloat16)          # (512, tn)

    # conv2 (512 -> 256) + BN2 + ReLU
    h2 = jnp.dot(w2_ref[...], h1, preferred_element_type=jnp.float32) + b2_ref[...]
    h2 = jnp.maximum(h2, 0.0).astype(jnp.bfloat16)               # (256, tn)

    # conv3 (256 -> 128) + BN3 + ReLU
    h3 = jnp.dot(w3_ref[...], h2, preferred_element_type=jnp.float32) + b3_ref[...]
    h3 = jnp.maximum(h3, 0.0).astype(jnp.bfloat16)               # (128, tn)

    # conv4 (128 -> num_classes, sublane-padded to a multiple of 8), no BN/ReLU
    o_ref[0] = (jnp.dot(w4_ref[...], h3, preferred_element_type=jnp.float32)
                + b4_ref[...]).astype(o_ref.dtype)


# ------------------------------ wrapper ------------------------------------

def segmentation_head_forward(x, global_features, fused, num_classes, tn=512):
    """x: (B, 64, N) NCW (PyTorch convention); global_features: (B, 1024).
    Returns (B, num_classes, N), matching the PyTorch module output."""
    B, c_local, N = x.shape
    tn = min(tn, N)
    assert N % tn == 0, "N must be a multiple of the point tile tn"

    w1a, w2, b2 = fused['w1a'], fused['w2'], fused['b2']
    w3, b3, w4, b4 = fused['w3'], fused['b3'], fused['w4'], fused['b4']
    c4_pad = w4.shape[0]

    # Hoisted global-feature contribution: one fp32 XLA matmul per call,
    # constant per batch element (was redone on every grid step before).
    gb = (global_features @ fused['w1b'].T + fused['b1'][None, :]) \
        .reshape(B, C1, 1)                                       # (B, 512, 1)

    x_bf = x.astype(jnp.bfloat16)

    full = lambda a: pl.BlockSpec(a.shape, lambda b, n: (0,) * a.ndim)

    out_padded = pl.pallas_call(
        seg_head_kernel,
        out_shape=jax.ShapeDtypeStruct((B, c4_pad, N), jnp.float32),
        grid_spec=pltpu.PrefetchScalarGridSpec(
            num_scalar_prefetch=0,
            grid=(B, N // tn),
            in_specs=[
                pl.BlockSpec((1, c_local, tn), lambda b, n: (b, 0, n)),  # x tile
                pl.BlockSpec((1, C1, 1), lambda b, n: (b, 0, 0)),        # gb (per batch)
                full(w1a),
                full(w2), full(b2),
                full(w3), full(b3),
                full(w4), full(b4),
            ],
            out_specs=pl.BlockSpec((1, c4_pad, tn), lambda b, n: (b, 0, n)),
        ),
        compiler_params=pltpu.CompilerParams(
            dimension_semantics=("parallel", "parallel"),
            # Only needed when tn is pushed past ~1024 (v5e default scoped
            # limit is 16 MiB); stays None for the common case / v7x headroom.
            vmem_limit_bytes=(64 * 1024 * 1024 if tn > 1024 else None)),
    )(x_bf, gb, w1a, w2, b2, w3, b3, w4, b4)

    return out_padded[:, :num_classes, :]                        # (B, classes, N)


# --------------------------- parameter setup --------------------------------

def init_conv(key, cout, cin):
    k1, k2 = jax.random.split(key)
    bound = 1.0 / np.sqrt(cin)
    w = jax.random.uniform(k1, (cout, cin), jnp.float32, -bound, bound)
    b = jax.random.uniform(k2, (cout,), jnp.float32, -bound, bound)
    return w, b


def init_bn(key, c):
    k1, k2, k3, k4 = jax.random.split(key, 4)
    gamma = 1.0 + 0.1 * jax.random.normal(k1, (c,), jnp.float32)
    beta = 0.1 * jax.random.normal(k2, (c,), jnp.float32)
    mean = 0.1 * jax.random.normal(k3, (c,), jnp.float32)
    var = jax.random.uniform(k4, (c,), jnp.float32, 0.5, 1.5)
    return gamma, beta, mean, var


def fold_conv_bn(w, b, bn):
    """Fold eval-mode BN into the 1x1 conv: y = scale*(Wx+b-mean)+beta."""
    gamma, beta, mean, var = bn
    scale = gamma / jnp.sqrt(var + BN_EPS)                       # (Cout,)
    w_eff = w * scale[:, None]                                   # (Cout, Cin)
    b_eff = (b - mean) * scale + beta                            # (Cout,)
    return w_eff, b_eff


def build_params(key, num_classes):
    ks = jax.random.split(key, 7)
    w1, b1 = init_conv(ks[0], C1, C_LOCAL + C_GLOBAL)            # conv1: 1088 -> 512
    bn1 = init_bn(ks[1], C1)
    w2, b2 = init_conv(ks[2], C2, C1)
    bn2 = init_bn(ks[3], C2)
    w3, b3 = init_conv(ks[4], C3, C2)
    bn3 = init_bn(ks[5], C3)
    w4, b4 = init_conv(ks[6], num_classes, C3)

    raw = dict(w1=w1, b1=b1, bn1=bn1, w2=w2, b2=b2, bn2=bn2,
               w3=w3, b3=b3, bn3=bn3, w4=w4, b4=b4)

    # Fused / kernel-layout parameters (channel-major, bf16 weights).
    w1e, b1e = fold_conv_bn(w1, b1, bn1)                         # (512, 1088), (512,)
    w2e, b2e = fold_conv_bn(w2, b2, bn2)
    w3e, b3e = fold_conv_bn(w3, b3, bn3)

    c4_pad = max(8, -(-num_classes // 8) * 8)                    # pad classes to 8 sublanes
    w4e = jnp.zeros((c4_pad, C3), jnp.float32).at[:num_classes].set(w4)
    b4e = jnp.zeros((c4_pad,), jnp.float32).at[:num_classes].set(b4)

    fused = dict(
        w1a=w1e[:, :C_LOCAL].astype(jnp.bfloat16),               # (512, 64)
        w1b=w1e[:, C_LOCAL:],                                    # (512, 1024) fp32, wrapper-side
        b1=b1e,                                                  # (512,)      fp32, wrapper-side
        w2=w2e.astype(jnp.bfloat16), b2=b2e.reshape(C2, 1),
        w3=w3e.astype(jnp.bfloat16), b3=b3e.reshape(C3, 1),
        w4=w4e.astype(jnp.bfloat16), b4=b4e.reshape(c4_pad, 1),
    )
    return raw, fused


# ---------------------------- pure-JAX reference ----------------------------

def reference_forward(x, global_features, raw, num_points, num_classes):
    B = x.shape[0]
    gf = jnp.broadcast_to(global_features.reshape(B, C_GLOBAL, 1),
                          (B, C_GLOBAL, num_points))
    h = jnp.concatenate([x, gf], axis=1)                         # (B, 1088, N)

    def conv_bn_relu(h, w, b, bn):
        gamma, beta, mean, var = bn
        y = jnp.einsum('oc,bcn->bon', w, h) + b[None, :, None]
        y = gamma[None, :, None] * (y - mean[None, :, None]) \
            / jnp.sqrt(var[None, :, None] + BN_EPS) + beta[None, :, None]
        return jnp.maximum(y, 0.0)

    h = conv_bn_relu(h, raw['w1'], raw['b1'], raw['bn1'])
    h = conv_bn_relu(h, raw['w2'], raw['b2'], raw['bn2'])
    h = conv_bn_relu(h, raw['w3'], raw['b3'], raw['bn3'])
    return jnp.einsum('oc,bcn->bon', raw['w4'], h) + raw['b4'][None, :, None]


# ---------------------------------- main ------------------------------------

if __name__ == "__main__":
    B = 2
    NUM_POINTS = 512
    NUM_CLASSES = 4

    key = jax.random.PRNGKey(0)
    k_x, k_g, k_p = jax.random.split(key, 3)

    x = jax.random.normal(k_x, (B, C_LOCAL, NUM_POINTS), jnp.float32)      # (2, 64, 512)
    global_features = jax.random.normal(k_g, (B, C_GLOBAL), jnp.float32)   # (2, 1024)

    raw, fused = build_params(k_p, NUM_CLASSES)

    fwd = jax.jit(functools.partial(segmentation_head_forward,
                                    num_classes=NUM_CLASSES, tn=512))
    out = jax.block_until_ready(fwd(x, global_features, fused))

    ref = jax.block_until_ready(
        reference_forward(x, global_features, raw, NUM_POINTS, NUM_CLASSES))

    assert out.shape == (B, NUM_CLASSES, NUM_POINTS), out.shape
    # bf16 matmuls (fp32 accumulation) vs fp32 reference -> relaxed tolerance.
    np.testing.assert_allclose(np.asarray(out), np.asarray(ref),
                               rtol=5e-2, atol=5e-2)

    print("KERNEL_OK")
</pallas_src>

<mosaic_0001>
module attributes {stable_mosaic.version = 11 : i64} {
  func.func @seg_head_kernel(%arg0: i32, %arg1: i32, %arg2: memref<1x64x512xbf16, #tpu.memory_space<vmem>>, %arg3: memref<1x512x1xf32, #tpu.memory_space<vmem>>, %arg4: memref<512x64xbf16, #tpu.memory_space<vmem>>, %arg5: memref<256x512xbf16, #tpu.memory_space<vmem>>, %arg6: memref<256x1xf32, #tpu.memory_space<vmem>>, %arg7: memref<128x256xbf16, #tpu.memory_space<vmem>>, %arg8: memref<128x1xf32, #tpu.memory_space<vmem>>, %arg9: memref<8x128xbf16, #tpu.memory_space<vmem>>, %arg10: memref<8x1xf32, #tpu.memory_space<vmem>>, %arg11: memref<1x8x512xf32, #tpu.memory_space<vmem>>) attributes {dimension_semantics = [#tpu.dimension_semantics<parallel>, #tpu.dimension_semantics<parallel>], iteration_bounds = array<i64: 2, 1>, scalar_prefetch = 0 : i64, scratch_operands = 0 : i64, tpu.core_type = #tpu.core_type<tc>, window_params = [{transform_indices = @transform_0, window_bounds = array<i64: 1, 64, 512>}, {transform_indices = @transform_1, window_bounds = array<i64: 1, 512, 1>}, {pipeline_mode = #tpu.pipeline_mode<synchronous>, transform_indices = @transform_2, window_bounds = array<i64: 512, 64>}, {pipeline_mode = #tpu.pipeline_mode<synchronous>, transform_indices = @transform_3, window_bounds = array<i64: 256, 512>}, {pipeline_mode = #tpu.pipeline_mode<synchronous>, transform_indices = @transform_4, window_bounds = array<i64: 256, 1>}, {pipeline_mode = #tpu.pipeline_mode<synchronous>, transform_indices = @transform_5, window_bounds = array<i64: 128, 256>}, {pipeline_mode = #tpu.pipeline_mode<synchronous>, transform_indices = @transform_6, window_bounds = array<i64: 128, 1>}, {pipeline_mode = #tpu.pipeline_mode<synchronous>, transform_indices = @transform_7, window_bounds = array<i64: 8, 128>}, {pipeline_mode = #tpu.pipeline_mode<synchronous>, transform_indices = @transform_8, window_bounds = array<i64: 8, 1>}, {transform_indices = @transform_9, window_bounds = array<i64: 1, 8, 512>}]} {
    %c0 = arith.constant 0 : index
    %c0_0 = arith.constant 0 : index
    %c0_1 = arith.constant 0 : index
    %0 = vector.load %arg2[%c0, %c0_0, %c0_1] : memref<1x64x512xbf16, #tpu.memory_space<vmem>>, vector<1x64x512xbf16>
    %1 = vector.shape_cast %0 : vector<1x64x512xbf16> to vector<64x512xbf16>
    %c0_2 = arith.constant 0 : index
    %c0_3 = arith.constant 0 : index
    %c0_4 = arith.constant 0 : index
    %2 = vector.load %arg3[%c0_2, %c0_3, %c0_4] : memref<1x512x1xf32, #tpu.memory_space<vmem>>, vector<1x512x1xf32>
    %3 = vector.shape_cast %2 : vector<1x512x1xf32> to vector<512x1xf32>
    %c0_5 = arith.constant 0 : index
    %c0_6 = arith.constant 0 : index
    %4 = vector.load %arg4[%c0_5, %c0_6] : memref<512x64xbf16, #tpu.memory_space<vmem>>, vector<512x64xbf16>
    %cst = arith.constant dense<0.000000e+00> : vector<512x512xf32>
    %5 = tpu.matmul %4, %1, %cst {dimension_numbers = #tpu.dot_dimension_numbers<[1], [0], [0], [1], [0, 0, 1, 1], [], []>} : vector<512x64xbf16>, vector<64x512xbf16>, vector<512x512xf32> -> vector<512x512xf32>
    %6 = vector.broadcast %3 : vector<512x1xf32> to vector<512x512xf32>
    %7 = arith.addf %5, %6 : vector<512x512xf32>
    %cst_7 = arith.constant 0.000000e+00 : f32
    %8 = vector.broadcast %cst_7 : f32 to vector<512x512xf32>
    %9 = arith.maximumf %7, %8 : vector<512x512xf32>
    %10 = arith.truncf %9 : vector<512x512xf32> to vector<512x512xbf16>
    %c0_8 = arith.constant 0 : index
    %c0_9 = arith.constant 0 : index
    %11 = vector.load %arg5[%c0_8, %c0_9] : memref<256x512xbf16, #tpu.memory_space<vmem>>, vector<256x512xbf16>
    %cst_10 = arith.constant dense<0.000000e+00> : vector<256x512xf32>
    %12 = tpu.matmul %11, %10, %cst_10 {dimension_numbers = #tpu.dot_dimension_numbers<[1], [0], [0], [1], [0, 0, 1, 1], [], []>} : vector<256x512xbf16>, vector<512x512xbf16>, vector<256x512xf32> -> vector<256x512xf32>
    %c0_11 = arith.constant 0 : index
    %c0_12 = arith.constant 0 : index
    %13 = vector.load %arg6[%c0_11, %c0_12] : memref<256x1xf32, #tpu.memory_space<vmem>>, vector<256x1xf32>
    %14 = vector.broadcast %13 : vector<256x1xf32> to vector<256x512xf32>
    %15 = arith.addf %12, %14 : vector<256x512xf32>
    %cst_13 = arith.constant 0.000000e+00 : f32
    %16 = vector.broadcast %cst_13 : f32 to vector<256x512xf32>
    %17 = arith.maximumf %15, %16 : vector<256x512xf32>
    %18 = arith.truncf %17 : vector<256x512xf32> to vector<256x512xbf16>
    %c0_14 = arith.constant 0 : index
    %c0_15 = arith.constant 0 : index
    %19 = vector.load %arg7[%c0_14, %c0_15] : memref<128x256xbf16, #tpu.memory_space<vmem>>, vector<128x256xbf16>
    %cst_16 = arith.constant dense<0.000000e+00> : vector<128x512xf32>
    %20 = tpu.matmul %19, %18, %cst_16 {dimension_numbers = #tpu.dot_dimension_numbers<[1], [0], [0], [1], [0, 0, 1, 1], [], []>} : vector<128x256xbf16>, vector<256x512xbf16>, vector<128x512xf32> -> vector<128x512xf32>
    %c0_17 = arith.constant 0 : index
    %c0_18 = arith.constant 0 : index
    %21 = vector.load %arg8[%c0_17, %c0_18] : memref<128x1xf32, #tpu.memory_space<vmem>>, vector<128x1xf32>
    %22 = vector.broadcast %21 : vector<128x1xf32> to vector<128x512xf32>
    %23 = arith.addf %20, %22 : vector<128x512xf32>
    %cst_19 = arith.constant 0.000000e+00 : f32
    %24 = vector.broadcast %cst_19 : f32 to vector<128x512xf32>
    %25 = arith.maximumf %23, %24 : vector<128x512xf32>
    %26 = arith.truncf %25 : vector<128x512xf32> to vector<128x512xbf16>
    %c0_20 = arith.constant 0 : index
    %c0_21 = arith.constant 0 : index
    %27 = vector.load %arg9[%c0_20, %c0_21] : memref<8x128xbf16, #tpu.memory_space<vmem>>, vector<8x128xbf16>
    %cst_22 = arith.constant dense<0.000000e+00> : vector<8x512xf32>
    %28 = tpu.matmul %27, %26, %cst_22 {dimension_numbers = #tpu.dot_dimension_numbers<[1], [0], [0], [1], [0, 0, 1, 1], [], []>} : vector<8x128xbf16>, vector<128x512xbf16>, vector<8x512xf32> -> vector<8x512xf32>
    %c0_23 = arith.constant 0 : index
    %c0_24 = arith.constant 0 : index
    %29 = vector.load %arg10[%c0_23, %c0_24] : memref<8x1xf32, #tpu.memory_space<vmem>>, vector<8x1xf32>
    %30 = vector.broadcast %29 : vector<8x1xf32> to vector<8x512xf32>
    %31 = arith.addf %28, %30 : vector<8x512xf32>
    %c0_25 = arith.constant 0 : index
    %c0_26 = arith.constant 0 : index
    %c0_27 = arith.constant 0 : index
    %32 = vector.load %arg11[%c0_25, %c0_26, %c0_27] : memref<1x8x512xf32, #tpu.memory_space<vmem>>, vector<1x8x512xf32>
    %33 = vector.shape_cast %32 : vector<1x8x512xf32> to vector<8x512xf32>
    %34 = vector.shape_cast %31 : vector<8x512xf32> to vector<1x8x512xf32>
    tpu.vector_store %arg11[%c0_25, %c0_26, %c0_27], %34 {strides = array<i32>} : memref<1x8x512xf32, #tpu.memory_space<vmem>>, vector<1x8x512xf32>,
    return
  }
  func.func @transform_0(%arg0: i32, %arg1: i32) -> (i32, i32, i32) {
    %c0_i32 = arith.constant 0 : i32
    %c0_i32_0 = arith.constant 0 : i32
    return %arg0, %c0_i32, %arg1 : i32, i32, i32
  }
  func.func @transform_1(%arg0: i32, %arg1: i32) -> (i32, i32, i32) {
    %c0_i32 = arith.constant 0 : i32
    %c0_i32_0 = arith.constant 0 : i32
    %c0_i32_1 = arith.constant 0 : i32
    return %arg0, %c0_i32, %c0_i32_0 : i32, i32, i32
  }
  func.func @transform_2(%arg0: i32, %arg1: i32) -> (i32, i32) {
    %c0_i32 = arith.constant 0 : i32
    %c0_i32_0 = arith.constant 0 : i32
    %c0_i32_1 = arith.constant 0 : i32
    return %c0_i32, %c0_i32_0 : i32, i32
  }
  func.func @transform_3(%arg0: i32, %arg1: i32) -> (i32, i32) {
    %c0_i32 = arith.constant 0 : i32
    %c0_i32_0 = arith.constant 0 : i32
    %c0_i32_1 = arith.constant 0 : i32
    return %c0_i32, %c0_i32_0 : i32, i32
  }
  func.func @transform_4(%arg0: i32, %arg1: i32) -> (i32, i32) {
    %c0_i32 = arith.constant 0 : i32
    %c0_i32_0 = arith.constant 0 : i32
    %c0_i32_1 = arith.constant 0 : i32
    return %c0_i32, %c0_i32_0 : i32, i32
  }
  func.func @transform_5(%arg0: i32, %arg1: i32) -> (i32, i32) {
    %c0_i32 = arith.constant 0 : i32
    %c0_i32_0 = arith.constant 0 : i32
    %c0_i32_1 = arith.constant 0 : i32
    return %c0_i32, %c0_i32_0 : i32, i32
  }
  func.func @transform_6(%arg0: i32, %arg1: i32) -> (i32, i32) {
    %c0_i32 = arith.constant 0 : i32
    %c0_i32_0 = arith.constant 0 : i32
    %c0_i32_1 = arith.constant 0 : i32
    return %c0_i32, %c0_i32_0 : i32, i32
  }
  func.func @transform_7(%arg0: i32, %arg1: i32) -> (i32, i32) {
    %c0_i32 = arith.constant 0 : i32
    %c0_i32_0 = arith.constant 0 : i32
    %c0_i32_1 = arith.constant 0 : i32
    return %c0_i32, %c0_i32_0 : i32, i32
  }
  func.func @transform_8(%arg0: i32, %arg1: i32) -> (i32, i32) {
    %c0_i32 = arith.constant 0 : i32
    %c0_i32_0 = arith.constant 0 : i32
    %c0_i32_1 = arith.constant 0 : i32
    return %c0_i32, %c0_i32_0 : i32, i32
  }
  func.func @transform_9(%arg0: i32, %arg1: i32) -> (i32, i32, i32) {
    %c0_i32 = arith.constant 0 : i32
    %c0_i32_0 = arith.constant 0 : i32
    return %arg0, %c0_i32, %arg1 : i32, i32, i32
  }
}

</mosaic_0001>

<bundles_post_ra>
// kernel: segmentation_head_forward.1
= control target key start
LH: loop header
LB: loop body
LE: loop exit
PB: predicated region body
PF: predicated region fallthrough
CT: control target
= control target key end

     0   :  { %s5272_s30 = smov 0   ;;  %s5274_s10 = smov 0   ;;  %s6105_s0 = inlined_call_operand.vmem [shape: bf16[2,64,512], index: 0, kind: input, shape index: {}]   ;;  %s6106_s1 = inlined_call_operand.vmem [shape: f32[2,512,1], index: 1, kind: input, shape index: {}]   ;;  %s6107_s2 = inlined_call_operand.vmem [shape: bf16[512,64], index: 2, kind: input, shape index: {}]   ;;  %s6108_s3 = inlined_call_operand.vmem [shape: bf16[256,512], index: 3, kind: input, shape index: {}]   ;;  %s6109_s4 = inlined_call_operand.vmem [shape: f32[256,1], index: 4, kind: input, shape index: {}]   ;;  %s6110_s5 = inlined_call_operand.vmem [shape: bf16[128,256], index: 5, kind: input, shape index: {}]   ;;  %s6111_s6 = inlined_call_operand.vmem [shape: f32[128,1], index: 6, kind: input, shape index: {}]   ;;  %s6112_s7 = inlined_call_operand.vmem [shape: bf16[8,128], index: 7, kind: input, shape index: {}]   ;;  %s6113_s8 = inlined_call_operand.vmem [shape: f32[8,1], index: 8, kind: input, shape index: {}]   ;;  %s6114_s9 = inlined_call_operand.vmem [shape: f32[2,8,512], index: 9, kind: output, shape index: {}]  }
   0x1   :  { %s5276_s11 = smov 0  }
   0x2 LB: > { %s31_s12 = sadd.s32 1, %s5215_s10  ;;  %p4534_p0 = scmp.ge.s32.totalorder %s5219_s11, 1  ;;  %s5219_s11 = sphi %s5276_s11, %s19_s11   ;;  %s5215_s10 = sphi %s5274_s10, %s6116_s10   ;;  %s5211_s30 = sphi %s5272_s30, %s6115_s30  }
   0x3   : > { %p33_p1 = scmp.ge.s32.totalorder %s31_s12, 2  ;;  %p318_p2 = scmp.lt.s32.totalorder %s5219_s11, 3 }
   0x5   : > { %s6118_s12 = smov (%p33_p1, %s31_s12), 0  ;;  %p319_p3 = pnand %p4534_p0, %p318_p2 }
   0x6   : > { %p368_p4 = scmp.lt.s32.totalorder (!%p319_p3), %s5211_s30, 1  ;;  %v5221_v0 = vmov (!%p319_p3), 0   ;;  %v5045_v27 = vld [vmem:[%s6107_s2] sm:$0xff] (!%p319_p3)   ;;  %vm1097_vm0 = vcmask (!%p319_p3), 523264   ;;  %v5046_v32 = vld [vmem:[%s6107_s2 + $0x8] sm:$0xff] (!%p319_p3)   ;;  %v5047_v37 = vld [vmem:[%s6107_s2 + $0x10] sm:$0xff] (!%p319_p3)  }
   0x7   : > { %322 = sbr.rel (%p319_p3) target bundleno = 1350 (0x546), region = 56  ;;  %5020 = vset.pattern.permute.xlu1 (!%p319_p3), %v5221_v0  ;;  %5019 = vset.pattern.permute.xlu0 (!%p319_p3), %v5221_v0  ;;  %v5048_v42 = vld [vmem:[%s6107_s2 + $0x18] sm:$0xff] (!%p319_p3)   ;;  %v5049_v47 = vld [vmem:[%s6107_s2 + $0x20] sm:$0xff] (!%p319_p3)   ;;  %v5050_v52 = vld [vmem:[%s6107_s2 + $0x28] sm:$0xff] (!%p319_p3)  }
   0x8   : > { %1226 = vmatprep.mubr.bf16.mxu0 (!%p319_p3), %v5221_v0  ;;  %1579 = vmatprep.mubr.bf16.mxu1 (!%p319_p3), %v5221_v0  ;;  %v5051_v57 = vld [vmem:[%s6107_s2 + $0x30] sm:$0xff] (!%p319_p3)   ;;  %v5052_v62 = vld [vmem:[%s6107_s2 + $0x38] sm:$0xff] (!%p319_p3)  }
   0xe   : > { %s6120_s30 = smov (!%p368_p4, %s5211_s30), 1 }
   0xf   : > { %s4736_s13 = sshll.u32 %s6120_s30, 9  ;;  %s4735_s14 = sshll.u32 %s6120_s30, 7 }
  0x10   : > { %s5301_s17 = scalar_lea.vmem %s6106_s1, %s4736_s13  ;;  %s5306_s20 = scalar_lea.vmem %s6105_s0, %s4735_s14 }
  0x11   : > { %v411_v1 = vld [vmem:[%s5301_s17 + $0x10] sm:$0xff]  ;;  %v409_v2 = vld [vmem:[%s5301_s17] sm:$0xff]  ;;  %v5023_v4 = vld [vmem:[%s5306_s20 + $0xc] ss:$16 sps:$4 sm:$0xff]   ;;  %s4737_s23 = sshll.u32 %s6120_s30, 5 }
  0x12   : > { %549 = vperm.xlu1 %5020, %v411_v1   ;;  %539 = vperm.xlu0 %5019, %v409_v2   ;;  %v5021_v3 = vld [vmem:[%s5306_s20 + $0x4] ss:$16 sps:$4 sm:$0xff]   ;;  %v5025_v5 = vld [vmem:[%s5306_s20] ss:$16 sps:$4 sm:$0xff]   ;;  %v5026_v6 = vld [vmem:[%s5306_s20 + $0x8] ss:$16 sps:$4 sm:$0xff]   ;;  %s390_s26 = scalar_lea.vmem %s6114_s9, %s4737_s23 }
  0x13   : > { %1194 = vmatprep.subr.bf16.mxu0 %v5021_v3  ;;  %v412_v7 = vld [vmem:[%s5301_s17 + $0x18] sm:$0xff]  ;;  %v410_v8 = vld [vmem:[%s5301_s17 + $0x8] sm:$0xff]  ;;  %1547 = vmatprep.subr.bf16.mxu1 %v5023_v4  ;;  %v5027_v9 = vld [vmem:[%s5306_s20 + $0x24] ss:$16 sps:$4 sm:$0xff]  }
  0x14   : > { %1195 = vmatpush1.bf16.msra.mxu0 %v5025_v5  ;;  %1548 = vmatpush1.bf16.msra.mxu1 %v5026_v6  ;;  %v5029_v10 = vld [vmem:[%s5306_s20 + $0x2c] ss:$16 sps:$4 sm:$0xff]   ;;  %v5031_v11 = vld [vmem:[%s5306_s20 + $0x20] ss:$16 sps:$4 sm:$0xff]   ;;  %v5032_v12 = vld [vmem:[%s5306_s20 + $0x28] ss:$16 sps:$4 sm:$0xff]  }
  0x15   : > { %1196 = vmatprep.subr.bf16.mxu0 %v5027_v9  ;;  %v414_v13 = vld [vmem:[%s5301_s17 + $0x28] sm:$0xff]  ;;  %1549 = vmatprep.subr.bf16.mxu1 %v5029_v10  ;;  %v413_v14 = vld [vmem:[%s5301_s17 + $0x20] sm:$0xff]  ;;  %v416_v19 = vld [vmem:[%s5301_s17 + $0x38] sm:$0xff] }
  0x16   : > { %554 = vperm.xlu1 %5020, %v412_v7   ;;  %544 = vperm.xlu0 %5019, %v410_v8   ;;  %v5033_v15 = vld [vmem:[%s5306_s20 + $0x44] ss:$16 sps:$4 sm:$0xff]   ;;  %v5035_v16 = vld [vmem:[%s5306_s20 + $0x4c] ss:$16 sps:$4 sm:$0xff]   ;;  %v5037_v17 = vld [vmem:[%s5306_s20 + $0x40] ss:$16 sps:$4 sm:$0xff]  }
  0x17   : > { %v5038_v18 = vld [vmem:[%s5306_s20 + $0x48] ss:$16 sps:$4 sm:$0xff]   ;;  %v415_v20 = vld [vmem:[%s5301_s17 + $0x30] sm:$0xff]  ;;  %v5041_v22 = vld [vmem:[%s5306_s20 + $0x6c] ss:$16 sps:$4 sm:$0xff]  }
  0x18   : > { %1197 = vmatpush1.bf16.msra.mxu0 %v5031_v11  ;;  %1550 = vmatpush1.bf16.msra.mxu1 %v5032_v12  ;;  %v5039_v21 = vld [vmem:[%s5306_s20 + $0x64] ss:$16 sps:$4 sm:$0xff]   ;;  %v5043_v23 = vld [vmem:[%s5306_s20 + $0x60] ss:$16 sps:$4 sm:$0xff]   ;;  %v5044_v24 = vld [vmem:[%s5306_s20 + $0x68] ss:$16 sps:$4 sm:$0xff]  }
  0x19   : > { %1198 = vmatprep.subr.bf16.mxu0 %v5033_v15  ;;  %1551 = vmatprep.subr.bf16.mxu1 %v5035_v16  ;;  %v418_v25 = vld [vmem:[%s5301_s17 + $0x48] sm:$0xff]  ;;  %v417_v26 = vld [vmem:[%s5301_s17 + $0x40] sm:$0xff]  ;;  %v420_v28 = vld [vmem:[%s5301_s17 + $0x58] sm:$0xff] }
  0x1a   : > { %564 = vperm.xlu1 %5020, %v414_v13   ;;  %559 = vperm.xlu0 %5019, %v413_v14   ;;  %v419_v29 = vld [vmem:[%s5301_s17 + $0x50] sm:$0xff]  ;;  %v422_v30 = vld [vmem:[%s5301_s17 + $0x68] sm:$0xff]  ;;  %v421_v31 = vld [vmem:[%s5301_s17 + $0x60] sm:$0xff] }
  0x1b   : > { %v424_v33 = vld [vmem:[%s5301_s17 + $0x78] sm:$0xff]  ;;  %v423_v34 = vld [vmem:[%s5301_s17 + $0x70] sm:$0xff]  ;;  %v426_v35 = vld [vmem:[%s5301_s17 + $0x88] sm:$0xff] }
  0x1c   : > { %1199 = vmatpush1.bf16.msra.mxu0 %v5037_v17  ;;  %1552 = vmatpush1.bf16.msra.mxu1 %v5038_v18  ;;  %v425_v36 = vld [vmem:[%s5301_s17 + $0x80] sm:$0xff]  ;;  %v428_v38 = vld [vmem:[%s5301_s17 + $0x98] sm:$0xff]  ;;  %v427_v39 = vld [vmem:[%s5301_s17 + $0x90] sm:$0xff] }
  0x1d   : > { %1200 = vmatprep.subr.bf16.mxu0 %v5039_v21  ;;  %1553 = vmatprep.subr.bf16.mxu1 %v5041_v22  ;;  %v430_v40 = vld [vmem:[%s5301_s17 + $0xa8] sm:$0xff]  ;;  %v429_v41 = vld [vmem:[%s5301_s17 + $0xa0] sm:$0xff]  ;;  %v432_v43 = vld [vmem:[%s5301_s17 + $0xb8] sm:$0xff] }
  0x1e   : > { %574 = vperm.xlu1 %5020, %v416_v19   ;;  %569 = vperm.xlu0 %5019, %v415_v20   ;;  %v431_v44 = vld [vmem:[%s5301_s17 + $0xb0] sm:$0xff]  ;;  %v434_v45 = vld [vmem:[%s5301_s17 + $0xc8] sm:$0xff]  ;;  %v433_v46 = vld [vmem:[%s5301_s17 + $0xc0] sm:$0xff] }
  0x1f   : > { %v436_v48 = vld [vmem:[%s5301_s17 + $0xd8] sm:$0xff]  ;;  %v435_v49 = vld [vmem:[%s5301_s17 + $0xd0] sm:$0xff]  ;;  %v438_v50 = vld [vmem:[%s5301_s17 + $0xe8] sm:$0xff] }
  0x20   : > { %1201 = vmatpush1.bf16.msra.mxu0 %v5043_v23  ;;  %1554 = vmatpush1.bf16.msra.mxu1 %v5044_v24  ;;  %v437_v51 = vld [vmem:[%s5301_s17 + $0xe0] sm:$0xff]  ;;  %v440_v53 = vld [vmem:[%s5301_s17 + $0xf8] sm:$0xff]  ;;  %v439_v54 = vld [vmem:[%s5301_s17 + $0xf0] sm:$0xff] }
  0x21   : > { %v442_v55 = vld [vmem:[%s5301_s17 + $0x108] sm:$0xff]  ;;  %v441_v56 = vld [vmem:[%s5301_s17 + $0x100] sm:$0xff]  ;;  %v444_v58 = vld [vmem:[%s5301_s17 + $0x118] sm:$0xff] }
  0x22   : > { %584 = vperm.xlu1 %5020, %v418_v25   ;;  %579 = vperm.xlu0 %5019, %v417_v26   ;;  %v443_v59 = vld [vmem:[%s5301_s17 + $0x110] sm:$0xff]  ;;  %v446_v60 = vld [vmem:[%s5301_s17 + $0x128] sm:$0xff]  ;;  %v445_v61 = vld [vmem:[%s5301_s17 + $0x120] sm:$0xff] }
  0x23   : > { %4589 = vmatmul.mubr.msk.bf16.vlgmr.msra.gmra.mrb[0].mxu0 %vm1097_vm0, %v5045_v27  ;;  %4621 = vmatmul.mubr.msk.bf16.vlgmr.msra.gmra.mrb[0].mxu1 %vm1097_vm0, %v5045_v27  ;;  %v448_v63 = vld [vmem:[%s5301_s17 + $0x138] sm:$0xff]  ;;  %v447_v1 = vld [vmem:[%s5301_s17 + $0x130] sm:$0xff]  ;;  %v450_v2 = vld [vmem:[%s5301_s17 + $0x148] sm:$0xff] }
  0x24   : > { %1236 = vmatprep.mubr.bf16.mxu0 %v5221_v0  ;;  %1589 = vmatprep.mubr.bf16.mxu1 %v5221_v0  ;;  %v449_v3 = vld [vmem:[%s5301_s17 + $0x140] sm:$0xff]  ;;  %v452_v5 = vld [vmem:[%s5301_s17 + $0x158] sm:$0xff]  ;;  %v451_v6 = vld [vmem:[%s5301_s17 + $0x150] sm:$0xff] }
  0x25   : > { %v5053_v4 = vld [vmem:[%s6107_s2 + $0x40] sm:$0xff]   ;;  %v454_v7 = vld [vmem:[%s5301_s17 + $0x168] sm:$0xff]  ;;  %v456_v10 = vld [vmem:[%s5301_s17 + $0x178] sm:$0xff] }
  0x26   : > { %594 = vperm.xlu1 %5020, %v420_v28   ;;  %589 = vperm.xlu0 %5019, %v419_v29   ;;  %v453_v8 = vld [vmem:[%s5301_s17 + $0x160] sm:$0xff]  ;;  %v5054_v9 = vld [vmem:[%s6107_s2 + $0x48] sm:$0xff]   ;;  %v455_v11 = vld [vmem:[%s5301_s17 + $0x170] sm:$0xff] }
  0x27   : > { %v458_v12 = vld [vmem:[%s5301_s17 + $0x188] sm:$0xff]  ;;  %v457_v13 = vld [vmem:[%s5301_s17 + $0x180] sm:$0xff]  ;;  %v5055_v14 = vld [vmem:[%s6107_s2 + $0x50] sm:$0xff]  }
  0x28   : > { %v460_v15 = vld [vmem:[%s5301_s17 + $0x198] sm:$0xff]  ;;  %v459_v16 = vld [vmem:[%s5301_s17 + $0x190] sm:$0xff]  ;;  %v462_v17 = vld [vmem:[%s5301_s17 + $0x1a8] sm:$0xff] }
  0x29   : > { %v461_v18 = vld [vmem:[%s5301_s17 + $0x1a0] sm:$0xff]  ;;  %v5056_v19 = vld [vmem:[%s6107_s2 + $0x58] sm:$0xff]   ;;  %v463_v21 = vld [vmem:[%s5301_s17 + $0x1b0] sm:$0xff] }
  0x2a   : > { %604 = vperm.xlu1 %5020, %v422_v30   ;;  %599 = vperm.xlu0 %5019, %v421_v31   ;;  %v464_v20 = vld [vmem:[%s5301_s17 + $0x1b8] sm:$0xff]  ;;  %v466_v22 = vld [vmem:[%s5301_s17 + $0x1c8] sm:$0xff]  ;;  %v465_v23 = vld [vmem:[%s5301_s17 + $0x1c0] sm:$0xff] }
  0x2b   : > { %4590 = vmatmul.mubr.msk.bf16.gmra.mrb[4].mxu0 %vm1097_vm0, %v5046_v32  ;;  %4622 = vmatmul.mubr.msk.bf16.gmra.mrb[4].mxu1 %vm1097_vm0, %v5046_v32  ;;  %v5057_v24 = vld [vmem:[%s6107_s2 + $0x60] sm:$0xff]   ;;  %v468_v25 = vld [vmem:[%s5301_s17 + $0x1d8] sm:$0xff]  ;;  %v467_v26 = vld [vmem:[%s5301_s17 + $0x1d0] sm:$0xff] }
  0x2c   : > { %1246 = vmatprep.mubr.bf16.mxu0 %v5221_v0  ;;  %1599 = vmatprep.mubr.bf16.mxu1 %v5221_v0  ;;  %v470_v27 = vld [vmem:[%s5301_s17 + $0x1e8] sm:$0xff]  ;;  %v469_v28 = vld [vmem:[%s5301_s17 + $0x1e0] sm:$0xff]  ;;  %v472_v30 = vld [vmem:[%s5301_s17 + $0x1f8] sm:$0xff] }
  0x2d   : > { %v5058_v29 = vld [vmem:[%s6107_s2 + $0x68] sm:$0xff]   ;;  %v471_v31 = vld [vmem:[%s5301_s17 + $0x1f0] sm:$0xff] }
  0x2e   : > { %614 = vperm.xlu1 %5020, %v424_v33   ;;  %609 = vperm.xlu0 %5019, %v423_v34   ;;  %v2349_v32 = vld [vmem:[%s6109_s4 + $0x8] sm:$0xff]  ;;  %v2348_v33 = vld [vmem:[%s6109_s4] sm:$0xff]  ;;  %v5059_v34 = vld [vmem:[%s6107_s2 + $0x70] sm:$0xff]  }
  0x32   : > { %624 = vperm.xlu1 %5020, %v426_v35   ;;  %619 = vperm.xlu0 %5019, %v425_v36   ;;  %v2351_v35 = vld [vmem:[%s6109_s4 + $0x18] sm:$0xff]  ;;  %v2350_v36 = vld [vmem:[%s6109_s4 + $0x10] sm:$0xff] }
  0x33   : > { %4591 = vmatmul.mubr.msk.bf16.gmra.mrb[8].mxu0 %vm1097_vm0, %v5047_v37  ;;  %4623 = vmatmul.mubr.msk.bf16.gmra.mrb[8].mxu1 %vm1097_vm0, %v5047_v37  ;;  %v2353_v37 = vld [vmem:[%s6109_s4 + $0x28] sm:$0xff] }
  0x34   : > { %1256 = vmatprep.mubr.bf16.mxu0 %v5221_v0  ;;  %1609 = vmatprep.mubr.bf16.mxu1 %v5221_v0 }
  0x36   : > { %634 = vperm.xlu1 %5020, %v428_v38   ;;  %629 = vperm.xlu0 %5019, %v427_v39   ;;  %v2352_v38 = vld [vmem:[%s6109_s4 + $0x20] sm:$0xff]  ;;  %v5060_v39 = vld [vmem:[%s6107_s2 + $0x78] sm:$0xff]  }
  0x3a   : > { %644 = vperm.xlu1 %5020, %v430_v40   ;;  %639 = vperm.xlu0 %5019, %v429_v41   ;;  %v2355_v40 = vld [vmem:[%s6109_s4 + $0x38] sm:$0xff]  ;;  %v2354_v41 = vld [vmem:[%s6109_s4 + $0x30] sm:$0xff] }
  0x3b   : > { %4592 = vmatmul.mubr.msk.bf16.gmra.mrb[12].mxu0 %vm1097_vm0, %v5048_v42  ;;  %4624 = vmatmul.mubr.msk.bf16.gmra.mrb[12].mxu1 %vm1097_vm0, %v5048_v42  ;;  %v2357_v42 = vld [vmem:[%s6109_s4 + $0x48] sm:$0xff] }
  0x3c   : > { %1266 = vmatprep.mubr.bf16.mxu0 %v5221_v0  ;;  %1619 = vmatprep.mubr.bf16.mxu1 %v5221_v0 }
  0x3e   : > { %654 = vperm.xlu1 %5020, %v432_v43   ;;  %649 = vperm.xlu0 %5019, %v431_v44   ;;  %v2356_v43 = vld [vmem:[%s6109_s4 + $0x40] sm:$0xff] }
  0x3f   : > { %v5061_v44 = vld [vmem:[%s6107_s2 + $0x80] sm:$0xff]  }
  0x42   : > { %664 = vperm.xlu1 %5020, %v434_v45   ;;  %659 = vperm.xlu0 %5019, %v433_v46   ;;  %v2359_v45 = vld [vmem:[%s6109_s4 + $0x58] sm:$0xff]  ;;  %v2358_v46 = vld [vmem:[%s6109_s4 + $0x50] sm:$0xff] }
  0x43   : > { %4593 = vmatmul.mubr.msk.bf16.gmra.mrb[16].mxu0 %vm1097_vm0, %v5049_v47  ;;  %4625 = vmatmul.mubr.msk.bf16.gmra.mrb[16].mxu1 %vm1097_vm0, %v5049_v47  ;;  %v2361_v47 = vld [vmem:[%s6109_s4 + $0x68] sm:$0xff] }
  0x44   : > { %1276 = vmatprep.mubr.bf16.mxu0 %v5221_v0  ;;  %1629 = vmatprep.mubr.bf16.mxu1 %v5221_v0 }
  0x46   : > { %674 = vperm.xlu1 %5020, %v436_v48   ;;  %669 = vperm.xlu0 %5019, %v435_v49   ;;  %v2360_v48 = vld [vmem:[%s6109_s4 + $0x60] sm:$0xff]  ;;  %v5062_v49 = vld [vmem:[%s6107_s2 + $0x88] sm:$0xff]  }
  0x4a   : > { %684 = vperm.xlu1 %5020, %v438_v50   ;;  %679 = vperm.xlu0 %5019, %v437_v51   ;;  %v2363_v50 = vld [vmem:[%s6109_s4 + $0x78] sm:$0xff]  ;;  %v2362_v51 = vld [vmem:[%s6109_s4 + $0x70] sm:$0xff] }
  0x4b   : > { %4594 = vmatmul.mubr.msk.bf16.gmra.mrb[20].mxu0 %vm1097_vm0, %v5050_v52  ;;  %4626 = vmatmul.mubr.msk.bf16.gmra.mrb[20].mxu1 %vm1097_vm0, %v5050_v52  ;;  %v2365_v52 = vld [vmem:[%s6109_s4 + $0x88] sm:$0xff] }
  0x4c   : > { %1286 = vmatprep.mubr.bf16.mxu0 %v5221_v0  ;;  %1639 = vmatprep.mubr.bf16.mxu1 %v5221_v0 }
  0x4e   : > { %694 = vperm.xlu1 %5020, %v440_v53   ;;  %689 = vperm.xlu0 %5019, %v439_v54   ;;  %v2364_v53 = vld [vmem:[%s6109_s4 + $0x80] sm:$0xff]  ;;  %v5063_v54 = vld [vmem:[%s6107_s2 + $0x90] sm:$0xff]  }
  0x52   : > { %704 = vperm.xlu1 %5020, %v442_v55   ;;  %699 = vperm.xlu0 %5019, %v441_v56   ;;  %v2367_v55 = vld [vmem:[%s6109_s4 + $0x98] sm:$0xff]  ;;  %v2366_v56 = vld [vmem:[%s6109_s4 + $0x90] sm:$0xff] }
  0x53   : > { %4595 = vmatmul.mubr.msk.bf16.gmra.mrb[24].mxu0 %vm1097_vm0, %v5051_v57  ;;  %4627 = vmatmul.mubr.msk.bf16.gmra.mrb[24].mxu1 %vm1097_vm0, %v5051_v57  ;;  %v2369_v57 = vld [vmem:[%s6109_s4 + $0xa8] sm:$0xff] }
  0x54   : > { %1296 = vmatprep.mubr.bf16.mxu0 %v5221_v0  ;;  %1649 = vmatprep.mubr.bf16.mxu1 %v5221_v0 }
  0x56   : > { %714 = vperm.xlu1 %5020, %v444_v58   ;;  %709 = vperm.xlu0 %5019, %v443_v59   ;;  %v2368_v58 = vld [vmem:[%s6109_s4 + $0xa0] sm:$0xff]  ;;  %v5064_v59 = vld [vmem:[%s6107_s2 + $0x98] sm:$0xff]  }
  0x5a   : > { %724 = vperm.xlu1 %5020, %v446_v60   ;;  %719 = vperm.xlu0 %5019, %v445_v61   ;;  %v2371_v60 = vld [vmem:[%s6109_s4 + $0xb8] sm:$0xff]  ;;  %v2370_v61 = vld [vmem:[%s6109_s4 + $0xb0] sm:$0xff] }
  0x5b   : > { %4596 = vmatmul.mubr.msk.bf16.gmra.mrb[28].mxu0 %vm1097_vm0, %v5052_v62  ;;  %4628 = vmatmul.mubr.msk.bf16.gmra.mrb[28].mxu1 %vm1097_vm0, %v5052_v62  ;;  %v2373_v62 = vld [vmem:[%s6109_s4 + $0xc8] sm:$0xff] }
  0x5c   : > { %1306 = vmatprep.mubr.bf16.mxu0 %v5221_v0  ;;  %1659 = vmatprep.mubr.bf16.mxu1 %v5221_v0 }
  0x5e   : > { %734 = vperm.xlu1 %5020, %v448_v63   ;;  %729 = vperm.xlu0 %5019, %v447_v1   ;;  %v2372_v63 = vld [vmem:[%s6109_s4 + $0xc0] sm:$0xff] }
  0x5f   : > { %v5065_v1 = vld [vmem:[%s6107_s2 + $0xa0] sm:$0xff]  }
  0x62   : > { %744 = vperm.xlu1 %5020, %v450_v2   ;;  %739 = vperm.xlu0 %5019, %v449_v3   ;;  %v2375_v2 = vld [vmem:[%s6109_s4 + $0xd8] sm:$0xff]  ;;  %v2374_v3 = vld [vmem:[%s6109_s4 + $0xd0] sm:$0xff] }
  0x63   : > { %4597 = vmatmul.mubr.msk.bf16.gmra.mrb[32].mxu0 %vm1097_vm0, %v5053_v4  ;;  %4629 = vmatmul.mubr.msk.bf16.gmra.mrb[32].mxu1 %vm1097_vm0, %v5053_v4  ;;  %v2377_v4 = vld [vmem:[%s6109_s4 + $0xe8] sm:$0xff] }
  0x64   : > { %1316 = vmatprep.mubr.bf16.mxu0 %v5221_v0  ;;  %1669 = vmatprep.mubr.bf16.mxu1 %v5221_v0 }
  0x66   : > { %754 = vperm.xlu1 %5020, %v452_v5   ;;  %749 = vperm.xlu0 %5019, %v451_v6   ;;  %v2376_v5 = vld [vmem:[%s6109_s4 + $0xe0] sm:$0xff]  ;;  %v5066_v6 = vld [vmem:[%s6107_s2 + $0xa8] sm:$0xff]  }
  0x6a   : > { %764 = vperm.xlu1 %5020, %v454_v7   ;;  %759 = vperm.xlu0 %5019, %v453_v8  }
  0x6b   : > { %4598 = vmatmul.mubr.msk.bf16.gmra.mrb[36].mxu0 %vm1097_vm0, %v5054_v9  ;;  %4630 = vmatmul.mubr.msk.bf16.gmra.mrb[36].mxu1 %vm1097_vm0, %v5054_v9  ;;  %v2379_v9 = vld [vmem:[%s6109_s4 + $0xf8] sm:$0xff] }
  0x6c   : > { %1326 = vmatprep.mubr.bf16.mxu0 %v5221_v0  ;;  %1679 = vmatprep.mubr.bf16.mxu1 %v5221_v0 }
  0x6e   : > { %774 = vperm.xlu1 %5020, %v456_v10   ;;  %769 = vperm.xlu0 %5019, %v455_v11   ;;  %v2378_v10 = vld [vmem:[%s6109_s4 + $0xf0] sm:$0xff] }
  0x72   : > { %784 = vperm.xlu1 %5020, %v458_v12   ;;  %779 = vperm.xlu0 %5019, %v457_v13   ;;  %v3841_v12 = vld [vmem:[%s6111_s6 + $0x8] sm:$0xff] }
  0x73   : > { %4599 = vmatmul.mubr.msk.bf16.gmra.mrb[40].mxu0 %vm1097_vm0, %v5055_v14  ;;  %4631 = vmatmul.mubr.msk.bf16.gmra.mrb[40].mxu1 %vm1097_vm0, %v5055_v14  ;;  %v3840_v14 = vld [vmem:[%s6111_s6] sm:$0xff] }
  0x74   : > { %1336 = vmatprep.mubr.bf16.mxu0 %v5221_v0  ;;  %1689 = vmatprep.mubr.bf16.mxu1 %v5221_v0 }
  0x76   : > { %794 = vperm.xlu1 %5020, %v460_v15   ;;  %789 = vperm.xlu0 %5019, %v459_v16   ;;  %v5067_v15 = vld [vmem:[%s6107_s2 + $0xb0] sm:$0xff]   ;;  %v3843_v16 = vld [vmem:[%s6111_s6 + $0x18] sm:$0xff] }
  0x7a   : > { %804 = vperm.xlu1 %5020, %v462_v17   ;;  %799 = vperm.xlu0 %5019, %v461_v18   ;;  %v3842_v17 = vld [vmem:[%s6111_s6 + $0x10] sm:$0xff] }
  0x7b   : > { %4600 = vmatmul.mubr.msk.bf16.gmra.mrb[44].mxu0 %vm1097_vm0, %v5056_v19  ;;  %4632 = vmatmul.mubr.msk.bf16.gmra.mrb[44].mxu1 %vm1097_vm0, %v5056_v19 }
  0x7c   : > { %1346 = vmatprep.mubr.bf16.mxu0 %v5221_v0  ;;  %1699 = vmatprep.mubr.bf16.mxu1 %v5221_v0 }
  0x7e   : > { %814 = vperm.xlu1 %5020, %v464_v20   ;;  %809 = vperm.xlu0 %5019, %v463_v21   ;;  %v3845_v20 = vld [vmem:[%s6111_s6 + $0x28] sm:$0xff]  ;;  %v3844_v21 = vld [vmem:[%s6111_s6 + $0x20] sm:$0xff] }
  0x82   : > { %824 = vperm.xlu1 %5020, %v466_v22   ;;  %819 = vperm.xlu0 %5019, %v465_v23   ;;  %v5068_v22 = vld [vmem:[%s6107_s2 + $0xb8] sm:$0xff]  }
  0x83   : > { %4601 = vmatmul.mubr.msk.bf16.gmra.mrb[48].mxu0 %vm1097_vm0, %v5057_v24  ;;  %4633 = vmatmul.mubr.msk.bf16.gmra.mrb[48].mxu1 %vm1097_vm0, %v5057_v24  ;;  %v3847_v24 = vld [vmem:[%s6111_s6 + $0x38] sm:$0xff] }
  0x84   : > { %1356 = vmatprep.mubr.bf16.mxu0 %v5221_v0  ;;  %1709 = vmatprep.mubr.bf16.mxu1 %v5221_v0 }
  0x86   : > { %834 = vperm.xlu1 %5020, %v468_v25   ;;  %829 = vperm.xlu0 %5019, %v467_v26   ;;  %v3846_v26 = vld [vmem:[%s6111_s6 + $0x30] sm:$0xff] }
  0x8a   : > { %844 = vperm.xlu1 %5020, %v470_v27   ;;  %839 = vperm.xlu0 %5019, %v469_v28   ;;  %v3849_v27 = vld [vmem:[%s6111_s6 + $0x48] sm:$0xff]  ;;  %v3848_v28 = vld [vmem:[%s6111_s6 + $0x40] sm:$0xff] }
  0x8b   : > { %4602 = vmatmul.mubr.msk.bf16.gmra.mrb[52].mxu0 %vm1097_vm0, %v5058_v29  ;;  %4634 = vmatmul.mubr.msk.bf16.gmra.mrb[52].mxu1 %vm1097_vm0, %v5058_v29  ;;  %v5069_v29 = vld [vmem:[%s6107_s2 + $0xc0] sm:$0xff]  }
  0x8c   : > { %1366 = vmatprep.mubr.bf16.mxu0 %v5221_v0  ;;  %1719 = vmatprep.mubr.bf16.mxu1 %v5221_v0 }
  0x8e   : > { %854 = vperm.xlu1 %5020, %v472_v30   ;;  %849 = vperm.xlu0 %5019, %v471_v31  }
  0x91   : > { %v5628_v7 = vpop.permute.xlu0 %539  ;;  %v5630_v8 = vpop.permute.xlu1 %549 }
  0x92   : > { %2387 = vperm.xlu1 %5020, %v2349_v32   ;;  %2382 = vperm.xlu0 %5019, %v2348_v33   ;;  %v3851_v32 = vld [vmem:[%s6111_s6 + $0x58] sm:$0xff]  ;;  %v3850_v33 = vld [vmem:[%s6111_s6 + $0x50] sm:$0xff] }
  0x93   : > { %4603 = vmatmul.mubr.msk.bf16.gmra.mrb[56].mxu0 %vm1097_vm0, %v5059_v34  ;;  %4635 = vmatmul.mubr.msk.bf16.gmra.mrb[56].mxu1 %vm1097_vm0, %v5059_v34 }
  0x94   : > { %1376 = vmatprep.mubr.bf16.mxu0 %v5221_v0  ;;  %1729 = vmatprep.mubr.bf16.mxu1 %v5221_v0 }
  0x95   : > { %v5642_v11 = vpop.permute.xlu0 %544  ;;  %v5647_v13 = vpop.permute.xlu1 %554 }
  0x96   : > { %2397 = vperm.xlu1 %5020, %v2351_v35   ;;  %2392 = vperm.xlu0 %5019, %v2350_v36   ;;  %v3853_v35 = vld [vmem:[%s6111_s6 + $0x68] sm:$0xff] }
  0x99   : > { %v5662_v18 = vpop.permute.xlu0 %559  ;;  %v5666_v19 = vpop.permute.xlu1 %564 }
  0x9a   : > { %2407 = vperm.xlu1 %5020, %v2353_v37   ;;  %2402 = vperm.xlu0 %5019, %v2352_v38   ;;  %v3852_v37 = vld [vmem:[%s6111_s6 + $0x60] sm:$0xff]  ;;  %v5070_v38 = vld [vmem:[%s6107_s2 + $0xc8] sm:$0xff]  }
  0x9b   : > { %4604 = vmatmul.mubr.msk.bf16.gmra.mrb[60].mxu0 %vm1097_vm0, %v5060_v39  ;;  %4636 = vmatmul.mubr.msk.bf16.gmra.mrb[60].mxu1 %vm1097_vm0, %v5060_v39  ;;  %v3855_v39 = vld [vmem:[%s6111_s6 + $0x78] sm:$0xff] }
  0x9c   : > { %1386 = vmatprep.mubr.bf16.mxu0 %v5221_v0  ;;  %1739 = vmatprep.mubr.bf16.mxu1 %v5221_v0 }
  0x9d   : > { %v5678_v23 = vpop.permute.xlu0 %569  ;;  %v5683_v25 = vpop.permute.xlu1 %574 }
  0x9e   : > { %2417 = vperm.xlu1 %5020, %v2355_v40   ;;  %2412 = vperm.xlu0 %5019, %v2354_v41   ;;  %v3854_v40 = vld [vmem:[%s6111_s6 + $0x70] sm:$0xff] }
  0xa1   : > { %v5701_v30 = vpop.permute.xlu0 %579  ;;  %v5703_v31 = vpop.permute.xlu1 %584 }
  0xa2   : > { %2427 = vperm.xlu1 %5020, %v2357_v42   ;;  %2422 = vperm.xlu0 %5019, %v2356_v43   ;;  %v4339_v43 = vld [vmem:[%s6113_s8] sm:$0xff] }
  0xa3   : > { %4605 = vmatmul.mubr.msk.bf16.gmra.mrb[64].mxu0 %vm1097_vm0, %v5061_v44  ;;  %4637 = vmatmul.mubr.msk.bf16.gmra.mrb[64].mxu1 %vm1097_vm0, %v5061_v44  ;;  %v5071_v44 = vld [vmem:[%s6107_s2 + $0xd0] sm:$0xff]  }
  0xa4   : > { %1396 = vmatprep.mubr.bf16.mxu0 %v5221_v0  ;;  %1749 = vmatprep.mubr.bf16.mxu1 %v5221_v0 }
  0xa5   : > { %v5715_v34 = vpop.permute.xlu0 %589  ;;  %v5720_v36 = vpop.permute.xlu1 %594 }
  0xa6   : > { %2437 = vperm.xlu1 %5020, %v2359_v45   ;;  %2432 = vperm.xlu0 %5019, %v2358_v46  }
  0xa9   : > { %v5735_v41 = vpop.permute.xlu0 %599  ;;  %v5739_v42 = vpop.permute.xlu1 %604 }
  0xaa   : > { %2447 = vperm.xlu1 %5020, %v2361_v47   ;;  %2442 = vperm.xlu0 %5019, %v2360_v48  }
  0xab   : > { %4606 = vmatmul.mubr.msk.bf16.gmra.mrb[68].mxu0 %vm1097_vm0, %v5062_v49  ;;  %4638 = vmatmul.mubr.msk.bf16.gmra.mrb[68].mxu1 %vm1097_vm0, %v5062_v49  ;;  %v5072_v49 = vld [vmem:[%s6107_s2 + $0xd8] sm:$0xff]  }
  0xac   : > { %1406 = vmatprep.mubr.bf16.mxu0 %v5221_v0  ;;  %1759 = vmatprep.mubr.bf16.mxu1 %v5221_v0 }
  0xad   : > { %v5748_v45 = vpop.permute.xlu0 %609 }
  0xae   : > { %2457 = vperm.xlu1 %5020, %v2363_v50   ;;  %2452 = vperm.xlu0 %5019, %v2362_v51  }
  0xb2   : > { %2467 = vperm.xlu1 %5020, %v2365_v52   ;;  %2462 = vperm.xlu0 %5019, %v2364_v53  }
  0xb3   : > { %4607 = vmatmul.mubr.msk.bf16.gmra.mrb[72].mxu0 %vm1097_vm0, %v5063_v54  ;;  %4639 = vmatmul.mubr.msk.bf16.gmra.mrb[72].mxu1 %vm1097_vm0, %v5063_v54 }
  0xb4   : > { %1416 = vmatprep.mubr.bf16.mxu0 %v5221_v0  ;;  %1769 = vmatprep.mubr.bf16.mxu1 %v5221_v0 }
  0xb6   : > { %2477 = vperm.xlu1 %5020, %v2367_v55   ;;  %2472 = vperm.xlu0 %5019, %v2366_v56  }
  0xba   : > { %2487 = vperm.xlu1 %5020, %v2369_v57   ;;  %2482 = vperm.xlu0 %5019, %v2368_v58  }
  0xbb   : > { %4608 = vmatmul.mubr.msk.bf16.gmra.mrb[76].mxu0 %vm1097_vm0, %v5064_v59  ;;  %4640 = vmatmul.mubr.msk.bf16.gmra.mrb[76].mxu1 %vm1097_vm0, %v5064_v59 }
  0xbc   : > { %1426 = vmatprep.mubr.bf16.mxu0 %v5221_v0  ;;  %1779 = vmatprep.mubr.bf16.mxu1 %v5221_v0 }
  0xbe   : > { %2497 = vperm.xlu1 %5020, %v2371_v60   ;;  %2492 = vperm.xlu0 %5019, %v2370_v61  }
  0xc2   : > { %2507 = vperm.xlu1 %5020, %v2373_v62   ;;  %2502 = vperm.xlu0 %5019, %v2372_v63  }
  0xc3   : > { %4609 = vmatmul.mubr.msk.bf16.gmra.mrb[80].mxu0 %vm1097_vm0, %v5065_v1  ;;  %4641 = vmatmul.mubr.msk.bf16.gmra.mrb[80].mxu1 %vm1097_vm0, %v5065_v1 }
  0xc4   : > { %1436 = vmatprep.mubr.bf16.mxu0 %v5221_v0  ;;  %1789 = vmatprep.mubr.bf16.mxu1 %v5221_v0 }
  0xc6   : > { %2517 = vperm.xlu1 %5020, %v2375_v2   ;;  %2512 = vperm.xlu0 %5019, %v2374_v3  }
  0xca   : > { %2527 = vperm.xlu1 %5020, %v2377_v4   ;;  %2522 = vperm.xlu0 %5019, %v2376_v5  }
  0xcb   : > { %4610 = vmatmul.mubr.msk.bf16.gmra.mrb[84].mxu0 %vm1097_vm0, %v5066_v6  ;;  %4642 = vmatmul.mubr.msk.bf16.gmra.mrb[84].mxu1 %vm1097_vm0, %v5066_v6 }
  0xcc   : > { %1446 = vmatprep.mubr.bf16.mxu0 %v5221_v0  ;;  %1799 = vmatprep.mubr.bf16.mxu1 %v5221_v0 }
  0xce   : > { %2537 = vperm.xlu1 %5020, %v2379_v9   ;;  %2532 = vperm.xlu0 %5019, %v2378_v10  }
  0xd2   : > { %3863 = vperm.xlu1 %5020, %v3841_v12   ;;  %3858 = vperm.xlu0 %5019, %v3840_v14  }
  0xd3   : > { %4611 = vmatmul.mubr.msk.bf16.gmra.mrb[88].mxu0 %vm1097_vm0, %v5067_v15  ;;  %4643 = vmatmul.mubr.msk.bf16.gmra.mrb[88].mxu1 %vm1097_vm0, %v5067_v15 }
  0xd4   : > { %1456 = vmatprep.mubr.bf16.mxu0 %v5221_v0  ;;  %1809 = vmatprep.mubr.bf16.mxu1 %v5221_v0 }
  0xd6   : > { %3873 = vperm.xlu1 %5020, %v3843_v16   ;;  %3868 = vperm.xlu0 %5019, %v3842_v17  }
  0xda   : > { %3883 = vperm.xlu1 %5020, %v3845_v20   ;;  %3878 = vperm.xlu0 %5019, %v3844_v21  }
  0xdb   : > { %4612 = vmatmul.mubr.msk.bf16.gmra.mrb[92].mxu0 %vm1097_vm0, %v5068_v22  ;;  %4644 = vmatmul.mubr.msk.bf16.gmra.mrb[92].mxu1 %vm1097_vm0, %v5068_v22 }
  0xdc   : > { %1466 = vmatprep.mubr.bf16.mxu0 %v5221_v0  ;;  %1819 = vmatprep.mubr.bf16.mxu1 %v5221_v0 }
  0xde   : > { %3893 = vperm.xlu1 %5020, %v3847_v24   ;;  %3888 = vperm.xlu0 %5019, %v3846_v26  }
  0xe2   : > { %3903 = vperm.xlu1 %5020, %v3849_v27   ;;  %3898 = vperm.xlu0 %5019, %v3848_v28  }
  0xe3   : > { %4613 = vmatmul.mubr.msk.bf16.gmra.mrb[96].mxu0 %vm1097_vm0, %v5069_v29  ;;  %4645 = vmatmul.mubr.msk.bf16.gmra.mrb[96].mxu1 %vm1097_vm0, %v5069_v29 }
  0xe4   : > { %1476 = vmatprep.mubr.bf16.mxu0 %v5221_v0  ;;  %1829 = vmatprep.mubr.bf16.mxu1 %v5221_v0 }
  0xe6   : > { %3913 = vperm.xlu1 %5020, %v3851_v32   ;;  %3908 = vperm.xlu0 %5019, %v3850_v33  }
  0xea   : > { %3923 = vperm.xlu1 %5020, %v3853_v35   ;;  %3918 = vperm.xlu0 %5019, %v3852_v37  }
  0xeb   : > { %4614 = vmatmul.mubr.msk.bf16.gmra.mrb[100].mxu0 %vm1097_vm0, %v5070_v38  ;;  %4646 = vmatmul.mubr.msk.bf16.gmra.mrb[100].mxu1 %vm1097_vm0, %v5070_v38 }
  0xec   : > { %1486 = vmatprep.mubr.bf16.mxu0 %v5221_v0  ;;  %1839 = vmatprep.mubr.bf16.mxu1 %v5221_v0 }
  0xee   : > { %3933 = vperm.xlu1 %5020, %v3855_v39   ;;  %3928 = vperm.xlu0 %5019, %v3854_v40  }
  0xf2   : > { %4342 = vperm.xlu0 %5019, %v4339_v43  }
  0xf3   : > { %4615 = vmatmul.mubr.msk.bf16.gmra.mrb[104].mxu0 %vm1097_vm0, %v5071_v44  ;;  %4647 = vmatmul.mubr.msk.bf16.gmra.mrb[104].mxu1 %vm1097_vm0, %v5071_v44 }
  0xf4   : > { %1496 = vmatprep.mubr.bf16.mxu0 %v5221_v0  ;;  %1849 = vmatprep.mubr.bf16.mxu1 %v5221_v0 }
  0xf6   : > { %v1228_v46 = vpop.f32.mrb[0].mxu0  ;;  %v1581_v47 = vpop.f32.mrb[0].mxu1 }
  0xf7   : > { %v1230_v48 = vpop.f32.mrb[1].mxu0  ;;  %v1229_v50 = vadd.f32 %v1228_v46, %v5628_v7  ;;  %v1583_v51 = vpop.f32.mrb[1].mxu1  ;;  %v1582_v52 = vadd.f32 %v1581_v47, %v5628_v7 }
  0xf8   : > { %v1231_v53 = vadd.f32 %v1230_v48, %v5628_v7  ;;  %v1232_v54 = vpop.f32.mrb[2].mxu0  ;;  %v1584_v55 = vadd.f32 %v1583_v51, %v5628_v7  ;;  %v1585_v57 = vpop.f32.mrb[2].mxu1 }
  0xf9   : > { %v1233_v56 = vadd.f32 %v1232_v54, %v5642_v11  ;;  %v1234_v58 = vpop.f32.mrb[3].mxu0  ;;  %v1586_v59 = vadd.f32 %v1585_v57, %v5642_v11  ;;  %v1587_v61 = vpop.f32.mrb[3].mxu1  ;;  %v1900_v62 = vmax.f32 %v1229_v50, 0.0  ;;  %v1902_v2 = vmax.f32 %v1582_v52, 0.0 }
  0xfa   : > { %v1235_v60 = vadd.f32 %v1234_v58, %v5642_v11  ;;  %v1588_v1 = vadd.f32 %v1587_v61, %v5642_v11  ;;  %v1901_v3 = vmax.f32 %v1231_v53, 0.0  ;;  %v1903_v6 = vmax.f32 %v1584_v55, 0.0  ;;  %v5073_v11 = vld [vmem:[%s6107_s2 + $0xe0] sm:$0xff]  }
  0xfb   : > { %4616 = vmatmul.mubr.msk.bf16.gmra.mrb[108].mxu0 %vm1097_vm0, %v5072_v49  ;;  %v1904_v63 = vmax.f32 %v1233_v56, 0.0  ;;  %4648 = vmatmul.mubr.msk.bf16.gmra.mrb[108].mxu1 %vm1097_vm0, %v5072_v49  ;;  %v1906_v4 = vmax.f32 %v1586_v59, 0.0 }
  0xfc   : > { %1506 = vmatprep.mubr.bf16.mxu0 %v5221_v0  ;;  %v1905_v5 = vmax.f32 %v1235_v60, 0.0  ;;  %1859 = vmatprep.mubr.bf16.mxu1 %v5221_v0  ;;  %v1907_v9 = vmax.f32 %v1588_v1, 0.0 }
  0xfd   : > { %v2156_v7 = vpack.c.bf16 %v1904_v63, %v1900_v62  ;;  %v2158_v12 = vpack.c.bf16 %v1906_v4, %v1902_v2 }
  0xfe   : > { %v1238_v10 = vpop.f32.mrb[4].mxu0  ;;  %v2157_v14 = vpack.c.bf16 %v1905_v5, %v1901_v3  ;;  %v1591_v15 = vpop.f32.mrb[4].mxu1  ;;  %v2159_v17 = vpack.c.bf16 %v1907_v9, %v1903_v6 }
  0xff   : > { %v1240_v16 = vpop.f32.mrb[5].mxu0  ;;  %v1239_v20 = vadd.f32 %v1238_v10, %v5630_v8  ;;  %v1593_v21 = vpop.f32.mrb[5].mxu1  ;;  %v1592_v22 = vadd.f32 %v1591_v15, %v5630_v8 }
 0x100   : > { %2860 = vmatprep.subr.bf16.mxu0 %v2157_v14  ;;  %v1241_v24 = vadd.f32 %v1240_v16, %v5630_v8  ;;  %v1242_v26 = vpop.f32.mrb[6].mxu0  ;;  %3246 = vmatprep.subr.bf16.mxu1 %v2159_v17  ;;  %v1594_v27 = vadd.f32 %v1593_v21, %v5630_v8  ;;  %v1595_v29 = vpop.f32.mrb[6].mxu1 }
 0x101   : > { %2861 = vmatpush1.bf16.msra.mxu0 %v2156_v7  ;;  %v1243_v28 = vadd.f32 %v1242_v26, %v5647_v13  ;;  %v1244_v32 = vpop.f32.mrb[7].mxu0  ;;  %3247 = vmatpush1.bf16.msra.mxu1 %v2158_v12  ;;  %v1596_v33 = vadd.f32 %v1595_v29, %v5647_v13  ;;  %v1597_v37 = vpop.f32.mrb[7].mxu1  ;;  %v1908_v38 = vmax.f32 %v1239_v20, 0.0  ;;  %v1910_v8 = vmax.f32 %v1592_v22, 0.0 }
 0x102   : > { %v1245_v35 = vadd.f32 %v1244_v32, %v5647_v13  ;;  %v1598_v40 = vadd.f32 %v1597_v37, %v5647_v13  ;;  %v1909_v43 = vmax.f32 %v1241_v24, 0.0  ;;  %v1911_v47 = vmax.f32 %v1594_v27, 0.0  ;;  %v5074_v13 = vld [vmem:[%s6107_s2 + $0xe8] sm:$0xff]  }
 0x103   : > { %4617 = vmatmul.mubr.msk.bf16.gmra.mrb[112].mxu0 %vm1097_vm0, %v5073_v11  ;;  %v1912_v39 = vmax.f32 %v1243_v28, 0.0  ;;  %4649 = vmatmul.mubr.msk.bf16.gmra.mrb[112].mxu1 %vm1097_vm0, %v5073_v11  ;;  %v1914_v44 = vmax.f32 %v1596_v33, 0.0 }
 0x104   : > { %1516 = vmatprep.mubr.bf16.mxu0 %v5221_v0  ;;  %v1913_v46 = vmax.f32 %v1245_v35, 0.0  ;;  %1869 = vmatprep.mubr.bf16.mxu1 %v5221_v0  ;;  %v1915_v49 = vmax.f32 %v1598_v40, 0.0 }
 0x105   : > { %v2160_v48 = vpack.c.bf16 %v1912_v39, %v1908_v38  ;;  %v2162_v51 = vpack.c.bf16 %v1914_v44, %v1910_v8 }
 0x106   : > { %v1248_v50 = vpop.f32.mrb[8].mxu0  ;;  %v2161_v52 = vpack.c.bf16 %v1913_v46, %v1909_v43  ;;  %v1601_v53 = vpop.f32.mrb[8].mxu1  ;;  %v2163_v55 = vpack.c.bf16 %v1915_v49, %v1911_v47 }
 0x107   : > { %v1250_v54 = vpop.f32.mrb[9].mxu0  ;;  %v1249_v56 = vadd.f32 %v1248_v50, %v5662_v18  ;;  %v1603_v57 = vpop.f32.mrb[9].mxu1  ;;  %v1602_v58 = vadd.f32 %v1601_v53, %v5662_v18 }
 0x108   : > { %v1251_v59 = vadd.f32 %v1250_v54, %v5662_v18  ;;  %v1252_v60 = vpop.f32.mrb[10].mxu0  ;;  %2862 = vmatprep.subr.bf16.mxu0 %v2161_v52  ;;  %v1604_v61 = vadd.f32 %v1603_v57, %v5662_v18  ;;  %v1605_v63 = vpop.f32.mrb[10].mxu1  ;;  %3248 = vmatprep.subr.bf16.mxu1 %v2163_v55 }
 0x109   : > { %v1253_v62 = vadd.f32 %v1252_v60, %v5666_v19  ;;  %v1254_v1 = vpop.f32.mrb[11].mxu0  ;;  %2863 = vmatpush1.bf16.msra.mxu0 %v2160_v48  ;;  %v1606_v2 = vadd.f32 %v1605_v63, %v5666_v19  ;;  %v1607_v4 = vpop.f32.mrb[11].mxu1  ;;  %3249 = vmatpush1.bf16.msra.mxu1 %v2162_v51  ;;  %v1916_v5 = vmax.f32 %v1249_v56, 0.0  ;;  %v1918_v18 = vmax.f32 %v1602_v58, 0.0  ;;  %v5079_v60 = vld [vmem:[%s6108_s3 + $0x4] ss:$16 sps:$4 sm:$0xff]  }
 0x10a   : > { %v1255_v3 = vadd.f32 %v1254_v1, %v5666_v19  ;;  %v1608_v7 = vadd.f32 %v1607_v4, %v5666_v19  ;;  %v1917_v9 = vmax.f32 %v1251_v59, 0.0  ;;  %v1919_v14 = vmax.f32 %v1604_v61, 0.0  ;;  %v5075_v19 = vld [vmem:[%s6107_s2 + $0xf0] sm:$0xff]  }
 0x10b   : > { %4618 = vmatmul.mubr.msk.bf16.gmra.mrb[116].mxu0 %vm1097_vm0, %v5074_v13  ;;  %v1920_v6 = vmax.f32 %v1253_v62, 0.0  ;;  %4650 = vmatmul.mubr.msk.bf16.gmra.mrb[116].mxu1 %vm1097_vm0, %v5074_v13  ;;  %v1922_v10 = vmax.f32 %v1606_v2, 0.0 }
 0x10c   : > { %1526 = vmatprep.mubr.bf16.mxu0 %v5221_v0  ;;  %v1921_v12 = vmax.f32 %v1255_v3, 0.0  ;;  %1879 = vmatprep.mubr.bf16.mxu1 %v5221_v0  ;;  %v1923_v16 = vmax.f32 %v1608_v7, 0.0 }
 0x10d   : > { %v2164_v15 = vpack.c.bf16 %v1920_v6, %v1916_v5  ;;  %v2166_v17 = vpack.c.bf16 %v1922_v10, %v1918_v18 }
 0x10e   : > { %v1258_v11 = vpop.f32.mrb[12].mxu0  ;;  %v2165_v20 = vpack.c.bf16 %v1921_v12, %v1917_v9  ;;  %v1611_v21 = vpop.f32.mrb[12].mxu1  ;;  %v2167_v24 = vpack.c.bf16 %v1923_v16, %v1919_v14 }
 0x10f   : > { %v1260_v22 = vpop.f32.mrb[13].mxu0  ;;  %v1259_v26 = vadd.f32 %v1258_v11, %v5678_v23  ;;  %v1613_v27 = vpop.f32.mrb[13].mxu1  ;;  %v1612_v28 = vadd.f32 %v1611_v21, %v5678_v23 }
 0x110   : > { %v1261_v29 = vadd.f32 %v1260_v22, %v5678_v23  ;;  %v1262_v32 = vpop.f32.mrb[14].mxu0  ;;  %2864 = vmatprep.subr.bf16.mxu0 %v2165_v20  ;;  %v1614_v33 = vadd.f32 %v1613_v27, %v5678_v23  ;;  %v1615_v37 = vpop.f32.mrb[14].mxu1  ;;  %3250 = vmatprep.subr.bf16.mxu1 %v2167_v24 }
 0x111   : > { %v1263_v35 = vadd.f32 %v1262_v32, %v5683_v25  ;;  %v1264_v38 = vpop.f32.mrb[15].mxu0  ;;  %2865 = vmatpush1.bf16.msra.mxu0 %v2164_v15  ;;  %v1616_v39 = vadd.f32 %v1615_v37, %v5683_v25  ;;  %v1617_v8 = vpop.f32.mrb[15].mxu1  ;;  %3251 = vmatpush1.bf16.msra.mxu1 %v2166_v17  ;;  %v1924_v43 = vmax.f32 %v1259_v26, 0.0  ;;  %v1926_v23 = vmax.f32 %v1612_v28, 0.0 }
 0x112   : > { %v1265_v40 = vadd.f32 %v1264_v38, %v5683_v25  ;;  %v1618_v46 = vadd.f32 %v1617_v8, %v5683_v25  ;;  %v1925_v47 = vmax.f32 %v1261_v29, 0.0  ;;  %v1927_v50 = vmax.f32 %v1614_v33, 0.0  ;;  %v5076_v25 = vld [vmem:[%s6107_s2 + $0xf8] sm:$0xff]  }
 0x113   : > { %4619 = vmatmul.mubr.msk.bf16.gmra.mrb[120].mxu0 %vm1097_vm0, %v5075_v19  ;;  %v1928_v44 = vmax.f32 %v1263_v35, 0.0  ;;  %4651 = vmatmul.mubr.msk.bf16.gmra.mrb[120].mxu1 %vm1097_vm0, %v5075_v19  ;;  %v1930_v48 = vmax.f32 %v1616_v39, 0.0 }
 0x114   : > { %1536 = vmatprep.mubr.bf16.mxu0 %v5221_v0  ;;  %v1929_v49 = vmax.f32 %v1265_v40, 0.0  ;;  %1889 = vmatprep.mubr.bf16.mxu1 %v5221_v0  ;;  %v1931_v52 = vmax.f32 %v1618_v46, 0.0 }
 0x115   : > { %v2168_v51 = vpack.c.bf16 %v1928_v44, %v1924_v43  ;;  %v2170_v54 = vpack.c.bf16 %v1930_v48, %v1926_v23 }
 0x116   : > { %v1268_v53 = vpop.f32.mrb[16].mxu0  ;;  %v2169_v13 = vpack.c.bf16 %v1929_v49, %v1925_v47  ;;  %v1621_v55 = vpop.f32.mrb[16].mxu1  ;;  %v2171_v57 = vpack.c.bf16 %v1931_v52, %v1927_v50 }
 0x117   : > { %v1270_v56 = vpop.f32.mrb[17].mxu0  ;;  %v1269_v58 = vadd.f32 %v1268_v53, %v5701_v30  ;;  %v1623_v59 = vpop.f32.mrb[17].mxu1  ;;  %v1622_v61 = vadd.f32 %v1621_v55, %v5701_v30 }
 0x118   : > { %v1271_v62 = vadd.f32 %v1270_v56, %v5701_v30  ;;  %v1272_v63 = vpop.f32.mrb[18].mxu0  ;;  %2866 = vmatprep.subr.bf16.mxu0 %v2169_v13  ;;  %v1624_v1 = vadd.f32 %v1623_v59, %v5701_v30  ;;  %v1625_v3 = vpop.f32.mrb[18].mxu1  ;;  %3252 = vmatprep.subr.bf16.mxu1 %v2171_v57 }
 0x119   : > { %v1273_v2 = vadd.f32 %v1272_v63, %v5703_v31  ;;  %v1274_v4 = vpop.f32.mrb[19].mxu0  ;;  %2867 = vmatpush1.bf16.msra.mxu0 %v2168_v51  ;;  %v1626_v5 = vadd.f32 %v1625_v3, %v5703_v31  ;;  %v1627_v7 = vpop.f32.mrb[19].mxu1  ;;  %3253 = vmatpush1.bf16.msra.mxu1 %v2170_v54  ;;  %v1932_v18 = vmax.f32 %v1269_v58, 0.0  ;;  %v1934_v30 = vmax.f32 %v1622_v61, 0.0 }
 0x11a   : > { %v1275_v6 = vadd.f32 %v1274_v4, %v5703_v31  ;;  %v1628_v10 = vadd.f32 %v1627_v7, %v5703_v31  ;;  %v1933_v12 = vmax.f32 %v1271_v62, 0.0  ;;  %v1935_v16 = vmax.f32 %v1624_v1, 0.0 }
 0x11b   : > { %4620 = vmatmul.mubr.msk.bf16.gmra.mrb[124].mxu0 %vm1097_vm0, %v5076_v25  ;;  %v1936_v9 = vmax.f32 %v1273_v2, 0.0  ;;  %4652 = vmatmul.mubr.msk.bf16.gmra.mrb[124].mxu1 %vm1097_vm0, %v5076_v25  ;;  %v1938_v14 = vmax.f32 %v1626_v5, 0.0 }
 0x11c   : > { %2892 = vmatprep.mubr.bf16.mxu0 %v5079_v60  ;;  %v1937_v15 = vmax.f32 %v1275_v6, 0.0  ;;  %3278 = vmatprep.mubr.bf16.mxu1 %v5079_v60  ;;  %v1939_v17 = vmax.f32 %v1628_v10, 0.0  ;;  %v615_v10 = vpop.permute.xlu1 %614 }
 0x11d   : > { %v2172_v11 = vpack.c.bf16 %v1936_v9, %v1932_v18  ;;  %v2174_v21 = vpack.c.bf16 %v1938_v14, %v1934_v30 }
 0x11e   : > { %v1278_v20 = vpop.f32.mrb[20].mxu0  ;;  %v2173_v22 = vpack.c.bf16 %v1937_v15, %v1933_v12  ;;  %v1631_v19 = vpop.f32.mrb[20].mxu1  ;;  %v2175_v26 = vpack.c.bf16 %v1939_v17, %v1935_v16 }
 0x11f   : > { %v1280_v24 = vpop.f32.mrb[21].mxu0  ;;  %v1279_v27 = vadd.f32 %v1278_v20, %v5715_v34  ;;  %v1633_v31 = vpop.f32.mrb[21].mxu1  ;;  %v1632_v28 = vadd.f32 %v1631_v19, %v5715_v34 }
 0x120   : > { %v1281_v29 = vadd.f32 %v1280_v24, %v5715_v34  ;;  %v1282_v32 = vpop.f32.mrb[22].mxu0  ;;  %2868 = vmatprep.subr.bf16.mxu0 %v2173_v22  ;;  %v1634_v33 = vadd.f32 %v1633_v31, %v5715_v34  ;;  %v1635_v37 = vpop.f32.mrb[22].mxu1  ;;  %3254 = vmatprep.subr.bf16.mxu1 %v2175_v26 }
 0x121   : > { %v1283_v35 = vadd.f32 %v1282_v32, %v5720_v36  ;;  %v1284_v38 = vpop.f32.mrb[23].mxu0  ;;  %2869 = vmatpush1.bf16.msra.mxu0 %v2172_v11  ;;  %v1636_v39 = vadd.f32 %v1635_v37, %v5720_v36  ;;  %v1637_v8 = vpop.f32.mrb[23].mxu1  ;;  %3255 = vmatpush1.bf16.msra.mxu1 %v2174_v21  ;;  %v1940_v43 = vmax.f32 %v1279_v27, 0.0  ;;  %v1942_v23 = vmax.f32 %v1632_v28, 0.0 }
 0x122   : > { %v1285_v40 = vadd.f32 %v1284_v38, %v5720_v36  ;;  %v1638_v46 = vadd.f32 %v1637_v8, %v5720_v36  ;;  %v1941_v47 = vmax.f32 %v1281_v29, 0.0  ;;  %v1943_v49 = vmax.f32 %v1634_v33, 0.0 }
 0x123   : > { %v1944_v44 = vmax.f32 %v1283_v35, 0.0  ;;  %v1946_v48 = vmax.f32 %v1636_v39, 0.0 }
 0x124   : > { %v1945_v34 = vmax.f32 %v1285_v40, 0.0  ;;  %v1947_v51 = vmax.f32 %v1638_v46, 0.0  ;;  %v625_v40 = vpop.permute.xlu1 %624 }
 0x125   : > { %v2176_v50 = vpack.c.bf16 %v1944_v44, %v1940_v43  ;;  %v2178_v53 = vpack.c.bf16 %v1946_v48, %v1942_v23  ;;  %v620_v23 = vpop.permute.xlu0 %619 }
 0x126   : > { %v1288_v52 = vpop.f32.mrb[24].mxu0  ;;  %v2177_v54 = vpack.c.bf16 %v1945_v34, %v1941_v47  ;;  %v1641_v13 = vpop.f32.mrb[24].mxu1  ;;  %v2179_v56 = vpack.c.bf16 %v1947_v51, %v1943_v49 }
 0x127   : > { %v1290_v55 = vpop.f32.mrb[25].mxu0  ;;  %v1289_v25 = vadd.f32 %v1288_v52, %v5735_v41  ;;  %v1643_v57 = vpop.f32.mrb[25].mxu1  ;;  %v1642_v58 = vadd.f32 %v1641_v13, %v5735_v41 }
 0x128   : > { %v1291_v36 = vadd.f32 %v1290_v55, %v5735_v41  ;;  %v1292_v59 = vpop.f32.mrb[26].mxu0  ;;  %2870 = vmatprep.subr.bf16.mxu0 %v2177_v54  ;;  %v1644_v60 = vadd.f32 %v1643_v57, %v5735_v41  ;;  %v1645_v62 = vpop.f32.mrb[26].mxu1  ;;  %3256 = vmatprep.subr.bf16.mxu1 %v2179_v56 }
 0x129   : > { %v1293_v61 = vadd.f32 %v1292_v59, %v5739_v42  ;;  %v1294_v63 = vpop.f32.mrb[27].mxu0  ;;  %2871 = vmatpush1.bf16.msra.mxu0 %v2176_v50  ;;  %v1646_v1 = vadd.f32 %v1645_v62, %v5739_v42  ;;  %v1647_v3 = vpop.f32.mrb[27].mxu1  ;;  %3257 = vmatpush1.bf16.msra.mxu1 %v2178_v53  ;;  %v1948_v4 = vmax.f32 %v1289_v25, 0.0  ;;  %v1950_v7 = vmax.f32 %v1642_v58, 0.0 }
 0x12a   : > { %v1295_v2 = vadd.f32 %v1294_v63, %v5739_v42  ;;  %v1648_v6 = vadd.f32 %v1647_v3, %v5739_v42  ;;  %v1949_v18 = vmax.f32 %v1291_v36, 0.0  ;;  %v1951_v30 = vmax.f32 %v1644_v60, 0.0  ;;  %v635_v3 = vpop.permute.xlu1 %634 }
 0x12b   : > { %v1952_v5 = vmax.f32 %v1293_v61, 0.0  ;;  %v1954_v9 = vmax.f32 %v1646_v1, 0.0 }
 0x12c   : > { %v1953_v41 = vmax.f32 %v1295_v2, 0.0  ;;  %v1955_v14 = vmax.f32 %v1648_v6, 0.0 }
 0x12d   : > { %v2180_v12 = vpack.c.bf16 %v1952_v5, %v1948_v4  ;;  %v2182_v16 = vpack.c.bf16 %v1954_v9, %v1950_v7 }
 0x12e   : > { %v1298_v15 = vpop.f32.mrb[28].mxu0  ;;  %v2181_v11 = vpack.c.bf16 %v1953_v41, %v1949_v18  ;;  %v1651_v17 = vpop.f32.mrb[28].mxu1  ;;  %v2183_v21 = vpack.c.bf16 %v1955_v14, %v1951_v30 }
 0x12f   : > { %v1300_v20 = vpop.f32.mrb[29].mxu0  ;;  %v1299_v22 = vadd.f32 %v1298_v15, %v5748_v45  ;;  %v1653_v19 = vpop.f32.mrb[29].mxu1  ;;  %v1652_v24 = vadd.f32 %v1651_v17, %v5748_v45 }
 0x130   : > { %v1301_v42 = vadd.f32 %v1300_v20, %v5748_v45  ;;  %v1302_v26 = vpop.f32.mrb[30].mxu0  ;;  %2872 = vmatprep.subr.bf16.mxu0 %v2181_v11  ;;  %v1654_v27 = vadd.f32 %v1653_v19, %v5748_v45  ;;  %v1655_v28 = vpop.f32.mrb[30].mxu1  ;;  %3258 = vmatprep.subr.bf16.mxu1 %v2183_v21 }
 0x131   : > { %v1303_v31 = vadd.f32 %v1302_v26, %v615_v10  ;;  %v1304_v29 = vpop.f32.mrb[31].mxu0  ;;  %2873 = vmatpush1.bf16.msra.mxu0 %v2180_v12  ;;  %v1656_v32 = vadd.f32 %v1655_v28, %v615_v10  ;;  %v1657_v35 = vpop.f32.mrb[31].mxu1  ;;  %3259 = vmatpush1.bf16.msra.mxu1 %v2182_v16  ;;  %v1956_v37 = vmax.f32 %v1299_v22, 0.0  ;;  %v1958_v8 = vmax.f32 %v1652_v24, 0.0 }
 0x132   : > { %v1305_v33 = vadd.f32 %v1304_v29, %v615_v10  ;;  %v1658_v39 = vadd.f32 %v1657_v35, %v615_v10  ;;  %v1957_v43 = vmax.f32 %v1301_v42, 0.0  ;;  %v1959_v47 = vmax.f32 %v1654_v27, 0.0  ;;  %v630_v18 = vpop.permute.xlu0 %629 }
 0x133   : > { %v1960_v38 = vmax.f32 %v1303_v31, 0.0  ;;  %v1962_v44 = vmax.f32 %v1656_v32, 0.0 }
 0x134   : > { %v1961_v46 = vmax.f32 %v1305_v33, 0.0  ;;  %v1963_v48 = vmax.f32 %v1658_v39, 0.0 }
 0x135   : > { %v2184_v45 = vpack.c.bf16 %v1960_v38, %v1956_v37  ;;  %v2186_v49 = vpack.c.bf16 %v1962_v44, %v1958_v8  ;;  %v645_v37 = vpop.permute.xlu1 %644 }
 0x136   : > { %v1308_v34 = vpop.f32.mrb[32].mxu0  ;;  %v2185_v50 = vpack.c.bf16 %v1961_v46, %v1957_v43  ;;  %v1661_v51 = vpop.f32.mrb[32].mxu1  ;;  %v2187_v53 = vpack.c.bf16 %v1963_v48, %v1959_v47 }
 0x137   : > { %v1310_v52 = vpop.f32.mrb[33].mxu0  ;;  %v1309_v54 = vadd.f32 %v1308_v34, %v620_v23  ;;  %v1663_v13 = vpop.f32.mrb[33].mxu1  ;;  %v1662_v55 = vadd.f32 %v1661_v51, %v620_v23 }
 0x138   : > { %v1311_v56 = vadd.f32 %v1310_v52, %v620_v23  ;;  %v1312_v25 = vpop.f32.mrb[34].mxu0  ;;  %2874 = vmatprep.subr.bf16.mxu0 %v2185_v50  ;;  %v1664_v57 = vadd.f32 %v1663_v13, %v620_v23  ;;  %v1665_v36 = vpop.f32.mrb[34].mxu1  ;;  %3260 = vmatprep.subr.bf16.mxu1 %v2187_v53 }
 0x139   : > { %v1313_v58 = vadd.f32 %v1312_v25, %v625_v40  ;;  %v1314_v59 = vpop.f32.mrb[35].mxu0  ;;  %2875 = vmatpush1.bf16.msra.mxu0 %v2184_v45  ;;  %v1666_v60 = vadd.f32 %v1665_v36, %v625_v40  ;;  %v1667_v62 = vpop.f32.mrb[35].mxu1  ;;  %3261 = vmatpush1.bf16.msra.mxu1 %v2186_v49  ;;  %v1964_v63 = vmax.f32 %v1309_v54, 0.0  ;;  %v1966_v4 = vmax.f32 %v1662_v55, 0.0 }
 0x13a   : > { %v1315_v61 = vadd.f32 %v1314_v59, %v625_v40  ;;  %v1668_v2 = vadd.f32 %v1667_v62, %v625_v40  ;;  %v1965_v5 = vmax.f32 %v1311_v56, 0.0  ;;  %v1967_v9 = vmax.f32 %v1664_v57, 0.0  ;;  %v640_v43 = vpop.permute.xlu0 %639 }
 0x13b   : > { %v1968_v1 = vmax.f32 %v1313_v58, 0.0  ;;  %v1970_v6 = vmax.f32 %v1666_v60, 0.0 }
 0x13c   : > { %v1969_v7 = vmax.f32 %v1315_v61, 0.0  ;;  %v1971_v10 = vmax.f32 %v1668_v2, 0.0 }
 0x13d   : > { %v2188_v41 = vpack.c.bf16 %v1968_v1, %v1964_v63  ;;  %v2190_v12 = vpack.c.bf16 %v1970_v6, %v1966_v4  ;;  %v655_v63 = vpop.permute.xlu1 %654 }
 0x13e   : > { %v1318_v30 = vpop.f32.mrb[36].mxu0  ;;  %v2189_v14 = vpack.c.bf16 %v1969_v7, %v1965_v5  ;;  %v1671_v15 = vpop.f32.mrb[36].mxu1  ;;  %v2191_v11 = vpack.c.bf16 %v1971_v10, %v1967_v9 }
 0x13f   : > { %v1320_v16 = vpop.f32.mrb[37].mxu0  ;;  %v1319_v17 = vadd.f32 %v1318_v30, %v630_v18  ;;  %v1673_v20 = vpop.f32.mrb[37].mxu1  ;;  %v1672_v21 = vadd.f32 %v1671_v15, %v630_v18 }
 0x140   : > { %v1321_v22 = vadd.f32 %v1320_v16, %v630_v18  ;;  %v1322_v19 = vpop.f32.mrb[38].mxu0  ;;  %2876 = vmatprep.subr.bf16.mxu0 %v2189_v14  ;;  %v1674_v24 = vadd.f32 %v1673_v20, %v630_v18  ;;  %v1675_v26 = vpop.f32.mrb[38].mxu1  ;;  %3262 = vmatprep.subr.bf16.mxu1 %v2191_v11 }
 0x141   : > { %v1323_v42 = vadd.f32 %v1322_v19, %v635_v3  ;;  %v1324_v27 = vpop.f32.mrb[39].mxu0  ;;  %2877 = vmatpush1.bf16.msra.mxu0 %v2188_v41  ;;  %v1676_v31 = vadd.f32 %v1675_v26, %v635_v3  ;;  %v1677_v29 = vpop.f32.mrb[39].mxu1  ;;  %3263 = vmatpush1.bf16.msra.mxu1 %v2190_v12  ;;  %v1972_v32 = vmax.f32 %v1319_v17, 0.0  ;;  %v1974_v38 = vmax.f32 %v1672_v21, 0.0 }
 0x142   : > { %v1325_v28 = vadd.f32 %v1324_v27, %v635_v3  ;;  %v1678_v35 = vadd.f32 %v1677_v29, %v635_v3  ;;  %v1973_v39 = vmax.f32 %v1321_v22, 0.0  ;;  %v1975_v44 = vmax.f32 %v1674_v24, 0.0  ;;  %v650_v5 = vpop.permute.xlu0 %649 }
 0x143   : > { %v1976_v33 = vmax.f32 %v1323_v42, 0.0  ;;  %v1978_v40 = vmax.f32 %v1676_v31, 0.0 }
 0x144   : > { %v1977_v8 = vmax.f32 %v1325_v28, 0.0  ;;  %v1979_v23 = vmax.f32 %v1678_v35, 0.0 }
 0x145   : > { %v2192_v46 = vpack.c.bf16 %v1976_v33, %v1972_v32  ;;  %v2194_v45 = vpack.c.bf16 %v1978_v40, %v1974_v38  ;;  %v665_v32 = vpop.permute.xlu1 %664 }
 0x146   : > { %v1328_v47 = vpop.f32.mrb[40].mxu0  ;;  %v2193_v48 = vpack.c.bf16 %v1977_v8, %v1973_v39  ;;  %v1681_v34 = vpop.f32.mrb[40].mxu1  ;;  %v2195_v50 = vpack.c.bf16 %v1979_v23, %v1975_v44 }
 0x147   : > { %v1330_v49 = vpop.f32.mrb[41].mxu0  ;;  %v1329_v51 = vadd.f32 %v1328_v47, %v640_v43  ;;  %v1683_v52 = vpop.f32.mrb[41].mxu1  ;;  %v1682_v53 = vadd.f32 %v1681_v34, %v640_v43 }
 0x148   : > { %v1331_v54 = vadd.f32 %v1330_v49, %v640_v43  ;;  %v1332_v13 = vpop.f32.mrb[42].mxu0  ;;  %2878 = vmatprep.subr.bf16.mxu0 %v2193_v48  ;;  %v1684_v55 = vadd.f32 %v1683_v52, %v640_v43  ;;  %v1685_v25 = vpop.f32.mrb[42].mxu1  ;;  %3264 = vmatprep.subr.bf16.mxu1 %v2195_v50 }
 0x149   : > { %v1333_v56 = vadd.f32 %v1332_v13, %v645_v37  ;;  %v1334_v57 = vpop.f32.mrb[43].mxu0  ;;  %2879 = vmatpush1.bf16.msra.mxu0 %v2192_v46  ;;  %v1686_v58 = vadd.f32 %v1685_v25, %v645_v37  ;;  %v1687_v59 = vpop.f32.mrb[43].mxu1  ;;  %3265 = vmatpush1.bf16.msra.mxu1 %v2194_v45  ;;  %v1980_v60 = vmax.f32 %v1329_v51, 0.0  ;;  %v1982_v1 = vmax.f32 %v1682_v53, 0.0 }
 0x14a   : > { %v1335_v36 = vadd.f32 %v1334_v57, %v645_v37  ;;  %v1688_v62 = vadd.f32 %v1687_v59, %v645_v37  ;;  %v1981_v2 = vmax.f32 %v1331_v54, 0.0  ;;  %v1983_v6 = vmax.f32 %v1684_v55, 0.0  ;;  %v660_v39 = vpop.permute.xlu0 %659 }
 0x14b   : > { %v1984_v61 = vmax.f32 %v1333_v56, 0.0  ;;  %v1986_v3 = vmax.f32 %v1686_v58, 0.0 }
 0x14c   : > { %v1985_v4 = vmax.f32 %v1335_v36, 0.0  ;;  %v1987_v18 = vmax.f32 %v1688_v62, 0.0 }
 0x14d   : > { %v2196_v7 = vpack.c.bf16 %v1984_v61, %v1980_v60  ;;  %v2198_v41 = vpack.c.bf16 %v1986_v3, %v1982_v1  ;;  %v675_v60 = vpop.permute.xlu1 %674 }
 0x14e   : > { %v1338_v9 = vpop.f32.mrb[44].mxu0  ;;  %v2197_v10 = vpack.c.bf16 %v1985_v4, %v1981_v2  ;;  %v1691_v30 = vpop.f32.mrb[44].mxu1  ;;  %v2199_v14 = vpack.c.bf16 %v1987_v18, %v1983_v6 }
 0x14f   : > { %v1340_v12 = vpop.f32.mrb[45].mxu0  ;;  %v1339_v15 = vadd.f32 %v1338_v9, %v650_v5  ;;  %v1693_v16 = vpop.f32.mrb[45].mxu1  ;;  %v1692_v11 = vadd.f32 %v1691_v30, %v650_v5 }
 0x150   : > { %v1341_v17 = vadd.f32 %v1340_v12, %v650_v5  ;;  %v1342_v20 = vpop.f32.mrb[46].mxu0  ;;  %2880 = vmatprep.subr.bf16.mxu0 %v2197_v10  ;;  %v1694_v21 = vadd.f32 %v1693_v16, %v650_v5  ;;  %v1695_v19 = vpop.f32.mrb[46].mxu1  ;;  %3266 = vmatprep.subr.bf16.mxu1 %v2199_v14 }
 0x151   : > { %v1343_v22 = vadd.f32 %v1342_v20, %v655_v63  ;;  %v1344_v24 = vpop.f32.mrb[47].mxu0  ;;  %2881 = vmatpush1.bf16.msra.mxu0 %v2196_v7  ;;  %v1696_v42 = vadd.f32 %v1695_v19, %v655_v63  ;;  %v1697_v27 = vpop.f32.mrb[47].mxu1  ;;  %3267 = vmatpush1.bf16.msra.mxu1 %v2198_v41  ;;  %v1988_v31 = vmax.f32 %v1339_v15, 0.0  ;;  %v1990_v33 = vmax.f32 %v1692_v11, 0.0 }
 0x152   : > { %v1345_v26 = vadd.f32 %v1344_v24, %v655_v63  ;;  %v1698_v29 = vadd.f32 %v1697_v27, %v655_v63  ;;  %v1989_v35 = vmax.f32 %v1341_v17, 0.0  ;;  %v1991_v40 = vmax.f32 %v1694_v21, 0.0  ;;  %v670_v2 = vpop.permute.xlu0 %669 }
 0x153   : > { %v1992_v28 = vmax.f32 %v1343_v22, 0.0  ;;  %v1994_v37 = vmax.f32 %v1696_v42, 0.0 }
 0x154   : > { %v1993_v38 = vmax.f32 %v1345_v26, 0.0  ;;  %v1995_v43 = vmax.f32 %v1698_v29, 0.0 }
 0x155   : > { %v2200_v8 = vpack.c.bf16 %v1992_v28, %v1988_v31  ;;  %v2202_v46 = vpack.c.bf16 %v1994_v37, %v1990_v33  ;;  %v685_v31 = vpop.permute.xlu1 %684 }
 0x156   : > { %v1348_v44 = vpop.f32.mrb[48].mxu0  ;;  %v2201_v23 = vpack.c.bf16 %v1993_v38, %v1989_v35  ;;  %v1701_v47 = vpop.f32.mrb[48].mxu1  ;;  %v2203_v48 = vpack.c.bf16 %v1995_v43, %v1991_v40 }
 0x157   : > { %v1350_v45 = vpop.f32.mrb[49].mxu0  ;;  %v1349_v34 = vadd.f32 %v1348_v44, %v660_v39  ;;  %v1703_v49 = vpop.f32.mrb[49].mxu1  ;;  %v1702_v50 = vadd.f32 %v1701_v47, %v660_v39 }
 0x158   : > { %v1351_v51 = vadd.f32 %v1350_v45, %v660_v39  ;;  %v1352_v52 = vpop.f32.mrb[50].mxu0  ;;  %2882 = vmatprep.subr.bf16.mxu0 %v2201_v23  ;;  %v1704_v53 = vadd.f32 %v1703_v49, %v660_v39  ;;  %v1705_v13 = vpop.f32.mrb[50].mxu1  ;;  %3268 = vmatprep.subr.bf16.mxu1 %v2203_v48 }
 0x159   : > { %v1353_v54 = vadd.f32 %v1352_v52, %v665_v32  ;;  %v1354_v55 = vpop.f32.mrb[51].mxu0  ;;  %2883 = vmatpush1.bf16.msra.mxu0 %v2200_v8  ;;  %v1706_v56 = vadd.f32 %v1705_v13, %v665_v32  ;;  %v1707_v57 = vpop.f32.mrb[51].mxu1  ;;  %3269 = vmatpush1.bf16.msra.mxu1 %v2202_v46  ;;  %v1996_v58 = vmax.f32 %v1349_v34, 0.0  ;;  %v1998_v61 = vmax.f32 %v1702_v50, 0.0 }
 0x15a   : > { %v1355_v25 = vadd.f32 %v1354_v55, %v665_v32  ;;  %v1708_v59 = vadd.f32 %v1707_v57, %v665_v32  ;;  %v1997_v62 = vmax.f32 %v1351_v51, 0.0  ;;  %v1999_v3 = vmax.f32 %v1704_v53, 0.0  ;;  %v680_v35 = vpop.permute.xlu0 %679 }
 0x15b   : > { %v2000_v36 = vmax.f32 %v1353_v54, 0.0  ;;  %v2002_v63 = vmax.f32 %v1706_v56, 0.0 }
 0x15c   : > { %v2001_v1 = vmax.f32 %v1355_v25, 0.0  ;;  %v2003_v5 = vmax.f32 %v1708_v59, 0.0 }
 0x15d   : > { %v2204_v4 = vpack.c.bf16 %v2000_v36, %v1996_v58  ;;  %v2206_v7 = vpack.c.bf16 %v2002_v63, %v1998_v61  ;;  %v695_v58 = vpop.permute.xlu1 %694 }
 0x15e   : > { %v1358_v6 = vpop.f32.mrb[52].mxu0  ;;  %v2205_v18 = vpack.c.bf16 %v2001_v1, %v1997_v62  ;;  %v1711_v9 = vpop.f32.mrb[52].mxu1  ;;  %v2207_v10 = vpack.c.bf16 %v2003_v5, %v1999_v3 }
 0x15f   : > { %v1360_v41 = vpop.f32.mrb[53].mxu0  ;;  %v1359_v30 = vadd.f32 %v1358_v6, %v670_v2  ;;  %v1713_v12 = vpop.f32.mrb[53].mxu1  ;;  %v1712_v14 = vadd.f32 %v1711_v9, %v670_v2 }
 0x160   : > { %v1361_v15 = vadd.f32 %v1360_v41, %v670_v2  ;;  %v1362_v16 = vpop.f32.mrb[54].mxu0  ;;  %2884 = vmatprep.subr.bf16.mxu0 %v2205_v18  ;;  %v1714_v11 = vadd.f32 %v1713_v12, %v670_v2  ;;  %v1715_v20 = vpop.f32.mrb[54].mxu1  ;;  %3270 = vmatprep.subr.bf16.mxu1 %v2207_v10 }
 0x161   : > { %v1363_v17 = vadd.f32 %v1362_v16, %v675_v60  ;;  %v1364_v21 = vpop.f32.mrb[55].mxu0  ;;  %2885 = vmatpush1.bf16.msra.mxu0 %v2204_v4  ;;  %v1716_v22 = vadd.f32 %v1715_v20, %v675_v60  ;;  %v1717_v24 = vpop.f32.mrb[55].mxu1  ;;  %3271 = vmatpush1.bf16.msra.mxu1 %v2206_v7  ;;  %v2004_v42 = vmax.f32 %v1359_v30, 0.0  ;;  %v2006_v28 = vmax.f32 %v1712_v14, 0.0 }
 0x162   : > { %v1365_v19 = vadd.f32 %v1364_v21, %v675_v60  ;;  %v1718_v27 = vadd.f32 %v1717_v24, %v675_v60  ;;  %v2005_v29 = vmax.f32 %v1361_v15, 0.0  ;;  %v2007_v37 = vmax.f32 %v1714_v11, 0.0  ;;  %v690_v62 = vpop.permute.xlu0 %689 }
 0x163   : > { %v2008_v26 = vmax.f32 %v1363_v17, 0.0  ;;  %v2010_v32 = vmax.f32 %v1716_v22, 0.0 }
 0x164   : > { %v2009_v33 = vmax.f32 %v1365_v19, 0.0  ;;  %v2011_v39 = vmax.f32 %v1718_v27, 0.0 }
 0x165   : > { %v2208_v38 = vpack.c.bf16 %v2008_v26, %v2004_v42  ;;  %v2210_v8 = vpack.c.bf16 %v2010_v32, %v2006_v28 }
 0x166   : > { %v1368_v40 = vpop.f32.mrb[56].mxu0  ;;  %v2209_v43 = vpack.c.bf16 %v2009_v33, %v2005_v29  ;;  %v1721_v44 = vpop.f32.mrb[56].mxu1  ;;  %v2211_v23 = vpack.c.bf16 %v2011_v39, %v2007_v37 }
 0x167   : > { %v1370_v46 = vpop.f32.mrb[57].mxu0  ;;  %v1369_v47 = vadd.f32 %v1368_v40, %v680_v35  ;;  %v1723_v45 = vpop.f32.mrb[57].mxu1  ;;  %v1722_v48 = vadd.f32 %v1721_v44, %v680_v35 }
 0x168   : > { %v1371_v34 = vadd.f32 %v1370_v46, %v680_v35  ;;  %v1372_v49 = vpop.f32.mrb[58].mxu0  ;;  %2886 = vmatprep.subr.bf16.mxu0 %v2209_v43  ;;  %v1724_v50 = vadd.f32 %v1723_v45, %v680_v35  ;;  %v1725_v52 = vpop.f32.mrb[58].mxu1  ;;  %3272 = vmatprep.subr.bf16.mxu1 %v2211_v23 }
 0x169   : > { %v1373_v51 = vadd.f32 %v1372_v49, %v685_v31  ;;  %v1374_v53 = vpop.f32.mrb[59].mxu0  ;;  %2887 = vmatpush1.bf16.msra.mxu0 %v2208_v38  ;;  %v1726_v54 = vadd.f32 %v1725_v52, %v685_v31  ;;  %v1727_v55 = vpop.f32.mrb[59].mxu1  ;;  %3273 = vmatpush1.bf16.msra.mxu1 %v2210_v8  ;;  %v2012_v56 = vmax.f32 %v1369_v47, 0.0  ;;  %v2014_v36 = vmax.f32 %v1722_v48, 0.0 }
 0x16a   : > { %v1375_v13 = vadd.f32 %v1374_v53, %v685_v31  ;;  %v1728_v57 = vadd.f32 %v1727_v55, %v685_v31  ;;  %v2013_v59 = vmax.f32 %v1371_v34, 0.0  ;;  %v2015_v63 = vmax.f32 %v1724_v50, 0.0  ;;  %v705_v31 = vpop.permute.xlu1 %704  ;;  %v700_v35 = vpop.permute.xlu0 %699 }
 0x16b   : > { %v2016_v25 = vmax.f32 %v1373_v51, 0.0  ;;  %v2018_v60 = vmax.f32 %v1726_v54, 0.0  ;;  %v5077_v51 = vld [vmem:[%s6108_s3] ss:$16 sps:$4 sm:$0xff]  }
 0x16c   : > { %v2017_v61 = vmax.f32 %v1375_v13, 0.0  ;;  %v2019_v2 = vmax.f32 %v1728_v57, 0.0  ;;  %v5080_v13 = vld [vmem:[%s6108_s3 + $0x24] ss:$16 sps:$4 sm:$0xff]  }
 0x16d   : > { %v2212_v1 = vpack.c.bf16 %v2016_v25, %v2012_v56  ;;  %v2214_v4 = vpack.c.bf16 %v2018_v60, %v2014_v36 }
 0x16e   : > { %v1378_v3 = vpop.f32.mrb[60].mxu0  ;;  %v2213_v5 = vpack.c.bf16 %v2017_v61, %v2013_v59  ;;  %v1731_v7 = vpop.f32.mrb[60].mxu1  ;;  %v2215_v9 = vpack.c.bf16 %v2019_v2, %v2015_v63 }
 0x16f   : > { %v1379_v6 = vadd.f32 %v1378_v3, %v690_v62  ;;  %v1380_v18 = vpop.f32.mrb[61].mxu0  ;;  %v1732_v41 = vadd.f32 %v1731_v7, %v690_v62  ;;  %v1733_v30 = vpop.f32.mrb[61].mxu1 }
 0x170   : > { %v1381_v10 = vadd.f32 %v1380_v18, %v690_v62  ;;  %v1382_v12 = vpop.f32.mrb[62].mxu0  ;;  %v1734_v14 = vadd.f32 %v1733_v30, %v690_v62  ;;  %v1735_v16 = vpop.f32.mrb[62].mxu1  ;;  %2888 = vmatprep.subr.bf16.mxu0 %v2213_v5  ;;  %3274 = vmatprep.subr.bf16.mxu1 %v2215_v9 }
 0x171   : > { %v1383_v15 = vadd.f32 %v1382_v12, %v695_v58  ;;  %v1736_v11 = vadd.f32 %v1735_v16, %v695_v58  ;;  %v1384_v17 = vpop.f32.mrb[63].mxu0  ;;  %v1737_v20 = vpop.f32.mrb[63].mxu1  ;;  %2889 = vmatpush1.bf16.msra.mxu0 %v2212_v1  ;;  %v2020_v21 = vmax.f32 %v1379_v6, 0.0  ;;  %3275 = vmatpush1.bf16.msra.mxu1 %v2214_v4  ;;  %v2022_v42 = vmax.f32 %v1732_v41, 0.0 }
 0x172   : > { %v1385_v19 = vadd.f32 %v1384_v17, %v695_v58  ;;  %v1738_v24 = vadd.f32 %v1737_v20, %v695_v58  ;;  %v2021_v26 = vmax.f32 %v1381_v10, 0.0  ;;  %v2023_v28 = vmax.f32 %v1734_v14, 0.0  ;;  %v715_v60 = vpop.permute.xlu1 %714  ;;  %v710_v1 = vpop.permute.xlu0 %709 }
 0x173   : > { %v2024_v22 = vmax.f32 %v1383_v15, 0.0  ;;  %v2026_v27 = vmax.f32 %v1736_v11, 0.0  ;;  %v5082_v11 = vld [vmem:[%s6108_s3 + $0x20] ss:$16 sps:$4 sm:$0xff]  }
 0x174   : > { %v2025_v32 = vmax.f32 %v1385_v19, 0.0  ;;  %v2027_v33 = vmax.f32 %v1738_v24, 0.0 }
 0x175   : > { %v2216_v29 = vpack.c.bf16 %v2024_v22, %v2020_v21  ;;  %v2218_v37 = vpack.c.bf16 %v2026_v27, %v2022_v42  ;;  %v5083_v22 = vld [vmem:[%s6108_s3 + $0x44] ss:$16 sps:$4 sm:$0xff]  }
 0x176   : > { %v1388_v38 = vpop.f32.mrb[64].mxu0  ;;  %v2217_v39 = vpack.c.bf16 %v2025_v32, %v2021_v26  ;;  %v2219_v40 = vpack.c.bf16 %v2027_v33, %v2023_v28  ;;  %v1741_v43 = vpop.f32.mrb[64].mxu1 }
 0x177   : > { %v1389_v8 = vadd.f32 %v1388_v38, %v700_v35  ;;  %v1390_v44 = vpop.f32.mrb[65].mxu0  ;;  %v1742_v46 = vadd.f32 %v1741_v43, %v700_v35  ;;  %v1743_v47 = vpop.f32.mrb[65].mxu1 }
 0x178   : > { %v1391_v23 = vadd.f32 %v1390_v44, %v700_v35  ;;  %v1392_v45 = vpop.f32.mrb[66].mxu0  ;;  %v1744_v48 = vadd.f32 %v1743_v47, %v700_v35  ;;  %v1745_v49 = vpop.f32.mrb[66].mxu1  ;;  %2890 = vmatprep.subr.bf16.mxu0 %v2217_v39  ;;  %3276 = vmatprep.subr.bf16.mxu1 %v2219_v40 }
 0x179   : > { %v1393_v34 = vadd.f32 %v1392_v45, %v705_v31  ;;  %v1394_v50 = vpop.f32.mrb[67].mxu0  ;;  %v1746_v52 = vadd.f32 %v1745_v49, %v705_v31  ;;  %v1747_v54 = vpop.f32.mrb[67].mxu1  ;;  %2891 = vmatpush1.bf16.msra.mxu0 %v2216_v29  ;;  %3277 = vmatpush1.bf16.msra.mxu1 %v2218_v37  ;;  %v2028_v55 = vmax.f32 %v1389_v8, 0.0  ;;  %v2030_v57 = vmax.f32 %v1742_v46, 0.0 }
 0x17a   : > { %v1395_v53 = vadd.f32 %v1394_v50, %v705_v31  ;;  %v1748_v25 = vadd.f32 %v1747_v54, %v705_v31  ;;  %v2029_v58 = vmax.f32 %v1391_v23, 0.0  ;;  %v2031_v61 = vmax.f32 %v1744_v48, 0.0  ;;  %v725_v29 = vpop.permute.xlu1 %724  ;;  %v720_v37 = vpop.permute.xlu0 %719 }
 0x17b   : > { %v2032_v56 = vmax.f32 %v1393_v34, 0.0  ;;  %v2034_v36 = vmax.f32 %v1746_v52, 0.0  ;;  %v5085_v52 = vld [vmem:[%s6108_s3 + $0x40] ss:$16 sps:$4 sm:$0xff]  }
 0x17c   : > { %v2033_v59 = vmax.f32 %v1395_v53, 0.0  ;;  %v2035_v63 = vmax.f32 %v1748_v25, 0.0  ;;  %2893 = vmatmul.mubr.bf16.vlgmr.msra.gmra.mrb[128].mxu0 %v5077_v51  ;;  %3279 = vmatmul.mubr.bf16.vlgmr.msra.gmra.mrb[128].mxu1 %v5077_v51 }
 0x17d   : > { %v2220_v62 = vpack.c.bf16 %v2032_v56, %v2028_v55  ;;  %v2222_v2 = vpack.c.bf16 %v2034_v36, %v2030_v57  ;;  %2902 = vmatprep.mubr.bf16.mxu0 %v5080_v13  ;;  %3288 = vmatprep.mubr.bf16.mxu1 %v5080_v13  ;;  %v5086_v55 = vld [vmem:[%s6108_s3 + $0x64] ss:$16 sps:$4 sm:$0xff]  }
 0x17e   : > { %v2221_v3 = vpack.c.bf16 %v2033_v59, %v2029_v58  ;;  %v1398_v4 = vpop.f32.mrb[68].mxu0  ;;  %v2223_v5 = vpack.c.bf16 %v2035_v63, %v2031_v61  ;;  %v1751_v7 = vpop.f32.mrb[68].mxu1 }
 0x17f   : > { %v1399_v6 = vadd.f32 %v1398_v4, %v710_v1  ;;  %v1400_v18 = vpop.f32.mrb[69].mxu0  ;;  %v1752_v9 = vadd.f32 %v1751_v7, %v710_v1  ;;  %v1753_v10 = vpop.f32.mrb[69].mxu1 }
 0x180   : > { %v1401_v41 = vadd.f32 %v1400_v18, %v710_v1  ;;  %v1402_v30 = vpop.f32.mrb[70].mxu0  ;;  %3053 = vmatprep.subr.bf16.mxu0 %v2221_v3  ;;  %v1754_v12 = vadd.f32 %v1753_v10, %v710_v1  ;;  %v1755_v15 = vpop.f32.mrb[70].mxu1  ;;  %3439 = vmatprep.subr.bf16.mxu1 %v2223_v5 }
 0x181   : > { %v1403_v14 = vadd.f32 %v1402_v30, %v715_v60  ;;  %v1404_v16 = vpop.f32.mrb[71].mxu0  ;;  %3054 = vmatpush1.bf16.msra.mxu0 %v2220_v62  ;;  %v1756_v17 = vadd.f32 %v1755_v15, %v715_v60  ;;  %v1757_v21 = vpop.f32.mrb[71].mxu1  ;;  %3440 = vmatpush1.bf16.msra.mxu1 %v2222_v2  ;;  %v2036_v19 = vmax.f32 %v1399_v6, 0.0  ;;  %v2038_v26 = vmax.f32 %v1752_v9, 0.0 }
 0x182   : > { %v1405_v20 = vadd.f32 %v1404_v16, %v715_v60  ;;  %v1758_v42 = vadd.f32 %v1757_v21, %v715_v60  ;;  %v2037_v27 = vmax.f32 %v1401_v41, 0.0  ;;  %v2039_v32 = vmax.f32 %v1754_v12, 0.0  ;;  %v735_v61 = vpop.permute.xlu1 %734  ;;  %v730_v2 = vpop.permute.xlu0 %729 }
 0x183   : > { %v2040_v24 = vmax.f32 %v1403_v14, 0.0  ;;  %v2042_v31 = vmax.f32 %v1756_v17, 0.0  ;;  %v5088_v17 = vld [vmem:[%s6108_s3 + $0x60] ss:$16 sps:$4 sm:$0xff]  }
 0x184   : > { %v2041_v28 = vmax.f32 %v1405_v20, 0.0  ;;  %v2043_v35 = vmax.f32 %v1758_v42, 0.0  ;;  %2903 = vmatmul.mubr.bf16.gmra.mrb[132].mxu0 %v5082_v11  ;;  %3289 = vmatmul.mubr.bf16.gmra.mrb[132].mxu1 %v5082_v11 }
 0x185   : > { %v2224_v33 = vpack.c.bf16 %v2040_v24, %v2036_v19  ;;  %v2226_v38 = vpack.c.bf16 %v2042_v31, %v2038_v26  ;;  %2912 = vmatprep.mubr.bf16.mxu0 %v5083_v22  ;;  %3298 = vmatprep.mubr.bf16.mxu1 %v5083_v22  ;;  %v5089_v19 = vld [vmem:[%s6108_s3 + $0x84] ss:$16 sps:$4 sm:$0xff]  }
 0x186   : > { %v2225_v39 = vpack.c.bf16 %v2041_v28, %v2037_v27  ;;  %v1408_v40 = vpop.f32.mrb[72].mxu0  ;;  %v2227_v8 = vpack.c.bf16 %v2043_v35, %v2039_v32  ;;  %v1761_v44 = vpop.f32.mrb[72].mxu1 }
 0x187   : > { %v1409_v43 = vadd.f32 %v1408_v40, %v720_v37  ;;  %v1410_v46 = vpop.f32.mrb[73].mxu0  ;;  %v1762_v23 = vadd.f32 %v1761_v44, %v720_v37  ;;  %v1763_v45 = vpop.f32.mrb[73].mxu1 }
 0x188   : > { %v1411_v47 = vadd.f32 %v1410_v46, %v720_v37  ;;  %v1412_v48 = vpop.f32.mrb[74].mxu0  ;;  %3055 = vmatprep.subr.bf16.mxu0 %v2225_v39  ;;  %v1764_v34 = vadd.f32 %v1763_v45, %v720_v37  ;;  %v1765_v50 = vpop.f32.mrb[74].mxu1  ;;  %3441 = vmatprep.subr.bf16.mxu1 %v2227_v8 }
 0x189   : > { %v1413_v49 = vadd.f32 %v1412_v48, %v725_v29  ;;  %v1414_v51 = vpop.f32.mrb[75].mxu0  ;;  %3056 = vmatpush1.bf16.msra.mxu0 %v2224_v33  ;;  %v1766_v53 = vadd.f32 %v1765_v50, %v725_v29  ;;  %v1767_v13 = vpop.f32.mrb[75].mxu1  ;;  %3442 = vmatpush1.bf16.msra.mxu1 %v2226_v38  ;;  %v2044_v56 = vmax.f32 %v1409_v43, 0.0  ;;  %v2046_v58 = vmax.f32 %v1762_v23, 0.0 }
 0x18a   : > { %v1415_v54 = vadd.f32 %v1414_v51, %v725_v29  ;;  %v1768_v57 = vadd.f32 %v1767_v13, %v725_v29  ;;  %v2045_v36 = vmax.f32 %v1411_v47, 0.0  ;;  %v2047_v62 = vmax.f32 %v1764_v34, 0.0  ;;  %v745_v32 = vpop.permute.xlu1 %744  ;;  %v740_v38 = vpop.permute.xlu0 %739 }
 0x18b   : > { %v2048_v25 = vmax.f32 %v1413_v49, 0.0  ;;  %v2050_v59 = vmax.f32 %v1766_v53, 0.0  ;;  %v5091_v53 = vld [vmem:[%s6108_s3 + $0x80] ss:$16 sps:$4 sm:$0xff]  }
 0x18c   : > { %v2049_v60 = vmax.f32 %v1415_v54, 0.0  ;;  %v2051_v1 = vmax.f32 %v1768_v57, 0.0  ;;  %2913 = vmatmul.mubr.bf16.gmra.mrb[136].mxu0 %v5085_v52  ;;  %3299 = vmatmul.mubr.bf16.gmra.mrb[136].mxu1 %v5085_v52 }
 0x18d   : > { %v2228_v63 = vpack.c.bf16 %v2048_v25, %v2044_v56  ;;  %v2230_v3 = vpack.c.bf16 %v2050_v59, %v2046_v58  ;;  %2922 = vmatprep.mubr.bf16.mxu0 %v5086_v55  ;;  %3308 = vmatprep.mubr.bf16.mxu1 %v5086_v55  ;;  %v5092_v56 = vld [vmem:[%s6108_s3 + $0xa4] ss:$16 sps:$4 sm:$0xff]  }
 0x18e   : > { %v2229_v4 = vpack.c.bf16 %v2049_v60, %v2045_v36  ;;  %v1418_v5 = vpop.f32.mrb[76].mxu0  ;;  %v2231_v6 = vpack.c.bf16 %v2051_v1, %v2047_v62  ;;  %v1771_v18 = vpop.f32.mrb[76].mxu1 }
 0x18f   : > { %v1419_v7 = vadd.f32 %v1418_v5, %v730_v2  ;;  %v1420_v9 = vpop.f32.mrb[77].mxu0  ;;  %v1772_v41 = vadd.f32 %v1771_v18, %v730_v2  ;;  %v1773_v30 = vpop.f32.mrb[77].mxu1 }
 0x190   : > { %v1421_v10 = vadd.f32 %v1420_v9, %v730_v2  ;;  %v1422_v12 = vpop.f32.mrb[78].mxu0  ;;  %3057 = vmatprep.subr.bf16.mxu0 %v2229_v4  ;;  %v1774_v14 = vadd.f32 %v1773_v30, %v730_v2  ;;  %v1775_v16 = vpop.f32.mrb[78].mxu1  ;;  %3443 = vmatprep.subr.bf16.mxu1 %v2231_v6 }
 0x191   : > { %v1423_v15 = vadd.f32 %v1422_v12, %v735_v61  ;;  %v1424_v11 = vpop.f32.mrb[79].mxu0  ;;  %3058 = vmatpush1.bf16.msra.mxu0 %v2228_v63  ;;  %v1776_v20 = vadd.f32 %v1775_v16, %v735_v61  ;;  %v1777_v22 = vpop.f32.mrb[79].mxu1  ;;  %3444 = vmatpush1.bf16.msra.mxu1 %v2230_v3  ;;  %v2052_v24 = vmax.f32 %v1419_v7, 0.0  ;;  %v2054_v27 = vmax.f32 %v1772_v41, 0.0 }
 0x192   : > { %v1425_v21 = vadd.f32 %v1424_v11, %v735_v61  ;;  %v1778_v26 = vadd.f32 %v1777_v22, %v735_v61  ;;  %v2053_v31 = vmax.f32 %v1421_v10, 0.0  ;;  %v2055_v33 = vmax.f32 %v1774_v14, 0.0  ;;  %v755_v62 = vpop.permute.xlu1 %754  ;;  %v750_v3 = vpop.permute.xlu0 %749 }
 0x193   : > { %v2056_v42 = vmax.f32 %v1423_v15, 0.0  ;;  %v2058_v28 = vmax.f32 %v1776_v20, 0.0  ;;  %v5094_v20 = vld [vmem:[%s6108_s3 + $0xa0] ss:$16 sps:$4 sm:$0xff]  }
 0x194   : > { %v2057_v29 = vmax.f32 %v1425_v21, 0.0  ;;  %v2059_v37 = vmax.f32 %v1778_v26, 0.0  ;;  %2923 = vmatmul.mubr.bf16.gmra.mrb[140].mxu0 %v5088_v17  ;;  %3309 = vmatmul.mubr.bf16.gmra.mrb[140].mxu1 %v5088_v17 }
 0x195   : > { %v2232_v35 = vpack.c.bf16 %v2056_v42, %v2052_v24  ;;  %v2234_v39 = vpack.c.bf16 %v2058_v28, %v2054_v27  ;;  %2932 = vmatprep.mubr.bf16.mxu0 %v5089_v19  ;;  %3318 = vmatprep.mubr.bf16.mxu1 %v5089_v19  ;;  %v5095_v24 = vld [vmem:[%s6108_s3 + $0xc4] ss:$16 sps:$4 sm:$0xff]  }
 0x196   : > { %v2233_v40 = vpack.c.bf16 %v2057_v29, %v2053_v31  ;;  %v1428_v8 = vpop.f32.mrb[80].mxu0  ;;  %v2235_v43 = vpack.c.bf16 %v2059_v37, %v2055_v33  ;;  %v1781_v46 = vpop.f32.mrb[80].mxu1 }
 0x197   : > { %v1429_v44 = vadd.f32 %v1428_v8, %v740_v38  ;;  %v1430_v23 = vpop.f32.mrb[81].mxu0  ;;  %v1782_v47 = vadd.f32 %v1781_v46, %v740_v38  ;;  %v1783_v48 = vpop.f32.mrb[81].mxu1 }
 0x198   : > { %v1431_v45 = vadd.f32 %v1430_v23, %v740_v38  ;;  %v1432_v34 = vpop.f32.mrb[82].mxu0  ;;  %3059 = vmatprep.subr.bf16.mxu0 %v2233_v40  ;;  %v1784_v49 = vadd.f32 %v1783_v48, %v740_v38  ;;  %v1785_v51 = vpop.f32.mrb[82].mxu1  ;;  %3445 = vmatprep.subr.bf16.mxu1 %v2235_v43 }
 0x199   : > { %v1433_v50 = vadd.f32 %v1432_v34, %v745_v32  ;;  %v1434_v52 = vpop.f32.mrb[83].mxu0  ;;  %3060 = vmatpush1.bf16.msra.mxu0 %v2232_v35  ;;  %v1786_v54 = vadd.f32 %v1785_v51, %v745_v32  ;;  %v1787_v55 = vpop.f32.mrb[83].mxu1  ;;  %3446 = vmatpush1.bf16.msra.mxu1 %v2234_v39  ;;  %v2060_v25 = vmax.f32 %v1429_v44, 0.0  ;;  %v2062_v36 = vmax.f32 %v1782_v47, 0.0 }
 0x19a   : > { %v1435_v13 = vadd.f32 %v1434_v52, %v745_v32  ;;  %v1788_v58 = vadd.f32 %v1787_v55, %v745_v32  ;;  %v2061_v59 = vmax.f32 %v1431_v45, 0.0  ;;  %v2063_v63 = vmax.f32 %v1784_v49, 0.0  ;;  %v765_v33 = vpop.permute.xlu1 %764  ;;  %v760_v39 = vpop.permute.xlu0 %759 }
 0x19b   : > { %v2064_v57 = vmax.f32 %v1433_v50, 0.0  ;;  %v2066_v60 = vmax.f32 %v1786_v54, 0.0  ;;  %v5097_v54 = vld [vmem:[%s6108_s3 + $0xc0] ss:$16 sps:$4 sm:$0xff]  }
 0x19c   : > { %v2065_v61 = vmax.f32 %v1435_v13, 0.0  ;;  %v2067_v2 = vmax.f32 %v1788_v58, 0.0  ;;  %2933 = vmatmul.mubr.bf16.gmra.mrb[144].mxu0 %v5091_v53  ;;  %3319 = vmatmul.mubr.bf16.gmra.mrb[144].mxu1 %v5091_v53 }
 0x19d   : > { %v2236_v1 = vpack.c.bf16 %v2064_v57, %v2060_v25  ;;  %v2238_v4 = vpack.c.bf16 %v2066_v60, %v2062_v36  ;;  %2942 = vmatprep.mubr.bf16.mxu0 %v5092_v56  ;;  %3328 = vmatprep.mubr.bf16.mxu1 %v5092_v56  ;;  %v5098_v25 = vld [vmem:[%s6108_s3 + $0xe4] ss:$16 sps:$4 sm:$0xff]  }
 0x19e   : > { %v2237_v5 = vpack.c.bf16 %v2065_v61, %v2061_v59  ;;  %v1438_v6 = vpop.f32.mrb[84].mxu0  ;;  %v2239_v7 = vpack.c.bf16 %v2067_v2, %v2063_v63  ;;  %v1791_v9 = vpop.f32.mrb[84].mxu1 }
 0x19f   : > { %v1439_v18 = vadd.f32 %v1438_v6, %v750_v3  ;;  %v1440_v41 = vpop.f32.mrb[85].mxu0  ;;  %v1792_v10 = vadd.f32 %v1791_v9, %v750_v3  ;;  %v1793_v12 = vpop.f32.mrb[85].mxu1 }
 0x1a0   : > { %v1441_v30 = vadd.f32 %v1440_v41, %v750_v3  ;;  %v1442_v14 = vpop.f32.mrb[86].mxu0  ;;  %3061 = vmatprep.subr.bf16.mxu0 %v2237_v5  ;;  %v1794_v15 = vadd.f32 %v1793_v12, %v750_v3  ;;  %v1795_v11 = vpop.f32.mrb[86].mxu1  ;;  %3447 = vmatprep.subr.bf16.mxu1 %v2239_v7 }
 0x1a1   : > { %v1443_v16 = vadd.f32 %v1442_v14, %v755_v62  ;;  %v1444_v17 = vpop.f32.mrb[87].mxu0  ;;  %3062 = vmatpush1.bf16.msra.mxu0 %v2236_v1  ;;  %v1796_v21 = vadd.f32 %v1795_v11, %v755_v62  ;;  %v1797_v19 = vpop.f32.mrb[87].mxu1  ;;  %3448 = vmatpush1.bf16.msra.mxu1 %v2238_v4  ;;  %v2068_v42 = vmax.f32 %v1439_v18, 0.0  ;;  %v2070_v31 = vmax.f32 %v1792_v10, 0.0 }
 0x1a2   : > { %v1445_v22 = vadd.f32 %v1444_v17, %v755_v62  ;;  %v1798_v27 = vadd.f32 %v1797_v19, %v755_v62  ;;  %v2069_v28 = vmax.f32 %v1441_v30, 0.0  ;;  %v2071_v35 = vmax.f32 %v1794_v15, 0.0  ;;  %v775_v63 = vpop.permute.xlu1 %774  ;;  %v770_v4 = vpop.permute.xlu0 %769 }
 0x1a3   : > { %v2072_v26 = vmax.f32 %v1443_v16, 0.0  ;;  %v2074_v29 = vmax.f32 %v1796_v21, 0.0  ;;  %v5100_v21 = vld [vmem:[%s6108_s3 + $0xe0] ss:$16 sps:$4 sm:$0xff]  }
 0x1a4   : > { %v2073_v32 = vmax.f32 %v1445_v22, 0.0  ;;  %v2075_v38 = vmax.f32 %v1798_v27, 0.0  ;;  %2943 = vmatmul.mubr.bf16.gmra.mrb[148].mxu0 %v5094_v20  ;;  %3329 = vmatmul.mubr.bf16.gmra.mrb[148].mxu1 %v5094_v20 }
 0x1a5   : > { %v2240_v37 = vpack.c.bf16 %v2072_v26, %v2068_v42  ;;  %v2242_v40 = vpack.c.bf16 %v2074_v29, %v2070_v31  ;;  %2952 = vmatprep.mubr.bf16.mxu0 %v5095_v24  ;;  %3338 = vmatprep.mubr.bf16.mxu1 %v5095_v24  ;;  %v5101_v42 = vld [vmem:[%s6108_s3 + $0x104] ss:$16 sps:$4 sm:$0xff]  }
 0x1a6   : > { %v2241_v8 = vpack.c.bf16 %v2073_v32, %v2069_v28  ;;  %v1448_v43 = vpop.f32.mrb[88].mxu0  ;;  %v2243_v44 = vpack.c.bf16 %v2075_v38, %v2071_v35  ;;  %v1801_v23 = vpop.f32.mrb[88].mxu1 }
 0x1a7   : > { %v1449_v46 = vadd.f32 %v1448_v43, %v760_v39  ;;  %v1450_v47 = vpop.f32.mrb[89].mxu0  ;;  %v1802_v45 = vadd.f32 %v1801_v23, %v760_v39  ;;  %v1803_v34 = vpop.f32.mrb[89].mxu1 }
 0x1a8   : > { %v1451_v48 = vadd.f32 %v1450_v47, %v760_v39  ;;  %v1452_v49 = vpop.f32.mrb[90].mxu0  ;;  %3063 = vmatprep.subr.bf16.mxu0 %v2241_v8  ;;  %v1804_v50 = vadd.f32 %v1803_v34, %v760_v39  ;;  %v1805_v52 = vpop.f32.mrb[90].mxu1  ;;  %3449 = vmatprep.subr.bf16.mxu1 %v2243_v44 }
 0x1a9   : > { %v1453_v51 = vadd.f32 %v1452_v49, %v765_v33  ;;  %v1454_v53 = vpop.f32.mrb[91].mxu0  ;;  %3064 = vmatpush1.bf16.msra.mxu0 %v2240_v37  ;;  %v1806_v13 = vadd.f32 %v1805_v52, %v765_v33  ;;  %v1807_v56 = vpop.f32.mrb[91].mxu1  ;;  %3450 = vmatpush1.bf16.msra.mxu1 %v2242_v40  ;;  %v2076_v57 = vmax.f32 %v1449_v46, 0.0  ;;  %v2078_v59 = vmax.f32 %v1802_v45, 0.0 }
 0x1aa   : > { %v1455_v55 = vadd.f32 %v1454_v53, %v765_v33  ;;  %v1808_v36 = vadd.f32 %v1807_v56, %v765_v33  ;;  %v2077_v60 = vmax.f32 %v1451_v48, 0.0  ;;  %v2079_v1 = vmax.f32 %v1804_v50, 0.0  ;;  %v785_v35 = vpop.permute.xlu1 %784  ;;  %v780_v40 = vpop.permute.xlu0 %779 }
 0x1ab   : > { %v2080_v58 = vmax.f32 %v1453_v51, 0.0  ;;  %v2082_v61 = vmax.f32 %v1806_v13, 0.0  ;;  %v5103_v13 = vld [vmem:[%s6108_s3 + $0x100] ss:$16 sps:$4 sm:$0xff]  }
 0x1ac   : > { %v2081_v62 = vmax.f32 %v1455_v55, 0.0  ;;  %v2083_v3 = vmax.f32 %v1808_v36, 0.0  ;;  %2953 = vmatmul.mubr.bf16.gmra.mrb[152].mxu0 %v5097_v54  ;;  %3339 = vmatmul.mubr.bf16.gmra.mrb[152].mxu1 %v5097_v54 }
 0x1ad   : > { %v2244_v2 = vpack.c.bf16 %v2080_v58, %v2076_v57  ;;  %v2246_v5 = vpack.c.bf16 %v2082_v61, %v2078_v59  ;;  %2962 = vmatprep.mubr.bf16.mxu0 %v5098_v25  ;;  %3348 = vmatprep.mubr.bf16.mxu1 %v5098_v25  ;;  %v5104_v57 = vld [vmem:[%s6108_s3 + $0x124] ss:$16 sps:$4 sm:$0xff]  }
 0x1ae   : > { %v2245_v6 = vpack.c.bf16 %v2081_v62, %v2077_v60  ;;  %v1458_v7 = vpop.f32.mrb[92].mxu0  ;;  %v2247_v18 = vpack.c.bf16 %v2083_v3, %v2079_v1  ;;  %v1811_v41 = vpop.f32.mrb[92].mxu1 }
 0x1af   : > { %v1459_v9 = vadd.f32 %v1458_v7, %v770_v4  ;;  %v1460_v10 = vpop.f32.mrb[93].mxu0  ;;  %v1812_v30 = vadd.f32 %v1811_v41, %v770_v4  ;;  %v1813_v14 = vpop.f32.mrb[93].mxu1 }
 0x1b0   : > { %v1461_v12 = vadd.f32 %v1460_v10, %v770_v4  ;;  %v1462_v15 = vpop.f32.mrb[94].mxu0  ;;  %3065 = vmatprep.subr.bf16.mxu0 %v2245_v6  ;;  %v1814_v16 = vadd.f32 %v1813_v14, %v770_v4  ;;  %v1815_v17 = vpop.f32.mrb[94].mxu1  ;;  %3451 = vmatprep.subr.bf16.mxu1 %v2247_v18 }
 0x1b1   : > { %v1463_v11 = vadd.f32 %v1462_v15, %v775_v63  ;;  %v1464_v20 = vpop.f32.mrb[95].mxu0  ;;  %3066 = vmatpush1.bf16.msra.mxu0 %v2244_v2  ;;  %v1816_v22 = vadd.f32 %v1815_v17, %v775_v63  ;;  %v1817_v24 = vpop.f32.mrb[95].mxu1  ;;  %3452 = vmatpush1.bf16.msra.mxu1 %v2246_v5  ;;  %v2084_v26 = vmax.f32 %v1459_v9, 0.0  ;;  %v2086_v28 = vmax.f32 %v1812_v30, 0.0 }
 0x1b2   : > { %v1465_v19 = vadd.f32 %v1464_v20, %v775_v63  ;;  %v1818_v31 = vadd.f32 %v1817_v24, %v775_v63  ;;  %v2085_v29 = vmax.f32 %v1461_v12, 0.0  ;;  %v2087_v37 = vmax.f32 %v1814_v16, 0.0  ;;  %v795_v1 = vpop.permute.xlu1 %794  ;;  %v790_v5 = vpop.permute.xlu0 %789 }
 0x1b3   : > { %v2088_v27 = vmax.f32 %v1463_v11, 0.0  ;;  %v2090_v32 = vmax.f32 %v1816_v22, 0.0  ;;  %v5106_v22 = vld [vmem:[%s6108_s3 + $0x120] ss:$16 sps:$4 sm:$0xff]  }
 0x1b4   : > { %v2089_v33 = vmax.f32 %v1465_v19, 0.0  ;;  %v2091_v39 = vmax.f32 %v1818_v31, 0.0  ;;  %2963 = vmatmul.mubr.bf16.gmra.mrb[156].mxu0 %v5100_v21  ;;  %3349 = vmatmul.mubr.bf16.gmra.mrb[156].mxu1 %v5100_v21 }
 0x1b5   : > { %v2248_v38 = vpack.c.bf16 %v2088_v27, %v2084_v26  ;;  %v2250_v8 = vpack.c.bf16 %v2090_v32, %v2086_v28  ;;  %2972 = vmatprep.mubr.bf16.mxu0 %v5101_v42  ;;  %3358 = vmatprep.mubr.bf16.mxu1 %v5101_v42  ;;  %v5107_v26 = vld [vmem:[%s6108_s3 + $0x144] ss:$16 sps:$4 sm:$0xff]  }
 0x1b6   : > { %v2249_v43 = vpack.c.bf16 %v2089_v33, %v2085_v29  ;;  %v1468_v44 = vpop.f32.mrb[96].mxu0  ;;  %v2251_v46 = vpack.c.bf16 %v2091_v39, %v2087_v37  ;;  %v1821_v47 = vpop.f32.mrb[96].mxu1 }
 0x1b7   : > { %v1469_v23 = vadd.f32 %v1468_v44, %v780_v40  ;;  %v1470_v45 = vpop.f32.mrb[97].mxu0  ;;  %v1822_v48 = vadd.f32 %v1821_v47, %v780_v40  ;;  %v1823_v49 = vpop.f32.mrb[97].mxu1 }
 0x1b8   : > { %v1471_v34 = vadd.f32 %v1470_v45, %v780_v40  ;;  %v1472_v50 = vpop.f32.mrb[98].mxu0  ;;  %3067 = vmatprep.subr.bf16.mxu0 %v2249_v43  ;;  %v1824_v51 = vadd.f32 %v1823_v49, %v780_v40  ;;  %v1825_v53 = vpop.f32.mrb[98].mxu1  ;;  %3453 = vmatprep.subr.bf16.mxu1 %v2251_v46 }
 0x1b9   : > { %v1473_v52 = vadd.f32 %v1472_v50, %v785_v35  ;;  %v1474_v54 = vpop.f32.mrb[99].mxu0  ;;  %3068 = vmatpush1.bf16.msra.mxu0 %v2248_v38  ;;  %v1826_v55 = vadd.f32 %v1825_v53, %v785_v35  ;;  %v1827_v25 = vpop.f32.mrb[99].mxu1  ;;  %3454 = vmatpush1.bf16.msra.mxu1 %v2250_v8  ;;  %v2092_v58 = vmax.f32 %v1469_v23, 0.0  ;;  %v2094_v60 = vmax.f32 %v1822_v48, 0.0 }
 0x1ba   : > { %v1475_v56 = vadd.f32 %v1474_v54, %v785_v35  ;;  %v1828_v59 = vadd.f32 %v1827_v25, %v785_v35  ;;  %v2093_v61 = vmax.f32 %v1471_v34, 0.0  ;;  %v2095_v2 = vmax.f32 %v1824_v51, 0.0  ;;  %v805_v37 = vpop.permute.xlu1 %804  ;;  %v800_v8 = vpop.permute.xlu0 %799 }
 0x1bb   : > { %v2096_v36 = vmax.f32 %v1473_v52, 0.0  ;;  %v2098_v62 = vmax.f32 %v1826_v55, 0.0  ;;  %v5109_v55 = vld [vmem:[%s6108_s3 + $0x140] ss:$16 sps:$4 sm:$0xff]  }
 0x1bc   : > { %v2097_v63 = vmax.f32 %v1475_v56, 0.0  ;;  %v2099_v4 = vmax.f32 %v1828_v59, 0.0  ;;  %2973 = vmatmul.mubr.bf16.gmra.mrb[160].mxu0 %v5103_v13  ;;  %3359 = vmatmul.mubr.bf16.gmra.mrb[160].mxu1 %v5103_v13 }
 0x1bd   : > { %v2252_v3 = vpack.c.bf16 %v2096_v36, %v2092_v58  ;;  %v2254_v6 = vpack.c.bf16 %v2098_v62, %v2094_v60  ;;  %2982 = vmatprep.mubr.bf16.mxu0 %v5104_v57  ;;  %3368 = vmatprep.mubr.bf16.mxu1 %v5104_v57  ;;  %v5110_v58 = vld [vmem:[%s6108_s3 + $0x164] ss:$16 sps:$4 sm:$0xff]  }
 0x1be   : > { %v2253_v7 = vpack.c.bf16 %v2097_v63, %v2093_v61  ;;  %v1478_v18 = vpop.f32.mrb[100].mxu0  ;;  %v2255_v9 = vpack.c.bf16 %v2099_v4, %v2095_v2  ;;  %v1831_v10 = vpop.f32.mrb[100].mxu1 }
 0x1bf   : > { %v1479_v41 = vadd.f32 %v1478_v18, %v790_v5  ;;  %v1480_v30 = vpop.f32.mrb[101].mxu0  ;;  %v1832_v12 = vadd.f32 %v1831_v10, %v790_v5  ;;  %v1833_v15 = vpop.f32.mrb[101].mxu1 }
 0x1c0   : > { %v1481_v14 = vadd.f32 %v1480_v30, %v790_v5  ;;  %v1482_v16 = vpop.f32.mrb[102].mxu0  ;;  %3069 = vmatprep.subr.bf16.mxu0 %v2253_v7  ;;  %v1834_v11 = vadd.f32 %v1833_v15, %v790_v5  ;;  %v1835_v20 = vpop.f32.mrb[102].mxu1  ;;  %3455 = vmatprep.subr.bf16.mxu1 %v2255_v9 }
 0x1c1   : > { %v1483_v17 = vadd.f32 %v1482_v16, %v795_v1  ;;  %v1484_v21 = vpop.f32.mrb[103].mxu0  ;;  %3070 = vmatpush1.bf16.msra.mxu0 %v2252_v3  ;;  %v1836_v19 = vadd.f32 %v1835_v20, %v795_v1  ;;  %v1837_v42 = vpop.f32.mrb[103].mxu1  ;;  %3456 = vmatpush1.bf16.msra.mxu1 %v2254_v6  ;;  %v2100_v27 = vmax.f32 %v1479_v41, 0.0  ;;  %v2102_v29 = vmax.f32 %v1832_v12, 0.0 }
 0x1c2   : > { %v1485_v24 = vadd.f32 %v1484_v21, %v795_v1  ;;  %v1838_v28 = vadd.f32 %v1837_v42, %v795_v1  ;;  %v2101_v32 = vmax.f32 %v1481_v14, 0.0  ;;  %v2103_v38 = vmax.f32 %v1834_v11, 0.0  ;;  %v815_v2 = vpop.permute.xlu1 %814  ;;  %v810_v6 = vpop.permute.xlu0 %809 }
 0x1c3   : > { %v2104_v31 = vmax.f32 %v1483_v17, 0.0  ;;  %v2106_v33 = vmax.f32 %v1836_v19, 0.0  ;;  %v5112_v19 = vld [vmem:[%s6108_s3 + $0x160] ss:$16 sps:$4 sm:$0xff]  }
 0x1c4   : > { %v2105_v35 = vmax.f32 %v1485_v24, 0.0  ;;  %v2107_v40 = vmax.f32 %v1838_v28, 0.0  ;;  %2983 = vmatmul.mubr.bf16.gmra.mrb[164].mxu0 %v5106_v22  ;;  %3369 = vmatmul.mubr.bf16.gmra.mrb[164].mxu1 %v5106_v22 }
 0x1c5   : > { %v2256_v39 = vpack.c.bf16 %v2104_v31, %v2100_v27  ;;  %v2258_v43 = vpack.c.bf16 %v2106_v33, %v2102_v29  ;;  %2992 = vmatprep.mubr.bf16.mxu0 %v5107_v26  ;;  %3378 = vmatprep.mubr.bf16.mxu1 %v5107_v26  ;;  %v5113_v27 = vld [vmem:[%s6108_s3 + $0x184] ss:$16 sps:$4 sm:$0xff]  }
 0x1c6   : > { %v2257_v44 = vpack.c.bf16 %v2105_v35, %v2101_v32  ;;  %v1488_v46 = vpop.f32.mrb[104].mxu0  ;;  %v2259_v23 = vpack.c.bf16 %v2107_v40, %v2103_v38  ;;  %v1841_v45 = vpop.f32.mrb[104].mxu1 }
 0x1c7   : > { %v1489_v47 = vadd.f32 %v1488_v46, %v800_v8  ;;  %v1490_v48 = vpop.f32.mrb[105].mxu0  ;;  %v1842_v34 = vadd.f32 %v1841_v45, %v800_v8  ;;  %v1843_v50 = vpop.f32.mrb[105].mxu1 }
 0x1c8   : > { %v1491_v49 = vadd.f32 %v1490_v48, %v800_v8  ;;  %v1492_v51 = vpop.f32.mrb[106].mxu0  ;;  %3071 = vmatprep.subr.bf16.mxu0 %v2257_v44  ;;  %v1844_v52 = vadd.f32 %v1843_v50, %v800_v8  ;;  %v1845_v54 = vpop.f32.mrb[106].mxu1  ;;  %3457 = vmatprep.subr.bf16.mxu1 %v2259_v23 }
 0x1c9   : > { %v1493_v53 = vadd.f32 %v1492_v51, %v805_v37  ;;  %v1494_v13 = vpop.f32.mrb[107].mxu0  ;;  %3072 = vmatpush1.bf16.msra.mxu0 %v2256_v39  ;;  %v1846_v56 = vadd.f32 %v1845_v54, %v805_v37  ;;  %v1847_v57 = vpop.f32.mrb[107].mxu1  ;;  %3458 = vmatpush1.bf16.msra.mxu1 %v2258_v43  ;;  %v2108_v36 = vmax.f32 %v1489_v47, 0.0  ;;  %v2110_v61 = vmax.f32 %v1842_v34, 0.0 }
 0x1ca   : > { %v1495_v25 = vadd.f32 %v1494_v13, %v805_v37  ;;  %v1848_v60 = vadd.f32 %v1847_v57, %v805_v37  ;;  %v2109_v62 = vmax.f32 %v1491_v49, 0.0  ;;  %v2111_v3 = vmax.f32 %v1844_v52, 0.0  ;;  %v825_v38 = vpop.permute.xlu1 %824  ;;  %v820_v43 = vpop.permute.xlu0 %819 }
 0x1cb   : > { %v2112_v59 = vmax.f32 %v1493_v53, 0.0  ;;  %v2114_v63 = vmax.f32 %v1846_v56, 0.0  ;;  %v5115_v56 = vld [vmem:[%s6108_s3 + $0x180] ss:$16 sps:$4 sm:$0xff]  }
 0x1cc   : > { %v2113_v1 = vmax.f32 %v1495_v25, 0.0  ;;  %v2115_v5 = vmax.f32 %v1848_v60, 0.0  ;;  %2993 = vmatmul.mubr.bf16.gmra.mrb[168].mxu0 %v5109_v55  ;;  %3379 = vmatmul.mubr.bf16.gmra.mrb[168].mxu1 %v5109_v55 }
 0x1cd   : > { %v2260_v4 = vpack.c.bf16 %v2112_v59, %v2108_v36  ;;  %v2262_v7 = vpack.c.bf16 %v2114_v63, %v2110_v61  ;;  %3002 = vmatprep.mubr.bf16.mxu0 %v5110_v58  ;;  %3388 = vmatprep.mubr.bf16.mxu1 %v5110_v58  ;;  %v5116_v36 = vld [vmem:[%s6108_s3 + $0x1a4] ss:$16 sps:$4 sm:$0xff]  }
 0x1ce   : > { %v2261_v18 = vpack.c.bf16 %v2113_v1, %v2109_v62  ;;  %v1498_v9 = vpop.f32.mrb[108].mxu0  ;;  %v2263_v41 = vpack.c.bf16 %v2115_v5, %v2111_v3  ;;  %v1851_v30 = vpop.f32.mrb[108].mxu1 }
 0x1cf   : > { %v1499_v10 = vadd.f32 %v1498_v9, %v810_v6  ;;  %v1500_v12 = vpop.f32.mrb[109].mxu0  ;;  %v1852_v14 = vadd.f32 %v1851_v30, %v810_v6  ;;  %v1853_v16 = vpop.f32.mrb[109].mxu1 }
 0x1d0   : > { %v1501_v15 = vadd.f32 %v1500_v12, %v810_v6  ;;  %v1502_v11 = vpop.f32.mrb[110].mxu0  ;;  %3073 = vmatprep.subr.bf16.mxu0 %v2261_v18  ;;  %v1854_v17 = vadd.f32 %v1853_v16, %v810_v6  ;;  %v1855_v21 = vpop.f32.mrb[110].mxu1  ;;  %3459 = vmatprep.subr.bf16.mxu1 %v2263_v41 }
 0x1d1   : > { %v1503_v20 = vadd.f32 %v1502_v11, %v815_v2  ;;  %v1504_v22 = vpop.f32.mrb[111].mxu0  ;;  %3074 = vmatpush1.bf16.msra.mxu0 %v2260_v4  ;;  %v1856_v24 = vadd.f32 %v1855_v21, %v815_v2  ;;  %v1857_v26 = vpop.f32.mrb[111].mxu1  ;;  %3460 = vmatpush1.bf16.msra.mxu1 %v2262_v7  ;;  %v2116_v31 = vmax.f32 %v1499_v10, 0.0  ;;  %v2118_v32 = vmax.f32 %v1852_v14, 0.0 }
 0x1d2   : > { %v1505_v42 = vadd.f32 %v1504_v22, %v815_v2  ;;  %v1858_v29 = vadd.f32 %v1857_v26, %v815_v2  ;;  %v2117_v33 = vmax.f32 %v1501_v15, 0.0  ;;  %v2119_v39 = vmax.f32 %v1854_v17, 0.0  ;;  %v835_v3 = vpop.permute.xlu1 %834  ;;  %v830_v7 = vpop.permute.xlu0 %829 }
 0x1d3   : > { %v2120_v28 = vmax.f32 %v1503_v20, 0.0  ;;  %v2122_v35 = vmax.f32 %v1856_v24, 0.0  ;;  %v5118_v24 = vld [vmem:[%s6108_s3 + $0x1a0] ss:$16 sps:$4 sm:$0xff]  }
 0x1d4   : > { %v2121_v37 = vmax.f32 %v1505_v42, 0.0  ;;  %v2123_v8 = vmax.f32 %v1858_v29, 0.0  ;;  %3003 = vmatmul.mubr.bf16.gmra.mrb[172].mxu0 %v5112_v19  ;;  %3389 = vmatmul.mubr.bf16.gmra.mrb[172].mxu1 %v5112_v19 }
 0x1d5   : > { %v2264_v40 = vpack.c.bf16 %v2120_v28, %v2116_v31  ;;  %v2266_v44 = vpack.c.bf16 %v2122_v35, %v2118_v32  ;;  %3012 = vmatprep.mubr.bf16.mxu0 %v5113_v27  ;;  %3398 = vmatprep.mubr.bf16.mxu1 %v5113_v27  ;;  %v5119_v31 = vld [vmem:[%s6108_s3 + $0x1c4] ss:$16 sps:$4 sm:$0xff]  }
 0x1d6   : > { %v2265_v46 = vpack.c.bf16 %v2121_v37, %v2117_v33  ;;  %v1508_v23 = vpop.f32.mrb[112].mxu0  ;;  %v2267_v47 = vpack.c.bf16 %v2123_v8, %v2119_v39  ;;  %v1861_v48 = vpop.f32.mrb[112].mxu1 }
 0x1d7   : > { %v1509_v45 = vadd.f32 %v1508_v23, %v820_v43  ;;  %v1510_v34 = vpop.f32.mrb[113].mxu0  ;;  %v1862_v49 = vadd.f32 %v1861_v48, %v820_v43  ;;  %v1863_v51 = vpop.f32.mrb[113].mxu1 }
 0x1d8   : > { %v1511_v50 = vadd.f32 %v1510_v34, %v820_v43  ;;  %v1512_v52 = vpop.f32.mrb[114].mxu0  ;;  %3075 = vmatprep.subr.bf16.mxu0 %v2265_v46  ;;  %v1864_v53 = vadd.f32 %v1863_v51, %v820_v43  ;;  %v1865_v13 = vpop.f32.mrb[114].mxu1  ;;  %3461 = vmatprep.subr.bf16.mxu1 %v2267_v47 }
 0x1d9   : > { %v1513_v54 = vadd.f32 %v1512_v52, %v825_v38  ;;  %v1514_v55 = vpop.f32.mrb[115].mxu0  ;;  %3076 = vmatpush1.bf16.msra.mxu0 %v2264_v40  ;;  %v1866_v25 = vadd.f32 %v1865_v13, %v825_v38  ;;  %v1867_v58 = vpop.f32.mrb[115].mxu1  ;;  %3462 = vmatpush1.bf16.msra.mxu1 %v2266_v44  ;;  %v2124_v59 = vmax.f32 %v1509_v45, 0.0  ;;  %v2126_v62 = vmax.f32 %v1862_v49, 0.0 }
 0x1da   : > { %v1515_v57 = vadd.f32 %v1514_v55, %v825_v38  ;;  %v1868_v61 = vadd.f32 %v1867_v58, %v825_v38  ;;  %v2125_v63 = vmax.f32 %v1511_v50, 0.0  ;;  %v2127_v4 = vmax.f32 %v1864_v53, 0.0  ;;  %v845_v39 = vpop.permute.xlu1 %844  ;;  %v840_v44 = vpop.permute.xlu0 %839 }
 0x1db   : > { %v2128_v60 = vmax.f32 %v1513_v54, 0.0  ;;  %v2130_v1 = vmax.f32 %v1866_v25, 0.0  ;;  %v5121_v25 = vld [vmem:[%s6108_s3 + $0x1c0] ss:$16 sps:$4 sm:$0xff]  }
 0x1dc   : > { %v2129_v2 = vmax.f32 %v1515_v57, 0.0  ;;  %v2131_v6 = vmax.f32 %v1868_v61, 0.0  ;;  %3013 = vmatmul.mubr.bf16.gmra.mrb[176].mxu0 %v5115_v56  ;;  %3399 = vmatmul.mubr.bf16.gmra.mrb[176].mxu1 %v5115_v56 }
 0x1dd   : > { %v2268_v5 = vpack.c.bf16 %v2128_v60, %v2124_v59  ;;  %v2270_v18 = vpack.c.bf16 %v2130_v1, %v2126_v62  ;;  %3022 = vmatprep.mubr.bf16.mxu0 %v5116_v36  ;;  %3408 = vmatprep.mubr.bf16.mxu1 %v5116_v36  ;;  %v5122_v59 = vld [vmem:[%s6108_s3 + $0x1e4] ss:$16 sps:$4 sm:$0xff]  }
 0x1de   : > { %v2269_v9 = vpack.c.bf16 %v2129_v2, %v2125_v63  ;;  %v1518_v41 = vpop.f32.mrb[116].mxu0  ;;  %v2271_v10 = vpack.c.bf16 %v2131_v6, %v2127_v4  ;;  %v1871_v12 = vpop.f32.mrb[116].mxu1 }
 0x1df   : > { %v1519_v30 = vadd.f32 %v1518_v41, %v830_v7  ;;  %v1520_v14 = vpop.f32.mrb[117].mxu0  ;;  %v1872_v15 = vadd.f32 %v1871_v12, %v830_v7  ;;  %v1873_v11 = vpop.f32.mrb[117].mxu1 }
 0x1e0   : > { %v1521_v16 = vadd.f32 %v1520_v14, %v830_v7  ;;  %v1522_v17 = vpop.f32.mrb[118].mxu0  ;;  %3077 = vmatprep.subr.bf16.mxu0 %v2269_v9  ;;  %v1874_v20 = vadd.f32 %v1873_v11, %v830_v7  ;;  %v1875_v22 = vpop.f32.mrb[118].mxu1  ;;  %3463 = vmatprep.subr.bf16.mxu1 %v2271_v10 }
 0x1e1   : > { %v1523_v21 = vadd.f32 %v1522_v17, %v835_v3  ;;  %v1524_v19 = vpop.f32.mrb[119].mxu0  ;;  %3078 = vmatpush1.bf16.msra.mxu0 %v2268_v5  ;;  %v1876_v42 = vadd.f32 %v1875_v22, %v835_v3  ;;  %v1877_v27 = vpop.f32.mrb[119].mxu1  ;;  %3464 = vmatpush1.bf16.msra.mxu1 %v2270_v18  ;;  %v2132_v28 = vmax.f32 %v1519_v30, 0.0  ;;  %v2134_v33 = vmax.f32 %v1872_v15, 0.0 }
 0x1e2   : > { %v1525_v26 = vadd.f32 %v1524_v19, %v835_v3  ;;  %v1878_v32 = vadd.f32 %v1877_v27, %v835_v3  ;;  %v2133_v35 = vmax.f32 %v1521_v16, 0.0  ;;  %v2135_v40 = vmax.f32 %v1874_v20, 0.0  ;;  %v855_v4 = vpop.permute.xlu1 %854  ;;  %v850_v18 = vpop.permute.xlu0 %849 }
 0x1e3   : > { %v2136_v29 = vmax.f32 %v1523_v21, 0.0  ;;  %v2138_v37 = vmax.f32 %v1876_v42, 0.0  ;;  %v5124_v42 = vld [vmem:[%s6108_s3 + $0x1e0] ss:$16 sps:$4 sm:$0xff]  }
 0x1e4   : > { %v2137_v38 = vmax.f32 %v1525_v26, 0.0  ;;  %v2139_v43 = vmax.f32 %v1878_v32, 0.0  ;;  %3023 = vmatmul.mubr.bf16.gmra.mrb[180].mxu0 %v5118_v24  ;;  %3409 = vmatmul.mubr.bf16.gmra.mrb[180].mxu1 %v5118_v24 }
 0x1e5   : > { %v2272_v8 = vpack.c.bf16 %v2136_v29, %v2132_v28  ;;  %v2274_v46 = vpack.c.bf16 %v2138_v37, %v2134_v33  ;;  %3032 = vmatprep.mubr.bf16.mxu0 %v5119_v31  ;;  %3418 = vmatprep.mubr.bf16.mxu1 %v5119_v31  ;;  %v5127_v28 = vld [vmem:[%s6108_s3 + $0xc] ss:$16 sps:$4 sm:$0xff]  }
 0x1e6   : > { %v2273_v23 = vpack.c.bf16 %v2137_v38, %v2133_v35  ;;  %v1528_v47 = vpop.f32.mrb[120].mxu0  ;;  %v2275_v45 = vpack.c.bf16 %v2139_v43, %v2135_v40  ;;  %v1881_v34 = vpop.f32.mrb[120].mxu1 }
 0x1e7   : > { %v1529_v48 = vadd.f32 %v1528_v47, %v840_v44  ;;  %v1530_v49 = vpop.f32.mrb[121].mxu0  ;;  %v1882_v50 = vadd.f32 %v1881_v34, %v840_v44  ;;  %v1883_v52 = vpop.f32.mrb[121].mxu1  ;;  %v5125_v47 = vld [vmem:[%s6108_s3 + $0x8] ss:$16 sps:$4 sm:$0xff]   ;;  %v5131_v34 = vld [vmem:[%s6108_s3 + $0x4c] ss:$16 sps:$4 sm:$0xff]  }
 0x1e8   : > { %v1531_v51 = vadd.f32 %v1530_v49, %v840_v44  ;;  %v1532_v53 = vpop.f32.mrb[122].mxu0  ;;  %3079 = vmatprep.subr.bf16.mxu0 %v2273_v23  ;;  %v1884_v54 = vadd.f32 %v1883_v52, %v840_v44  ;;  %v1885_v55 = vpop.f32.mrb[122].mxu1  ;;  %3465 = vmatprep.subr.bf16.mxu1 %v2275_v45  ;;  %v5128_v45 = vld [vmem:[%s6108_s3 + $0x2c] ss:$16 sps:$4 sm:$0xff]   ;;  %v5133_v49 = vld [vmem:[%s6108_s3 + $0x48] ss:$16 sps:$4 sm:$0xff]  }
 0x1e9   : > { %v1533_v13 = vadd.f32 %v1532_v53, %v845_v39  ;;  %v1534_v56 = vpop.f32.mrb[123].mxu0  ;;  %3080 = vmatpush1.bf16.msra.mxu0 %v2272_v8  ;;  %v1886_v57 = vadd.f32 %v1885_v55, %v845_v39  ;;  %v1887_v36 = vpop.f32.mrb[123].mxu1  ;;  %3466 = vmatpush1.bf16.msra.mxu1 %v2274_v46  ;;  %v2140_v60 = vmax.f32 %v1529_v48, 0.0  ;;  %v2142_v63 = vmax.f32 %v1882_v50, 0.0  ;;  %v5130_v48 = vld [vmem:[%s6108_s3 + $0x28] ss:$16 sps:$4 sm:$0xff]  }
 0x1ea   : > { %v1535_v58 = vadd.f32 %v1534_v56, %v845_v39  ;;  %v1888_v62 = vadd.f32 %v1887_v36, %v845_v39  ;;  %v2141_v1 = vmax.f32 %v1531_v51, 0.0  ;;  %v2143_v5 = vmax.f32 %v1884_v54, 0.0  ;;  %v5134_v50 = vld [vmem:[%s6108_s3 + $0x6c] ss:$16 sps:$4 sm:$0xff]   ;;  %v5136_v51 = vld [vmem:[%s6108_s3 + $0x68] ss:$16 sps:$4 sm:$0xff]  }
 0x1eb   : > { %v2144_v61 = vmax.f32 %v1533_v13, 0.0  ;;  %v2146_v2 = vmax.f32 %v1886_v57, 0.0  ;;  %v5137_v52 = vld [vmem:[%s6108_s3 + $0x8c] ss:$16 sps:$4 sm:$0xff]   ;;  %v5139_v53 = vld [vmem:[%s6108_s3 + $0x88] ss:$16 sps:$4 sm:$0xff]  }
 0x1ec   : > { %v2145_v3 = vmax.f32 %v1535_v58, 0.0  ;;  %v2147_v7 = vmax.f32 %v1888_v62, 0.0  ;;  %3033 = vmatmul.mubr.bf16.gmra.mrb[184].mxu0 %v5121_v25  ;;  %3419 = vmatmul.mubr.bf16.gmra.mrb[184].mxu1 %v5121_v25  ;;  %v5140_v54 = vld [vmem:[%s6108_s3 + $0xac] ss:$16 sps:$4 sm:$0xff]   ;;  %v5142_v13 = vld [vmem:[%s6108_s3 + $0xa8] ss:$16 sps:$4 sm:$0xff]  }
 0x1ed   : > { %v2276_v6 = vpack.c.bf16 %v2144_v61, %v2140_v60  ;;  %v2278_v9 = vpack.c.bf16 %v2146_v2, %v2142_v63  ;;  %3042 = vmatprep.mubr.bf16.mxu0 %v5122_v59  ;;  %3428 = vmatprep.mubr.bf16.mxu1 %v5122_v59  ;;  %v5143_v55 = vld [vmem:[%s6108_s3 + $0xcc] ss:$16 sps:$4 sm:$0xff]   ;;  %v5145_v56 = vld [vmem:[%s6108_s3 + $0xc8] ss:$16 sps:$4 sm:$0xff]  }
 0x1ee   : > { %v2277_v41 = vpack.c.bf16 %v2145_v3, %v2141_v1  ;;  %v1538_v10 = vpop.f32.mrb[124].mxu0  ;;  %v2279_v30 = vpack.c.bf16 %v2147_v7, %v2143_v5  ;;  %v1891_v14 = vpop.f32.mrb[124].mxu1  ;;  %v5146_v25 = vld [vmem:[%s6108_s3 + $0xec] ss:$16 sps:$4 sm:$0xff]   ;;  %v5148_v57 = vld [vmem:[%s6108_s3 + $0xe8] ss:$16 sps:$4 sm:$0xff]  }
 0x1ef   : > { %v1539_v12 = vadd.f32 %v1538_v10, %v850_v18  ;;  %v1540_v15 = vpop.f32.mrb[125].mxu0  ;;  %v1892_v16 = vadd.f32 %v1891_v14, %v850_v18  ;;  %v1893_v17 = vpop.f32.mrb[125].mxu1  ;;  %v5149_v58 = vld [vmem:[%s6108_s3 + $0x10c] ss:$16 sps:$4 sm:$0xff]   ;;  %v5151_v36 = vld [vmem:[%s6108_s3 + $0x108] ss:$16 sps:$4 sm:$0xff]  }
 0x1f0   : > { %v1541_v11 = vadd.f32 %v1540_v15, %v850_v18  ;;  %v1542_v20 = vpop.f32.mrb[126].mxu0  ;;  %3081 = vmatprep.subr.bf16.mxu0 %v2277_v41  ;;  %v1894_v21 = vadd.f32 %v1893_v17, %v850_v18  ;;  %v1895_v19 = vpop.f32.mrb[126].mxu1  ;;  %3467 = vmatprep.subr.bf16.mxu1 %v2279_v30  ;;  %v5152_v59 = vld [vmem:[%s6108_s3 + $0x12c] ss:$16 sps:$4 sm:$0xff]   ;;  %v5154_v60 = vld [vmem:[%s6108_s3 + $0x128] ss:$16 sps:$4 sm:$0xff]  }
 0x1f1   : > { %v1543_v22 = vadd.f32 %v1542_v20, %v855_v4  ;;  %v1544_v24 = vpop.f32.mrb[127].mxu0  ;;  %3082 = vmatpush1.bf16.msra.mxu0 %v2276_v6  ;;  %v1896_v26 = vadd.f32 %v1895_v19, %v855_v4  ;;  %v1897_v31 = vpop.f32.mrb[127].mxu1  ;;  %3468 = vmatpush1.bf16.msra.mxu1 %v2278_v9  ;;  %v2148_v29 = vmax.f32 %v1539_v12, 0.0  ;;  %v2150_v35 = vmax.f32 %v1892_v16, 0.0  ;;  %v5155_v61 = vld [vmem:[%s6108_s3 + $0x14c] ss:$16 sps:$4 sm:$0xff]  }
 0x1f2   : > { %v1545_v27 = vadd.f32 %v1544_v24, %v855_v4  ;;  %v1898_v33 = vadd.f32 %v1897_v31, %v855_v4  ;;  %v2149_v37 = vmax.f32 %v1541_v11, 0.0  ;;  %v2151_v40 = vmax.f32 %v1894_v21, 0.0  ;;  %v5157_v62 = vld [vmem:[%s6108_s3 + $0x148] ss:$16 sps:$4 sm:$0xff]   ;;  %v5158_v63 = vld [vmem:[%s6108_s3 + $0x16c] ss:$16 sps:$4 sm:$0xff]   ;;  %v2388_v41 = vpop.permute.xlu1 %2387  ;;  %v2383_v10 = vpop.permute.xlu0 %2382 }
 0x1f3   : > { %v2152_v32 = vmax.f32 %v1543_v22, 0.0  ;;  %v2154_v38 = vmax.f32 %v1896_v26, 0.0  ;;  %v5160_v1 = vld [vmem:[%s6108_s3 + $0x168] ss:$16 sps:$4 sm:$0xff]   ;;  %v5161_v2 = vld [vmem:[%s6108_s3 + $0x18c] ss:$16 sps:$4 sm:$0xff]  }
 0x1f4   : > { %v2153_v39 = vmax.f32 %v1545_v27, 0.0  ;;  %v2155_v43 = vmax.f32 %v1898_v33, 0.0  ;;  %3043 = vmatmul.mubr.bf16.gmra.mrb[188].mxu0 %v5124_v42  ;;  %3429 = vmatmul.mubr.bf16.gmra.mrb[188].mxu1 %v5124_v42  ;;  %v5163_v3 = vld [vmem:[%s6108_s3 + $0x188] ss:$16 sps:$4 sm:$0xff]   ;;  %v5164_v4 = vld [vmem:[%s6108_s3 + $0x1ac] ss:$16 sps:$4 sm:$0xff]  }
 0x1f5   : > { %v2280_v8 = vpack.c.bf16 %v2152_v32, %v2148_v29  ;;  %v2282_v44 = vpack.c.bf16 %v2154_v38, %v2150_v35  ;;  %3085 = vmatprep.mubr.bf16.mxu0 %v5127_v28  ;;  %3471 = vmatprep.mubr.bf16.mxu1 %v5127_v28  ;;  %v5166_v5 = vld [vmem:[%s6108_s3 + $0x1a8] ss:$16 sps:$4 sm:$0xff]   ;;  %v5167_v6 = vld [vmem:[%s6108_s3 + $0x1cc] ss:$16 sps:$4 sm:$0xff]  }
 0x1f6   : > { %v2281_v46 = vpack.c.bf16 %v2153_v39, %v2149_v37  ;;  %v2283_v23 = vpack.c.bf16 %v2155_v43, %v2151_v40  ;;  %v5169_v7 = vld [vmem:[%s6108_s3 + $0x1c8] ss:$16 sps:$4 sm:$0xff]   ;;  %v5170_v18 = vld [vmem:[%s6108_s3 + $0x1ec] ss:$16 sps:$4 sm:$0xff]   ;;  %v2393_v43 = vpop.permute.xlu0 %2392 }
 0x1f7   : > { %v5172_v9 = vld [vmem:[%s6108_s3 + $0x1e8] ss:$16 sps:$4 sm:$0xff]   ;;  %v5175_v28 = vld [vmem:[%s6110_s5 + $0x4] ss:$8 sps:$4 sm:$0xff]  }
 0x1f8   : > { %3083 = vmatprep.subr.bf16.mxu0 %v2281_v46  ;;  %3469 = vmatprep.subr.bf16.mxu1 %v2283_v23 }
 0x1f9   : > { %3084 = vmatpush1.bf16.msra.mxu0 %v2280_v8  ;;  %3470 = vmatpush1.bf16.msra.mxu1 %v2282_v44  ;;  %v2398_v8 = vpop.permute.xlu1 %2397 }
 0x1fc   : > { %3086 = vmatmul.mubr.bf16.vlgmr.msra.gmra.mrb[128].mxu0 %v5125_v47  ;;  %3472 = vmatmul.mubr.bf16.vlgmr.msra.gmra.mrb[128].mxu1 %v5125_v47 }
 0x1fd   : > { %3095 = vmatprep.mubr.bf16.mxu0 %v5128_v45  ;;  %3481 = vmatprep.mubr.bf16.mxu1 %v5128_v45 }
 0x204   : > { %3096 = vmatmul.mubr.bf16.gmra.mrb[132].mxu0 %v5130_v48  ;;  %3482 = vmatmul.mubr.bf16.gmra.mrb[132].mxu1 %v5130_v48 }
 0x205   : > { %3105 = vmatprep.mubr.bf16.mxu0 %v5131_v34  ;;  %3491 = vmatprep.mubr.bf16.mxu1 %v5131_v34 }
 0x20c   : > { %3106 = vmatmul.mubr.bf16.gmra.mrb[136].mxu0 %v5133_v49  ;;  %3492 = vmatmul.mubr.bf16.gmra.mrb[136].mxu1 %v5133_v49 }
 0x20d   : > { %3115 = vmatprep.mubr.bf16.mxu0 %v5134_v50  ;;  %3501 = vmatprep.mubr.bf16.mxu1 %v5134_v50 }
 0x214   : > { %3116 = vmatmul.mubr.bf16.gmra.mrb[140].mxu0 %v5136_v51  ;;  %3502 = vmatmul.mubr.bf16.gmra.mrb[140].mxu1 %v5136_v51 }
 0x215   : > { %3125 = vmatprep.mubr.bf16.mxu0 %v5137_v52  ;;  %3511 = vmatprep.mubr.bf16.mxu1 %v5137_v52 }
 0x21c   : > { %3126 = vmatmul.mubr.bf16.gmra.mrb[144].mxu0 %v5139_v53  ;;  %3512 = vmatmul.mubr.bf16.gmra.mrb[144].mxu1 %v5139_v53 }
 0x21d   : > { %3135 = vmatprep.mubr.bf16.mxu0 %v5140_v54  ;;  %3521 = vmatprep.mubr.bf16.mxu1 %v5140_v54 }
 0x224   : > { %3136 = vmatmul.mubr.bf16.gmra.mrb[148].mxu0 %v5142_v13  ;;  %3522 = vmatmul.mubr.bf16.gmra.mrb[148].mxu1 %v5142_v13 }
 0x225   : > { %3145 = vmatprep.mubr.bf16.mxu0 %v5143_v55  ;;  %3531 = vmatprep.mubr.bf16.mxu1 %v5143_v55 }
 0x22c   : > { %3146 = vmatmul.mubr.bf16.gmra.mrb[152].mxu0 %v5145_v56  ;;  %3532 = vmatmul.mubr.bf16.gmra.mrb[152].mxu1 %v5145_v56 }
 0x22d   : > { %3155 = vmatprep.mubr.bf16.mxu0 %v5146_v25  ;;  %3541 = vmatprep.mubr.bf16.mxu1 %v5146_v25 }
 0x234   : > { %3156 = vmatmul.mubr.bf16.gmra.mrb[156].mxu0 %v5148_v57  ;;  %3542 = vmatmul.mubr.bf16.gmra.mrb[156].mxu1 %v5148_v57 }
 0x235   : > { %3165 = vmatprep.mubr.bf16.mxu0 %v5149_v58  ;;  %3551 = vmatprep.mubr.bf16.mxu1 %v5149_v58 }
 0x23c   : > { %3166 = vmatmul.mubr.bf16.gmra.mrb[160].mxu0 %v5151_v36  ;;  %3552 = vmatmul.mubr.bf16.gmra.mrb[160].mxu1 %v5151_v36 }
 0x23d   : > { %3175 = vmatprep.mubr.bf16.mxu0 %v5152_v59  ;;  %3561 = vmatprep.mubr.bf16.mxu1 %v5152_v59 }
 0x244   : > { %3176 = vmatmul.mubr.bf16.gmra.mrb[164].mxu0 %v5154_v60  ;;  %3562 = vmatmul.mubr.bf16.gmra.mrb[164].mxu1 %v5154_v60 }
 0x245   : > { %3185 = vmatprep.mubr.bf16.mxu0 %v5155_v61  ;;  %3571 = vmatprep.mubr.bf16.mxu1 %v5155_v61 }
 0x24c   : > { %3186 = vmatmul.mubr.bf16.gmra.mrb[168].mxu0 %v5157_v62  ;;  %3572 = vmatmul.mubr.bf16.gmra.mrb[168].mxu1 %v5157_v62 }
 0x24d   : > { %3195 = vmatprep.mubr.bf16.mxu0 %v5158_v63  ;;  %3581 = vmatprep.mubr.bf16.mxu1 %v5158_v63 }
 0x254   : > { %3196 = vmatmul.mubr.bf16.gmra.mrb[172].mxu0 %v5160_v1  ;;  %3582 = vmatmul.mubr.bf16.gmra.mrb[172].mxu1 %v5160_v1 }
 0x255   : > { %3205 = vmatprep.mubr.bf16.mxu0 %v5161_v2  ;;  %3591 = vmatprep.mubr.bf16.mxu1 %v5161_v2 }
 0x25c   : > { %3206 = vmatmul.mubr.bf16.gmra.mrb[176].mxu0 %v5163_v3  ;;  %3592 = vmatmul.mubr.bf16.gmra.mrb[176].mxu1 %v5163_v3 }
 0x25d   : > { %3215 = vmatprep.mubr.bf16.mxu0 %v5164_v4  ;;  %3601 = vmatprep.mubr.bf16.mxu1 %v5164_v4  ;;  %v2408_v4 = vpop.permute.xlu1 %2407 }
 0x264   : > { %3216 = vmatmul.mubr.bf16.gmra.mrb[180].mxu0 %v5166_v5  ;;  %3602 = vmatmul.mubr.bf16.gmra.mrb[180].mxu1 %v5166_v5  ;;  %v2403_v5 = vpop.permute.xlu0 %2402 }
 0x265   : > { %3225 = vmatprep.mubr.bf16.mxu0 %v5167_v6  ;;  %3611 = vmatprep.mubr.bf16.mxu1 %v5167_v6 }
 0x26c   : > { %3226 = vmatmul.mubr.bf16.gmra.mrb[184].mxu0 %v5169_v7  ;;  %3612 = vmatmul.mubr.bf16.gmra.mrb[184].mxu1 %v5169_v7 }
 0x26d   : > { %3235 = vmatprep.mubr.bf16.mxu0 %v5170_v18  ;;  %3621 = vmatprep.mubr.bf16.mxu1 %v5170_v18 }
 0x274   : > { %3236 = vmatmul.mubr.bf16.gmra.mrb[188].mxu0 %v5172_v9  ;;  %3622 = vmatmul.mubr.bf16.gmra.mrb[188].mxu1 %v5172_v9 }
 0x275   : > { %4048 = vmatprep.mubr.bf16.mxu0 %v5175_v28  ;;  %4161 = vmatprep.mubr.bf16.mxu1 %v5175_v28 }
 0x2cf   : > { %v3087_v30 = vpop.f32.mrb[128].mxu0  ;;  %v3473_v12 = vpop.f32.mrb[128].mxu1 }
 0x2d0   : > { %v4738_v14 = vadd.f32 %v3087_v30, %v2383_v10  ;;  %v4802_v15 = vadd.f32 %v3473_v12, %v2383_v10  ;;  %v3089_v16 = vpop.f32.mrb[129].mxu0  ;;  %v3475_v11 = vpop.f32.mrb[129].mxu1 }
 0x2d1   : > { %v4739_v17 = vadd.f32 %v3089_v16, %v2383_v10  ;;  %v4803_v20 = vadd.f32 %v3475_v11, %v2383_v10  ;;  %v3091_v21 = vpop.f32.mrb[130].mxu0  ;;  %v3477_v22 = vpop.f32.mrb[130].mxu1 }
 0x2d2   : > { %v4740_v19 = vadd.f32 %v3091_v21, %v2388_v41  ;;  %v4804_v24 = vadd.f32 %v3477_v22, %v2388_v41  ;;  %v3093_v42 = vpop.f32.mrb[131].mxu0  ;;  %v3479_v26 = vpop.f32.mrb[131].mxu1  ;;  %v3632_v29 = vmax.f32 %v4738_v14, 0.0  ;;  %v3634_v32 = vmax.f32 %v4802_v15, 0.0 }
 0x2d3   : > { %v4741_v27 = vadd.f32 %v3093_v42, %v2388_v41  ;;  %v4805_v31 = vadd.f32 %v3479_v26, %v2388_v41  ;;  %v3633_v37 = vmax.f32 %v4739_v17, 0.0  ;;  %v3635_v38 = vmax.f32 %v4803_v20, 0.0 }
 0x2d4   : > { %v3636_v33 = vmax.f32 %v4740_v19, 0.0  ;;  %v3638_v35 = vmax.f32 %v4804_v24, 0.0 }
 0x2d5   : > { %v3637_v39 = vmax.f32 %v4741_v27, 0.0  ;;  %v3639_v40 = vmax.f32 %v4805_v31, 0.0 }
 0x2d6   : > { %v3760_v44 = vpack.c.bf16 %v3636_v33, %v3632_v29  ;;  %v3762_v46 = vpack.c.bf16 %v3638_v35, %v3634_v32 }
 0x2d7   : > { %v3761_v23 = vpack.c.bf16 %v3637_v39, %v3633_v37  ;;  %v3763_v47 = vpack.c.bf16 %v3639_v40, %v3635_v38  ;;  %v3097_v45 = vpop.f32.mrb[132].mxu0  ;;  %v3483_v48 = vpop.f32.mrb[132].mxu1 }
 0x2d8   : > { %v4742_v34 = vadd.f32 %v3097_v45, %v2393_v43  ;;  %v4806_v49 = vadd.f32 %v3483_v48, %v2393_v43  ;;  %v3099_v50 = vpop.f32.mrb[133].mxu0  ;;  %v3485_v51 = vpop.f32.mrb[133].mxu1 }
 0x2d9   : > { %v4743_v52 = vadd.f32 %v3099_v50, %v2393_v43  ;;  %v4807_v53 = vadd.f32 %v3485_v51, %v2393_v43  ;;  %v3101_v54 = vpop.f32.mrb[134].mxu0  ;;  %v3487_v13 = vpop.f32.mrb[134].mxu1  ;;  %4016 = vmatprep.subr.bf16.mxu0 %v3761_v23  ;;  %4129 = vmatprep.subr.bf16.mxu1 %v3763_v47 }
 0x2da   : > { %v4744_v55 = vadd.f32 %v3101_v54, %v2398_v8  ;;  %v4808_v56 = vadd.f32 %v3487_v13, %v2398_v8  ;;  %v3103_v25 = vpop.f32.mrb[135].mxu0  ;;  %v3489_v57 = vpop.f32.mrb[135].mxu1  ;;  %4017 = vmatpush1.bf16.msra.mxu0 %v3760_v44  ;;  %4130 = vmatpush1.bf16.msra.mxu1 %v3762_v46  ;;  %v3640_v59 = vmax.f32 %v4742_v34, 0.0  ;;  %v3642_v60 = vmax.f32 %v4806_v49, 0.0 }
 0x2db   : > { %v4745_v58 = vadd.f32 %v3103_v25, %v2398_v8  ;;  %v4809_v36 = vadd.f32 %v3489_v57, %v2398_v8  ;;  %v3641_v63 = vmax.f32 %v4743_v52, 0.0  ;;  %v3643_v1 = vmax.f32 %v4807_v53, 0.0  ;;  %v2418_v38 = vpop.permute.xlu1 %2417  ;;  %v2413_v39 = vpop.permute.xlu0 %2412 }
 0x2dc   : > { %v3644_v61 = vmax.f32 %v4744_v55, 0.0  ;;  %v3646_v62 = vmax.f32 %v4808_v56, 0.0 }
 0x2dd   : > { %v3645_v2 = vmax.f32 %v4745_v58, 0.0  ;;  %v3647_v3 = vmax.f32 %v4809_v36, 0.0 }
 0x2de   : > { %v3764_v6 = vpack.c.bf16 %v3644_v61, %v3640_v59  ;;  %v3766_v7 = vpack.c.bf16 %v3646_v62, %v3642_v60 }
 0x2df   : > { %v3765_v18 = vpack.c.bf16 %v3645_v2, %v3641_v63  ;;  %v3767_v9 = vpack.c.bf16 %v3647_v3, %v3643_v1  ;;  %v3107_v41 = vpop.f32.mrb[136].mxu0  ;;  %v3493_v10 = vpop.f32.mrb[136].mxu1 }
 0x2e0   : > { %v4746_v30 = vadd.f32 %v3107_v41, %v2403_v5  ;;  %v4810_v12 = vadd.f32 %v3493_v10, %v2403_v5  ;;  %v3109_v14 = vpop.f32.mrb[137].mxu0  ;;  %v3495_v15 = vpop.f32.mrb[137].mxu1 }
 0x2e1   : > { %v4747_v16 = vadd.f32 %v3109_v14, %v2403_v5  ;;  %v4811_v11 = vadd.f32 %v3495_v15, %v2403_v5  ;;  %v3111_v17 = vpop.f32.mrb[138].mxu0  ;;  %v3497_v20 = vpop.f32.mrb[138].mxu1  ;;  %4018 = vmatprep.subr.bf16.mxu0 %v3765_v18  ;;  %4131 = vmatprep.subr.bf16.mxu1 %v3767_v9 }
 0x2e2   : > { %v4748_v21 = vadd.f32 %v3111_v17, %v2408_v4  ;;  %v4812_v22 = vadd.f32 %v3497_v20, %v2408_v4  ;;  %v3113_v19 = vpop.f32.mrb[139].mxu0  ;;  %v3499_v24 = vpop.f32.mrb[139].mxu1  ;;  %4019 = vmatpush1.bf16.msra.mxu0 %v3764_v6  ;;  %4132 = vmatpush1.bf16.msra.mxu1 %v3766_v7  ;;  %v3648_v27 = vmax.f32 %v4746_v30, 0.0  ;;  %v3650_v31 = vmax.f32 %v4810_v12, 0.0 }
 0x2e3   : > { %v4749_v42 = vadd.f32 %v3113_v19, %v2408_v4  ;;  %v4813_v26 = vadd.f32 %v3499_v24, %v2408_v4  ;;  %v3649_v32 = vmax.f32 %v4747_v16, 0.0  ;;  %v3651_v33 = vmax.f32 %v4811_v11, 0.0  ;;  %v2428_v1 = vpop.permute.xlu1 %2427  ;;  %v2423_v2 = vpop.permute.xlu0 %2422 }
 0x2e4   : > { %v3652_v28 = vmax.f32 %v4748_v21, 0.0  ;;  %v3654_v29 = vmax.f32 %v4812_v22, 0.0 }
 0x2e5   : > { %v3653_v35 = vmax.f32 %v4749_v42, 0.0  ;;  %v3655_v37 = vmax.f32 %v4813_v26, 0.0 }
 0x2e6   : > { %v3768_v40 = vpack.c.bf16 %v3652_v28, %v3648_v27  ;;  %v3770_v8 = vpack.c.bf16 %v3654_v29, %v3650_v31 }
 0x2e7   : > { %v3769_v43 = vpack.c.bf16 %v3653_v35, %v3649_v32  ;;  %v3771_v44 = vpack.c.bf16 %v3655_v37, %v3651_v33  ;;  %v3117_v46 = vpop.f32.mrb[140].mxu0  ;;  %v3503_v23 = vpop.f32.mrb[140].mxu1 }
 0x2e8   : > { %v4750_v47 = vadd.f32 %v3117_v46, %v2413_v39  ;;  %v4814_v45 = vadd.f32 %v3503_v23, %v2413_v39  ;;  %v3119_v48 = vpop.f32.mrb[141].mxu0  ;;  %v3505_v34 = vpop.f32.mrb[141].mxu1 }
 0x2e9   : > { %v4751_v49 = vadd.f32 %v3119_v48, %v2413_v39  ;;  %v4815_v50 = vadd.f32 %v3505_v34, %v2413_v39  ;;  %v3121_v51 = vpop.f32.mrb[142].mxu0  ;;  %v3507_v52 = vpop.f32.mrb[142].mxu1  ;;  %4020 = vmatprep.subr.bf16.mxu0 %v3769_v43  ;;  %4133 = vmatprep.subr.bf16.mxu1 %v3771_v44 }
 0x2ea   : > { %v4752_v53 = vadd.f32 %v3121_v51, %v2418_v38  ;;  %v4816_v54 = vadd.f32 %v3507_v52, %v2418_v38  ;;  %v3123_v13 = vpop.f32.mrb[143].mxu0  ;;  %v3509_v55 = vpop.f32.mrb[143].mxu1  ;;  %4021 = vmatpush1.bf16.msra.mxu0 %v3768_v40  ;;  %4134 = vmatpush1.bf16.msra.mxu1 %v3770_v8  ;;  %v3656_v57 = vmax.f32 %v4750_v47, 0.0  ;;  %v3658_v58 = vmax.f32 %v4814_v45, 0.0 }
 0x2eb   : > { %v4753_v56 = vadd.f32 %v3123_v13, %v2418_v38  ;;  %v4817_v25 = vadd.f32 %v3509_v55, %v2418_v38  ;;  %v3657_v60 = vmax.f32 %v4751_v49, 0.0  ;;  %v3659_v61 = vmax.f32 %v4815_v50, 0.0  ;;  %v2438_v33 = vpop.permute.xlu1 %2437  ;;  %v2433_v35 = vpop.permute.xlu0 %2432 }
 0x2ec   : > { %v3660_v36 = vmax.f32 %v4752_v53, 0.0  ;;  %v3662_v59 = vmax.f32 %v4816_v54, 0.0 }
 0x2ed   : > { %v3661_v62 = vmax.f32 %v4753_v56, 0.0  ;;  %v3663_v63 = vmax.f32 %v4817_v25, 0.0 }
 0x2ee   : > { %v3772_v3 = vpack.c.bf16 %v3660_v36, %v3656_v57  ;;  %v3774_v4 = vpack.c.bf16 %v3662_v59, %v3658_v58 }
 0x2ef   : > { %v3773_v5 = vpack.c.bf16 %v3661_v62, %v3657_v60  ;;  %v3775_v6 = vpack.c.bf16 %v3663_v63, %v3659_v61  ;;  %v3127_v7 = vpop.f32.mrb[144].mxu0  ;;  %v3513_v18 = vpop.f32.mrb[144].mxu1 }
 0x2f0   : > { %v4754_v9 = vadd.f32 %v3127_v7, %v2423_v2  ;;  %v4818_v41 = vadd.f32 %v3513_v18, %v2423_v2  ;;  %v3129_v10 = vpop.f32.mrb[145].mxu0  ;;  %v3515_v30 = vpop.f32.mrb[145].mxu1 }
 0x2f1   : > { %v4755_v12 = vadd.f32 %v3129_v10, %v2423_v2  ;;  %v4819_v14 = vadd.f32 %v3515_v30, %v2423_v2  ;;  %v3131_v15 = vpop.f32.mrb[146].mxu0  ;;  %v3517_v16 = vpop.f32.mrb[146].mxu1  ;;  %4022 = vmatprep.subr.bf16.mxu0 %v3773_v5  ;;  %4135 = vmatprep.subr.bf16.mxu1 %v3775_v6 }
 0x2f2   : > { %v4756_v11 = vadd.f32 %v3131_v15, %v2428_v1  ;;  %v4820_v17 = vadd.f32 %v3517_v16, %v2428_v1  ;;  %v3133_v20 = vpop.f32.mrb[147].mxu0  ;;  %v3519_v21 = vpop.f32.mrb[147].mxu1  ;;  %4023 = vmatpush1.bf16.msra.mxu0 %v3772_v3  ;;  %4136 = vmatpush1.bf16.msra.mxu1 %v3774_v4  ;;  %v3664_v24 = vmax.f32 %v4754_v9, 0.0  ;;  %v3666_v42 = vmax.f32 %v4818_v41, 0.0 }
 0x2f3   : > { %v4757_v22 = vadd.f32 %v3133_v20, %v2428_v1  ;;  %v4821_v19 = vadd.f32 %v3519_v21, %v2428_v1  ;;  %v3665_v31 = vmax.f32 %v4755_v12, 0.0  ;;  %v3667_v28 = vmax.f32 %v4819_v14, 0.0  ;;  %v2448_v61 = vpop.permute.xlu1 %2447  ;;  %v2443_v62 = vpop.permute.xlu0 %2442 }
 0x2f4   : > { %v3668_v26 = vmax.f32 %v4756_v11, 0.0  ;;  %v3670_v27 = vmax.f32 %v4820_v17, 0.0 }
 0x2f5   : > { %v3669_v29 = vmax.f32 %v4757_v22, 0.0  ;;  %v3671_v32 = vmax.f32 %v4821_v19, 0.0 }
 0x2f6   : > { %v3776_v37 = vpack.c.bf16 %v3668_v26, %v3664_v24  ;;  %v3778_v38 = vpack.c.bf16 %v3670_v27, %v3666_v42 }
 0x2f7   : > { %v3777_v39 = vpack.c.bf16 %v3669_v29, %v3665_v31  ;;  %v3779_v40 = vpack.c.bf16 %v3671_v32, %v3667_v28  ;;  %v3137_v8 = vpop.f32.mrb[148].mxu0  ;;  %v3523_v43 = vpop.f32.mrb[148].mxu1 }
 0x2f8   : > { %v4758_v44 = vadd.f32 %v3137_v8, %v2433_v35  ;;  %v4822_v46 = vadd.f32 %v3523_v43, %v2433_v35  ;;  %v3139_v23 = vpop.f32.mrb[149].mxu0  ;;  %v3525_v47 = vpop.f32.mrb[149].mxu1 }
 0x2f9   : > { %v4759_v45 = vadd.f32 %v3139_v23, %v2433_v35  ;;  %v4823_v48 = vadd.f32 %v3525_v47, %v2433_v35  ;;  %v3141_v34 = vpop.f32.mrb[150].mxu0  ;;  %v3527_v49 = vpop.f32.mrb[150].mxu1  ;;  %4024 = vmatprep.subr.bf16.mxu0 %v3777_v39  ;;  %4137 = vmatprep.subr.bf16.mxu1 %v3779_v40 }
 0x2fa   : > { %v4760_v50 = vadd.f32 %v3141_v34, %v2438_v33  ;;  %v4824_v51 = vadd.f32 %v3527_v49, %v2438_v33  ;;  %v3143_v52 = vpop.f32.mrb[151].mxu0  ;;  %v3529_v53 = vpop.f32.mrb[151].mxu1  ;;  %4025 = vmatpush1.bf16.msra.mxu0 %v3776_v37  ;;  %4138 = vmatpush1.bf16.msra.mxu1 %v3778_v38  ;;  %v3672_v55 = vmax.f32 %v4758_v44, 0.0  ;;  %v3674_v56 = vmax.f32 %v4822_v46, 0.0 }
 0x2fb   : > { %v4761_v54 = vadd.f32 %v3143_v52, %v2438_v33  ;;  %v4825_v13 = vadd.f32 %v3529_v53, %v2438_v33  ;;  %v3673_v58 = vmax.f32 %v4759_v45, 0.0  ;;  %v3675_v36 = vmax.f32 %v4823_v48, 0.0  ;;  %v2458_v28 = vpop.permute.xlu1 %2457  ;;  %v2453_v29 = vpop.permute.xlu0 %2452 }
 0x2fc   : > { %v3676_v25 = vmax.f32 %v4760_v50, 0.0  ;;  %v3678_v57 = vmax.f32 %v4824_v51, 0.0 }
 0x2fd   : > { %v3677_v59 = vmax.f32 %v4761_v54, 0.0  ;;  %v3679_v60 = vmax.f32 %v4825_v13, 0.0 }
 0x2fe   : > { %v3780_v63 = vpack.c.bf16 %v3676_v25, %v3672_v55  ;;  %v3782_v1 = vpack.c.bf16 %v3678_v57, %v3674_v56 }
 0x2ff   : > { %v3781_v2 = vpack.c.bf16 %v3677_v59, %v3673_v58  ;;  %v3783_v3 = vpack.c.bf16 %v3679_v60, %v3675_v36  ;;  %v3147_v4 = vpop.f32.mrb[152].mxu0  ;;  %v3533_v5 = vpop.f32.mrb[152].mxu1 }
 0x300   : > { %v4762_v6 = vadd.f32 %v3147_v4, %v2443_v62  ;;  %v4826_v7 = vadd.f32 %v3533_v5, %v2443_v62  ;;  %v3149_v18 = vpop.f32.mrb[153].mxu0  ;;  %v3535_v9 = vpop.f32.mrb[153].mxu1 }
 0x301   : > { %v4763_v41 = vadd.f32 %v3149_v18, %v2443_v62  ;;  %v4827_v10 = vadd.f32 %v3535_v9, %v2443_v62  ;;  %v3151_v30 = vpop.f32.mrb[154].mxu0  ;;  %v3537_v12 = vpop.f32.mrb[154].mxu1  ;;  %4026 = vmatprep.subr.bf16.mxu0 %v3781_v2  ;;  %4139 = vmatprep.subr.bf16.mxu1 %v3783_v3 }
 0x302   : > { %v4764_v14 = vadd.f32 %v3151_v30, %v2448_v61  ;;  %v4828_v15 = vadd.f32 %v3537_v12, %v2448_v61  ;;  %v3153_v16 = vpop.f32.mrb[155].mxu0  ;;  %v3539_v11 = vpop.f32.mrb[155].mxu1  ;;  %4027 = vmatpush1.bf16.msra.mxu0 %v3780_v63  ;;  %4140 = vmatpush1.bf16.msra.mxu1 %v3782_v1  ;;  %v3680_v21 = vmax.f32 %v4762_v6, 0.0  ;;  %v3682_v22 = vmax.f32 %v4826_v7, 0.0 }
 0x303   : > { %v4765_v17 = vadd.f32 %v3153_v16, %v2448_v61  ;;  %v4829_v20 = vadd.f32 %v3539_v11, %v2448_v61  ;;  %v3681_v42 = vmax.f32 %v4763_v41, 0.0  ;;  %v3683_v26 = vmax.f32 %v4827_v10, 0.0  ;;  %v2468_v36 = vpop.permute.xlu1 %2467  ;;  %v2463_v59 = vpop.permute.xlu0 %2462 }
 0x304   : > { %v3684_v19 = vmax.f32 %v4764_v14, 0.0  ;;  %v3686_v24 = vmax.f32 %v4828_v15, 0.0 }
 0x305   : > { %v3685_v27 = vmax.f32 %v4765_v17, 0.0  ;;  %v3687_v31 = vmax.f32 %v4829_v20, 0.0 }
 0x306   : > { %v3784_v32 = vpack.c.bf16 %v3684_v19, %v3680_v21  ;;  %v3786_v33 = vpack.c.bf16 %v3686_v24, %v3682_v22 }
 0x307   : > { %v3785_v35 = vpack.c.bf16 %v3685_v27, %v3681_v42  ;;  %v3787_v37 = vpack.c.bf16 %v3687_v31, %v3683_v26  ;;  %v3157_v38 = vpop.f32.mrb[156].mxu0  ;;  %v3543_v39 = vpop.f32.mrb[156].mxu1 }
 0x308   : > { %v4766_v40 = vadd.f32 %v3157_v38, %v2453_v29  ;;  %v4830_v8 = vadd.f32 %v3543_v39, %v2453_v29  ;;  %v3159_v43 = vpop.f32.mrb[157].mxu0  ;;  %v3545_v44 = vpop.f32.mrb[157].mxu1 }
 0x309   : > { %v4767_v46 = vadd.f32 %v3159_v43, %v2453_v29  ;;  %v4831_v23 = vadd.f32 %v3545_v44, %v2453_v29  ;;  %v3161_v47 = vpop.f32.mrb[158].mxu0  ;;  %v3547_v45 = vpop.f32.mrb[158].mxu1  ;;  %4028 = vmatprep.subr.bf16.mxu0 %v3785_v35  ;;  %4141 = vmatprep.subr.bf16.mxu1 %v3787_v37 }
 0x30a   : > { %v4768_v48 = vadd.f32 %v3161_v47, %v2458_v28  ;;  %v4832_v34 = vadd.f32 %v3547_v45, %v2458_v28  ;;  %v3163_v49 = vpop.f32.mrb[159].mxu0  ;;  %v3549_v50 = vpop.f32.mrb[159].mxu1  ;;  %4029 = vmatpush1.bf16.msra.mxu0 %v3784_v32  ;;  %4142 = vmatpush1.bf16.msra.mxu1 %v3786_v33  ;;  %v3688_v53 = vmax.f32 %v4766_v40, 0.0  ;;  %v3690_v54 = vmax.f32 %v4830_v8, 0.0 }
 0x30b   : > { %v4769_v51 = vadd.f32 %v3163_v49, %v2458_v28  ;;  %v4833_v52 = vadd.f32 %v3549_v50, %v2458_v28  ;;  %v3689_v56 = vmax.f32 %v4767_v46, 0.0  ;;  %v3691_v25 = vmax.f32 %v4831_v23, 0.0  ;;  %v2478_v26 = vpop.permute.xlu1 %2477  ;;  %v2473_v27 = vpop.permute.xlu0 %2472 }
 0x30c   : > { %v3692_v13 = vmax.f32 %v4768_v48, 0.0  ;;  %v3694_v55 = vmax.f32 %v4832_v34, 0.0 }
 0x30d   : > { %v3693_v57 = vmax.f32 %v4769_v51, 0.0  ;;  %v3695_v58 = vmax.f32 %v4833_v52, 0.0 }
 0x30e   : > { %v3788_v60 = vpack.c.bf16 %v3692_v13, %v3688_v53  ;;  %v3790_v61 = vpack.c.bf16 %v3694_v55, %v3690_v54 }
 0x30f   : > { %v3789_v62 = vpack.c.bf16 %v3693_v57, %v3689_v56  ;;  %v3791_v63 = vpack.c.bf16 %v3695_v58, %v3691_v25  ;;  %v3167_v1 = vpop.f32.mrb[160].mxu0  ;;  %v3553_v2 = vpop.f32.mrb[160].mxu1 }
 0x310   : > { %v4770_v3 = vadd.f32 %v3167_v1, %v2463_v59  ;;  %v4834_v4 = vadd.f32 %v3553_v2, %v2463_v59  ;;  %v3169_v5 = vpop.f32.mrb[161].mxu0  ;;  %v3555_v6 = vpop.f32.mrb[161].mxu1 }
 0x311   : > { %v4771_v7 = vadd.f32 %v3169_v5, %v2463_v59  ;;  %v4835_v18 = vadd.f32 %v3555_v6, %v2463_v59  ;;  %v3171_v9 = vpop.f32.mrb[162].mxu0  ;;  %v3557_v41 = vpop.f32.mrb[162].mxu1  ;;  %4030 = vmatprep.subr.bf16.mxu0 %v3789_v62  ;;  %4143 = vmatprep.subr.bf16.mxu1 %v3791_v63 }
 0x312   : > { %v4772_v10 = vadd.f32 %v3171_v9, %v2468_v36  ;;  %v4836_v30 = vadd.f32 %v3557_v41, %v2468_v36  ;;  %v3173_v12 = vpop.f32.mrb[163].mxu0  ;;  %v3559_v14 = vpop.f32.mrb[163].mxu1  ;;  %4031 = vmatpush1.bf16.msra.mxu0 %v3788_v60  ;;  %4144 = vmatpush1.bf16.msra.mxu1 %v3790_v61  ;;  %v3696_v11 = vmax.f32 %v4770_v3, 0.0  ;;  %v3698_v17 = vmax.f32 %v4834_v4, 0.0 }
 0x313   : > { %v4773_v15 = vadd.f32 %v3173_v12, %v2468_v36  ;;  %v4837_v16 = vadd.f32 %v3559_v14, %v2468_v36  ;;  %v3697_v22 = vmax.f32 %v4771_v7, 0.0  ;;  %v3699_v19 = vmax.f32 %v4835_v18, 0.0  ;;  %v2488_v25 = vpop.permute.xlu1 %2487  ;;  %v2483_v57 = vpop.permute.xlu0 %2482 }
 0x314   : > { %v3700_v20 = vmax.f32 %v4772_v10, 0.0  ;;  %v3702_v21 = vmax.f32 %v4836_v30, 0.0 }
 0x315   : > { %v3701_v24 = vmax.f32 %v4773_v15, 0.0  ;;  %v3703_v42 = vmax.f32 %v4837_v16, 0.0 }
 0x316   : > { %v3792_v31 = vpack.c.bf16 %v3700_v20, %v3696_v11  ;;  %v3794_v28 = vpack.c.bf16 %v3702_v21, %v3698_v17 }
 0x317   : > { %v3793_v29 = vpack.c.bf16 %v3701_v24, %v3697_v22  ;;  %v3795_v32 = vpack.c.bf16 %v3703_v42, %v3699_v19  ;;  %v3177_v33 = vpop.f32.mrb[164].mxu0  ;;  %v3563_v35 = vpop.f32.mrb[164].mxu1 }
 0x318   : > { %v4774_v37 = vadd.f32 %v3177_v33, %v2473_v27  ;;  %v4838_v38 = vadd.f32 %v3563_v35, %v2473_v27  ;;  %v3179_v39 = vpop.f32.mrb[165].mxu0  ;;  %v3565_v40 = vpop.f32.mrb[165].mxu1 }
 0x319   : > { %v4775_v8 = vadd.f32 %v3179_v39, %v2473_v27  ;;  %v4839_v43 = vadd.f32 %v3565_v40, %v2473_v27  ;;  %v3181_v44 = vpop.f32.mrb[166].mxu0  ;;  %v3567_v46 = vpop.f32.mrb[166].mxu1  ;;  %4032 = vmatprep.subr.bf16.mxu0 %v3793_v29  ;;  %4145 = vmatprep.subr.bf16.mxu1 %v3795_v32 }
 0x31a   : > { %v4776_v23 = vadd.f32 %v3181_v44, %v2478_v26  ;;  %v4840_v47 = vadd.f32 %v3567_v46, %v2478_v26  ;;  %v3183_v45 = vpop.f32.mrb[167].mxu0  ;;  %v3569_v48 = vpop.f32.mrb[167].mxu1  ;;  %4033 = vmatpush1.bf16.msra.mxu0 %v3792_v31  ;;  %4146 = vmatpush1.bf16.msra.mxu1 %v3794_v28  ;;  %v3704_v50 = vmax.f32 %v4774_v37, 0.0  ;;  %v3706_v51 = vmax.f32 %v4838_v38, 0.0 }
 0x31b   : > { %v4777_v34 = vadd.f32 %v3183_v45, %v2478_v26  ;;  %v4841_v49 = vadd.f32 %v3569_v48, %v2478_v26  ;;  %v3705_v54 = vmax.f32 %v4775_v8, 0.0  ;;  %v3707_v13 = vmax.f32 %v4839_v43, 0.0  ;;  %v2498_v19 = vpop.permute.xlu1 %2497  ;;  %v2493_v24 = vpop.permute.xlu0 %2492 }
 0x31c   : > { %v3708_v52 = vmax.f32 %v4776_v23, 0.0  ;;  %v3710_v53 = vmax.f32 %v4840_v47, 0.0 }
 0x31d   : > { %v3709_v55 = vmax.f32 %v4777_v34, 0.0  ;;  %v3711_v56 = vmax.f32 %v4841_v49, 0.0 }
 0x31e   : > { %v3796_v58 = vpack.c.bf16 %v3708_v52, %v3704_v50  ;;  %v3798_v36 = vpack.c.bf16 %v3710_v53, %v3706_v51 }
 0x31f   : > { %v3797_v59 = vpack.c.bf16 %v3709_v55, %v3705_v54  ;;  %v3799_v60 = vpack.c.bf16 %v3711_v56, %v3707_v13  ;;  %v3187_v61 = vpop.f32.mrb[168].mxu0  ;;  %v3573_v62 = vpop.f32.mrb[168].mxu1 }
 0x320   : > { %v4778_v63 = vadd.f32 %v3187_v61, %v2483_v57  ;;  %v4842_v1 = vadd.f32 %v3573_v62, %v2483_v57  ;;  %v3189_v2 = vpop.f32.mrb[169].mxu0  ;;  %v3575_v3 = vpop.f32.mrb[169].mxu1 }
 0x321   : > { %v4779_v4 = vadd.f32 %v3189_v2, %v2483_v57  ;;  %v4843_v5 = vadd.f32 %v3575_v3, %v2483_v57  ;;  %v3191_v6 = vpop.f32.mrb[170].mxu0  ;;  %v3577_v7 = vpop.f32.mrb[170].mxu1  ;;  %4034 = vmatprep.subr.bf16.mxu0 %v3797_v59  ;;  %4147 = vmatprep.subr.bf16.mxu1 %v3799_v60 }
 0x322   : > { %v4780_v18 = vadd.f32 %v3191_v6, %v2488_v25  ;;  %v4844_v9 = vadd.f32 %v3577_v7, %v2488_v25  ;;  %v3193_v41 = vpop.f32.mrb[171].mxu0  ;;  %v3579_v10 = vpop.f32.mrb[171].mxu1  ;;  %4035 = vmatpush1.bf16.msra.mxu0 %v3796_v58  ;;  %4148 = vmatpush1.bf16.msra.mxu1 %v3798_v36  ;;  %v3712_v14 = vmax.f32 %v4778_v63, 0.0  ;;  %v3714_v15 = vmax.f32 %v4842_v1, 0.0 }
 0x323   : > { %v4781_v30 = vadd.f32 %v3193_v41, %v2488_v25  ;;  %v4845_v12 = vadd.f32 %v3579_v10, %v2488_v25  ;;  %v3713_v17 = vmax.f32 %v4779_v4, 0.0  ;;  %v3715_v20 = vmax.f32 %v4843_v5, 0.0  ;;  %v2508_v13 = vpop.permute.xlu1 %2507  ;;  %v2503_v55 = vpop.permute.xlu0 %2502 }
 0x324   : > { %v3716_v16 = vmax.f32 %v4780_v18, 0.0  ;;  %v3718_v11 = vmax.f32 %v4844_v9, 0.0 }
 0x325   : > { %v3717_v21 = vmax.f32 %v4781_v30, 0.0  ;;  %v3719_v22 = vmax.f32 %v4845_v12, 0.0 }
 0x326   : > { %v3800_v42 = vpack.c.bf16 %v3716_v16, %v3712_v14  ;;  %v3802_v26 = vpack.c.bf16 %v3718_v11, %v3714_v15 }
 0x327   : > { %v3801_v27 = vpack.c.bf16 %v3717_v21, %v3713_v17  ;;  %v3803_v31 = vpack.c.bf16 %v3719_v22, %v3715_v20  ;;  %v3197_v28 = vpop.f32.mrb[172].mxu0  ;;  %v3583_v29 = vpop.f32.mrb[172].mxu1 }
 0x328   : > { %v4782_v32 = vadd.f32 %v3197_v28, %v2493_v24  ;;  %v4846_v33 = vadd.f32 %v3583_v29, %v2493_v24  ;;  %v3199_v35 = vpop.f32.mrb[173].mxu0  ;;  %v3585_v37 = vpop.f32.mrb[173].mxu1 }
 0x329   : > { %v4783_v38 = vadd.f32 %v3199_v35, %v2493_v24  ;;  %v4847_v39 = vadd.f32 %v3585_v37, %v2493_v24  ;;  %v3201_v40 = vpop.f32.mrb[174].mxu0  ;;  %v3587_v8 = vpop.f32.mrb[174].mxu1  ;;  %4036 = vmatprep.subr.bf16.mxu0 %v3801_v27  ;;  %4149 = vmatprep.subr.bf16.mxu1 %v3803_v31 }
 0x32a   : > { %v4784_v43 = vadd.f32 %v3201_v40, %v2498_v19  ;;  %v4848_v44 = vadd.f32 %v3587_v8, %v2498_v19  ;;  %v3203_v46 = vpop.f32.mrb[175].mxu0  ;;  %v3589_v23 = vpop.f32.mrb[175].mxu1  ;;  %4037 = vmatpush1.bf16.msra.mxu0 %v3800_v42  ;;  %4150 = vmatpush1.bf16.msra.mxu1 %v3802_v26  ;;  %v3720_v48 = vmax.f32 %v4782_v32, 0.0  ;;  %v3722_v34 = vmax.f32 %v4846_v33, 0.0 }
 0x32b   : > { %v4785_v47 = vadd.f32 %v3203_v46, %v2498_v19  ;;  %v4849_v45 = vadd.f32 %v3589_v23, %v2498_v19  ;;  %v3721_v51 = vmax.f32 %v4783_v38, 0.0  ;;  %v3723_v52 = vmax.f32 %v4847_v39, 0.0  ;;  %v2518_v20 = vpop.permute.xlu1 %2517  ;;  %v2513_v21 = vpop.permute.xlu0 %2512 }
 0x32c   : > { %v3724_v49 = vmax.f32 %v4784_v43, 0.0  ;;  %v3726_v50 = vmax.f32 %v4848_v44, 0.0 }
 0x32d   : > { %v3725_v53 = vmax.f32 %v4785_v47, 0.0  ;;  %v3727_v54 = vmax.f32 %v4849_v45, 0.0 }
 0x32e   : > { %v3804_v56 = vpack.c.bf16 %v3724_v49, %v3720_v48  ;;  %v3806_v25 = vpack.c.bf16 %v3726_v50, %v3722_v34 }
 0x32f   : > { %v3805_v57 = vpack.c.bf16 %v3725_v53, %v3721_v51  ;;  %v3807_v58 = vpack.c.bf16 %v3727_v54, %v3723_v52  ;;  %v3207_v36 = vpop.f32.mrb[176].mxu0  ;;  %v3593_v59 = vpop.f32.mrb[176].mxu1 }
 0x330   : > { %v4786_v60 = vadd.f32 %v3207_v36, %v2503_v55  ;;  %v4850_v61 = vadd.f32 %v3593_v59, %v2503_v55  ;;  %v3209_v62 = vpop.f32.mrb[177].mxu0  ;;  %v3595_v63 = vpop.f32.mrb[177].mxu1 }
 0x331   : > { %v4787_v1 = vadd.f32 %v3209_v62, %v2503_v55  ;;  %v4851_v2 = vadd.f32 %v3595_v63, %v2503_v55  ;;  %v3211_v3 = vpop.f32.mrb[178].mxu0  ;;  %v3597_v4 = vpop.f32.mrb[178].mxu1  ;;  %4038 = vmatprep.subr.bf16.mxu0 %v3805_v57  ;;  %4151 = vmatprep.subr.bf16.mxu1 %v3807_v58 }
 0x332   : > { %v4788_v5 = vadd.f32 %v3211_v3, %v2508_v13  ;;  %v4852_v6 = vadd.f32 %v3597_v4, %v2508_v13  ;;  %v3213_v7 = vpop.f32.mrb[179].mxu0  ;;  %v3599_v18 = vpop.f32.mrb[179].mxu1  ;;  %4039 = vmatpush1.bf16.msra.mxu0 %v3804_v56  ;;  %4152 = vmatpush1.bf16.msra.mxu1 %v3806_v25  ;;  %v3728_v10 = vmax.f32 %v4786_v60, 0.0  ;;  %v3730_v30 = vmax.f32 %v4850_v61, 0.0 }
 0x333   : > { %v4789_v9 = vadd.f32 %v3213_v7, %v2508_v13  ;;  %v4853_v41 = vadd.f32 %v3599_v18, %v2508_v13  ;;  %v3729_v15 = vmax.f32 %v4787_v1, 0.0  ;;  %v3731_v16 = vmax.f32 %v4851_v2, 0.0  ;;  %v2528_v52 = vpop.permute.xlu1 %2527  ;;  %v2523_v53 = vpop.permute.xlu0 %2522 }
 0x334   : > { %v3732_v12 = vmax.f32 %v4788_v5, 0.0  ;;  %v3734_v14 = vmax.f32 %v4852_v6, 0.0 }
 0x335   : > { %v3733_v11 = vmax.f32 %v4789_v9, 0.0  ;;  %v3735_v17 = vmax.f32 %v4853_v41, 0.0 }
 0x336   : > { %v3808_v22 = vpack.c.bf16 %v3732_v12, %v3728_v10  ;;  %v3810_v19 = vpack.c.bf16 %v3734_v14, %v3730_v30 }
 0x337   : > { %v3809_v24 = vpack.c.bf16 %v3733_v11, %v3729_v15  ;;  %v3811_v42 = vpack.c.bf16 %v3735_v17, %v3731_v16  ;;  %v3217_v26 = vpop.f32.mrb[180].mxu0  ;;  %v3603_v27 = vpop.f32.mrb[180].mxu1 }
 0x338   : > { %v4790_v31 = vadd.f32 %v3217_v26, %v2513_v21  ;;  %v4854_v28 = vadd.f32 %v3603_v27, %v2513_v21  ;;  %v3219_v29 = vpop.f32.mrb[181].mxu0  ;;  %v3605_v32 = vpop.f32.mrb[181].mxu1 }
 0x339   : > { %v4791_v33 = vadd.f32 %v3219_v29, %v2513_v21  ;;  %v4855_v35 = vadd.f32 %v3605_v32, %v2513_v21  ;;  %v3221_v37 = vpop.f32.mrb[182].mxu0  ;;  %v3607_v38 = vpop.f32.mrb[182].mxu1  ;;  %4040 = vmatprep.subr.bf16.mxu0 %v3809_v24  ;;  %4153 = vmatprep.subr.bf16.mxu1 %v3811_v42 }
 0x33a   : > { %v4792_v39 = vadd.f32 %v3221_v37, %v2518_v20  ;;  %v4856_v40 = vadd.f32 %v3607_v38, %v2518_v20  ;;  %v3223_v8 = vpop.f32.mrb[183].mxu0  ;;  %v3609_v43 = vpop.f32.mrb[183].mxu1  ;;  %4041 = vmatpush1.bf16.msra.mxu0 %v3808_v22  ;;  %4154 = vmatpush1.bf16.msra.mxu1 %v3810_v19  ;;  %v3736_v23 = vmax.f32 %v4790_v31, 0.0  ;;  %v3738_v47 = vmax.f32 %v4854_v28, 0.0 }
 0x33b   : > { %v4793_v44 = vadd.f32 %v3223_v8, %v2518_v20  ;;  %v4857_v46 = vadd.f32 %v3609_v43, %v2518_v20  ;;  %v3737_v34 = vmax.f32 %v4791_v33, 0.0  ;;  %v3739_v49 = vmax.f32 %v4855_v35, 0.0  ;;  %v2538_v16 = vpop.permute.xlu1 %2537  ;;  %v2533_v11 = vpop.permute.xlu0 %2532 }
 0x33c   : > { %v3740_v45 = vmax.f32 %v4792_v39, 0.0  ;;  %v3742_v48 = vmax.f32 %v4856_v40, 0.0 }
 0x33d   : > { %v3741_v50 = vmax.f32 %v4793_v44, 0.0  ;;  %v3743_v51 = vmax.f32 %v4857_v46, 0.0 }
 0x33e   : > { %v3812_v54 = vpack.c.bf16 %v3740_v45, %v3736_v23  ;;  %v3814_v13 = vpack.c.bf16 %v3742_v48, %v3738_v47 }
 0x33f   : > { %v3813_v55 = vpack.c.bf16 %v3741_v50, %v3737_v34  ;;  %v3815_v56 = vpack.c.bf16 %v3743_v51, %v3739_v49  ;;  %v3227_v25 = vpop.f32.mrb[184].mxu0  ;;  %v3613_v57 = vpop.f32.mrb[184].mxu1 }
 0x340   : > { %v4794_v58 = vadd.f32 %v3227_v25, %v2523_v53  ;;  %v4858_v36 = vadd.f32 %v3613_v57, %v2523_v53  ;;  %v3229_v59 = vpop.f32.mrb[185].mxu0  ;;  %v3615_v60 = vpop.f32.mrb[185].mxu1  ;;  %v5182_v25 = vld [vmem:[%s6110_s5 + $0x34] ss:$8 sps:$4 sm:$0xff]   ;;  %v5184_v57 = vld [vmem:[%s6110_s5 + $0x30] ss:$8 sps:$4 sm:$0xff]  }
 0x341   : > { %v4795_v61 = vadd.f32 %v3229_v59, %v2523_v53  ;;  %v4859_v62 = vadd.f32 %v3615_v60, %v2523_v53  ;;  %v3231_v63 = vpop.f32.mrb[186].mxu0  ;;  %v3617_v1 = vpop.f32.mrb[186].mxu1  ;;  %4042 = vmatprep.subr.bf16.mxu0 %v3813_v55  ;;  %4155 = vmatprep.subr.bf16.mxu1 %v3815_v56  ;;  %v5173_v53 = vld [vmem:[%s6110_s5] ss:$8 sps:$4 sm:$0xff]   ;;  %v5179_v55 = vld [vmem:[%s6110_s5 + $0x24] ss:$8 sps:$4 sm:$0xff]  }
 0x342   : > { %v4796_v2 = vadd.f32 %v3231_v63, %v2528_v52  ;;  %v4860_v3 = vadd.f32 %v3617_v1, %v2528_v52  ;;  %v3233_v4 = vpop.f32.mrb[187].mxu0  ;;  %v3619_v5 = vpop.f32.mrb[187].mxu1  ;;  %4043 = vmatpush1.bf16.msra.mxu0 %v3812_v54  ;;  %4156 = vmatpush1.bf16.msra.mxu1 %v3814_v13  ;;  %v3744_v18 = vmax.f32 %v4794_v58, 0.0  ;;  %v3746_v9 = vmax.f32 %v4858_v36, 0.0  ;;  %v5176_v54 = vld [vmem:[%s6110_s5 + $0x14] ss:$8 sps:$4 sm:$0xff]  }
 0x343   : > { %v4797_v6 = vadd.f32 %v3233_v4, %v2528_v52  ;;  %v4861_v7 = vadd.f32 %v3619_v5, %v2528_v52  ;;  %v3745_v30 = vmax.f32 %v4795_v61, 0.0  ;;  %v3747_v12 = vmax.f32 %v4859_v62, 0.0  ;;  %v5178_v13 = vld [vmem:[%s6110_s5 + $0x10] ss:$8 sps:$4 sm:$0xff]   ;;  %v5181_v56 = vld [vmem:[%s6110_s5 + $0x20] ss:$8 sps:$4 sm:$0xff]  }
 0x344   : > { %v3748_v41 = vmax.f32 %v4796_v2, 0.0  ;;  %v3750_v10 = vmax.f32 %v4860_v3, 0.0  ;;  %v5185_v58 = vld [vmem:[%s6110_s5 + $0x44] ss:$8 sps:$4 sm:$0xff]   ;;  %v5187_v36 = vld [vmem:[%s6110_s5 + $0x40] ss:$8 sps:$4 sm:$0xff]   ;;  %v3864_v2 = vpop.permute.xlu1 %3863  ;;  %v3859_v3 = vpop.permute.xlu0 %3858 }
 0x345   : > { %v3749_v14 = vmax.f32 %v4797_v6, 0.0  ;;  %v3751_v15 = vmax.f32 %v4861_v7, 0.0  ;;  %v5188_v59 = vld [vmem:[%s6110_s5 + $0x54] ss:$8 sps:$4 sm:$0xff]   ;;  %v5190_v60 = vld [vmem:[%s6110_s5 + $0x50] ss:$8 sps:$4 sm:$0xff]  }
 0x346   : > { %v3816_v17 = vpack.c.bf16 %v3748_v41, %v3744_v18  ;;  %v3818_v20 = vpack.c.bf16 %v3750_v10, %v3746_v9  ;;  %v5191_v61 = vld [vmem:[%s6110_s5 + $0x64] ss:$8 sps:$4 sm:$0xff]   ;;  %v5193_v62 = vld [vmem:[%s6110_s5 + $0x60] ss:$8 sps:$4 sm:$0xff]   ;;  %v5194_v63 = vld [vmem:[%s6110_s5 + $0x74] ss:$8 sps:$4 sm:$0xff]  }
 0x347   : > { %v3817_v21 = vpack.c.bf16 %v3749_v14, %v3745_v30  ;;  %v3819_v22 = vpack.c.bf16 %v3751_v15, %v3747_v12  ;;  %v3237_v19 = vpop.f32.mrb[188].mxu0  ;;  %v3623_v24 = vpop.f32.mrb[188].mxu1  ;;  %v5196_v1 = vld [vmem:[%s6110_s5 + $0x70] ss:$8 sps:$4 sm:$0xff]  }
 0x348   : > { %v4798_v42 = vadd.f32 %v3237_v19, %v2533_v11  ;;  %v4862_v26 = vadd.f32 %v3623_v24, %v2533_v11  ;;  %v3239_v27 = vpop.f32.mrb[189].mxu0  ;;  %v3625_v31 = vpop.f32.mrb[189].mxu1 }
 0x349   : > { %v4799_v28 = vadd.f32 %v3239_v27, %v2533_v11  ;;  %v4863_v29 = vadd.f32 %v3625_v31, %v2533_v11  ;;  %v3241_v32 = vpop.f32.mrb[190].mxu0  ;;  %v3627_v33 = vpop.f32.mrb[190].mxu1  ;;  %4044 = vmatprep.subr.bf16.mxu0 %v3817_v21  ;;  %4157 = vmatprep.subr.bf16.mxu1 %v3819_v22 }
 0x34a   : > { %v4800_v35 = vadd.f32 %v3241_v32, %v2538_v16  ;;  %v4864_v37 = vadd.f32 %v3627_v33, %v2538_v16  ;;  %v3243_v38 = vpop.f32.mrb[191].mxu0  ;;  %v3629_v39 = vpop.f32.mrb[191].mxu1  ;;  %4045 = vmatpush1.bf16.msra.mxu0 %v3816_v17  ;;  %4158 = vmatpush1.bf16.msra.mxu1 %v3818_v20  ;;  %v3752_v43 = vmax.f32 %v4798_v42, 0.0  ;;  %v3754_v44 = vmax.f32 %v4862_v26, 0.0 }
 0x34b   : > { %v4801_v40 = vadd.f32 %v3243_v38, %v2538_v16  ;;  %v4865_v8 = vadd.f32 %v3629_v39, %v2538_v16  ;;  %v3753_v47 = vmax.f32 %v4799_v28, 0.0  ;;  %v3755_v45 = vmax.f32 %v4863_v29, 0.0  ;;  %v3874_v31 = vpop.permute.xlu1 %3873  ;;  %v3869_v28 = vpop.permute.xlu0 %3868 }
 0x34c   : > { %v3756_v46 = vmax.f32 %v4800_v35, 0.0  ;;  %v3758_v23 = vmax.f32 %v4864_v37, 0.0 }
 0x34d   : > { %v3757_v48 = vmax.f32 %v4801_v40, 0.0  ;;  %v3759_v34 = vmax.f32 %v4865_v8, 0.0 }
 0x34e   : > { %v3820_v49 = vpack.c.bf16 %v3756_v46, %v3752_v43  ;;  %v3822_v50 = vpack.c.bf16 %v3758_v23, %v3754_v44 }
 0x34f   : > { %v3821_v51 = vpack.c.bf16 %v3757_v48, %v3753_v47  ;;  %v3823_v52 = vpack.c.bf16 %v3759_v34, %v3755_v45 }
 0x351   : > { %4046 = vmatprep.subr.bf16.mxu0 %v3821_v51  ;;  %4159 = vmatprep.subr.bf16.mxu1 %v3823_v52 }
 0x352   : > { %4047 = vmatpush1.bf16.msra.mxu0 %v3820_v49  ;;  %4160 = vmatpush1.bf16.msra.mxu1 %v3822_v50 }
 0x355   : > { %4049 = vmatmul.mubr.bf16.vlgmr.msra.gmra.mrb[192].mxu0 %v5173_v53  ;;  %4162 = vmatmul.mubr.bf16.vlgmr.msra.gmra.mrb[192].mxu1 %v5173_v53 }
 0x356   : > { %4058 = vmatprep.mubr.bf16.mxu0 %v5176_v54  ;;  %4171 = vmatprep.mubr.bf16.mxu1 %v5176_v54 }
 0x35d   : > { %4059 = vmatmul.mubr.bf16.gmra.mrb[196].mxu0 %v5178_v13  ;;  %4172 = vmatmul.mubr.bf16.gmra.mrb[196].mxu1 %v5178_v13 }
 0x35e   : > { %4068 = vmatprep.mubr.bf16.mxu0 %v5179_v55  ;;  %4181 = vmatprep.mubr.bf16.mxu1 %v5179_v55 }
 0x365   : > { %4069 = vmatmul.mubr.bf16.gmra.mrb[200].mxu0 %v5181_v56  ;;  %4182 = vmatmul.mubr.bf16.gmra.mrb[200].mxu1 %v5181_v56 }
 0x366   : > { %4078 = vmatprep.mubr.bf16.mxu0 %v5182_v25  ;;  %4191 = vmatprep.mubr.bf16.mxu1 %v5182_v25 }
 0x36d   : > { %4079 = vmatmul.mubr.bf16.gmra.mrb[204].mxu0 %v5184_v57  ;;  %4192 = vmatmul.mubr.bf16.gmra.mrb[204].mxu1 %v5184_v57 }
 0x36e   : > { %4088 = vmatprep.mubr.bf16.mxu0 %v5185_v58  ;;  %4201 = vmatprep.mubr.bf16.mxu1 %v5185_v58  ;;  %v3884_v58 = vpop.permute.xlu1 %3883 }
 0x375   : > { %4089 = vmatmul.mubr.bf16.gmra.mrb[208].mxu0 %v5187_v36  ;;  %4202 = vmatmul.mubr.bf16.gmra.mrb[208].mxu1 %v5187_v36  ;;  %v3879_v36 = vpop.permute.xlu0 %3878 }
 0x376   : > { %4098 = vmatprep.mubr.bf16.mxu0 %v5188_v59  ;;  %4211 = vmatprep.mubr.bf16.mxu1 %v5188_v59 }
 0x37d   : > { %4099 = vmatmul.mubr.bf16.gmra.mrb[212].mxu0 %v5190_v60  ;;  %4212 = vmatmul.mubr.bf16.gmra.mrb[212].mxu1 %v5190_v60 }
 0x37e   : > { %4108 = vmatprep.mubr.bf16.mxu0 %v5191_v61  ;;  %4221 = vmatprep.mubr.bf16.mxu1 %v5191_v61 }
 0x385   : > { %4109 = vmatmul.mubr.bf16.gmra.mrb[216].mxu0 %v5193_v62  ;;  %4222 = vmatmul.mubr.bf16.gmra.mrb[216].mxu1 %v5193_v62 }
 0x386   : > { %4118 = vmatprep.mubr.bf16.mxu0 %v5194_v63  ;;  %4231 = vmatprep.mubr.bf16.mxu1 %v5194_v63 }
 0x38d   : > { %4119 = vmatmul.mubr.bf16.gmra.mrb[220].mxu0 %v5196_v1  ;;  %4232 = vmatmul.mubr.bf16.gmra.mrb[220].mxu1 %v5196_v1 }
 0x38e   : > { %4377 = vmatprep.mubr.bf16.mxu0 %v5221_v0  ;;  %4418 = vmatprep.mubr.bf16.mxu1 %v5221_v0 }
 0x428   : > { %v4050_v4 = vpop.f32.mrb[192].mxu0  ;;  %v4163_v5 = vpop.f32.mrb[192].mxu1 }
 0x429   : > { %v4051_v6 = vadd.f32 %v4050_v4, %v3859_v3  ;;  %v4164_v7 = vadd.f32 %v4163_v5, %v3859_v3  ;;  %v4052_v18 = vpop.f32.mrb[193].mxu0  ;;  %v4165_v9 = vpop.f32.mrb[193].mxu1 }
 0x42a   : > { %v4053_v41 = vadd.f32 %v4052_v18, %v3859_v3  ;;  %v4166_v10 = vadd.f32 %v4165_v9, %v3859_v3  ;;  %v4054_v30 = vpop.f32.mrb[194].mxu0  ;;  %v4167_v12 = vpop.f32.mrb[194].mxu1 }
 0x42b   : > { %v4055_v14 = vadd.f32 %v4054_v30, %v3864_v2  ;;  %v4168_v15 = vadd.f32 %v4167_v12, %v3864_v2  ;;  %v4056_v16 = vpop.f32.mrb[195].mxu0  ;;  %v4169_v11 = vpop.f32.mrb[195].mxu1  ;;  %v4242_v21 = vmax.f32 %v4051_v6, 0.0  ;;  %v4244_v0 = vmax.f32 %v4164_v7, 0.0 }
 0x42c   : > { %v4057_v17 = vadd.f32 %v4056_v16, %v3864_v2  ;;  %v4170_v20 = vadd.f32 %v4169_v11, %v3864_v2  ;;  %v4243_v24 = vmax.f32 %v4053_v41, 0.0  ;;  %v4245_v42 = vmax.f32 %v4166_v10, 0.0 }
 0x42d   : > { %v4246_v22 = vmax.f32 %v4055_v14, 0.0  ;;  %v4248_v19 = vmax.f32 %v4168_v15, 0.0 }
 0x42e   : > { %v4247_v26 = vmax.f32 %v4057_v17, 0.0  ;;  %v4249_v27 = vmax.f32 %v4170_v20, 0.0 }
 0x42f   : > { %v4306_v29 = vpack.c.bf16 %v4246_v22, %v4242_v21  ;;  %v4308_v32 = vpack.c.bf16 %v4248_v19, %v4244_v0 }
 0x430   : > { %v4307_v33 = vpack.c.bf16 %v4247_v26, %v4243_v24  ;;  %v4309_v35 = vpack.c.bf16 %v4249_v27, %v4245_v42  ;;  %v4060_v37 = vpop.f32.mrb[196].mxu0  ;;  %v4173_v38 = vpop.f32.mrb[196].mxu1 }
 0x431   : > { %v4061_v39 = vadd.f32 %v4060_v37, %v3869_v28  ;;  %v4174_v40 = vadd.f32 %v4173_v38, %v3869_v28  ;;  %v4062_v8 = vpop.f32.mrb[197].mxu0  ;;  %v4175_v43 = vpop.f32.mrb[197].mxu1 }
 0x432   : > { %v4063_v44 = vadd.f32 %v4062_v8, %v3869_v28  ;;  %v4176_v46 = vadd.f32 %v4175_v43, %v3869_v28  ;;  %v4064_v23 = vpop.f32.mrb[198].mxu0  ;;  %v4177_v47 = vpop.f32.mrb[198].mxu1  ;;  %4345 = vmatprep.subr.bf16.mxu0 %v4307_v33  ;;  %4386 = vmatprep.subr.bf16.mxu1 %v4309_v35 }
 0x433   : > { %v4065_v45 = vadd.f32 %v4064_v23, %v3874_v31  ;;  %v4178_v48 = vadd.f32 %v4177_v47, %v3874_v31  ;;  %v4066_v34 = vpop.f32.mrb[199].mxu0  ;;  %v4179_v49 = vpop.f32.mrb[199].mxu1  ;;  %4346 = vmatpush1.bf16.msra.mxu0 %v4306_v29  ;;  %4387 = vmatpush1.bf16.msra.mxu1 %v4308_v32  ;;  %v4250_v52 = vmax.f32 %v4061_v39, 0.0  ;;  %v4252_v53 = vmax.f32 %v4174_v40, 0.0 }
 0x434   : > { %v4067_v50 = vadd.f32 %v4066_v34, %v3874_v31  ;;  %v4180_v51 = vadd.f32 %v4179_v49, %v3874_v31  ;;  %v4251_v55 = vmax.f32 %v4063_v44, 0.0  ;;  %v4253_v56 = vmax.f32 %v4176_v46, 0.0  ;;  %v3894_v24 = vpop.permute.xlu1 %3893  ;;  %v3889_v42 = vpop.permute.xlu0 %3888 }
 0x435   : > { %v4254_v54 = vmax.f32 %v4065_v45, 0.0  ;;  %v4256_v13 = vmax.f32 %v4178_v48, 0.0 }
 0x436   : > { %v4255_v25 = vmax.f32 %v4067_v50, 0.0  ;;  %v4257_v57 = vmax.f32 %v4180_v51, 0.0 }
 0x437   : > { %v4310_v59 = vpack.c.bf16 %v4254_v54, %v4250_v52  ;;  %v4312_v60 = vpack.c.bf16 %v4256_v13, %v4252_v53 }
 0x438   : > { %v4311_v61 = vpack.c.bf16 %v4255_v25, %v4251_v55  ;;  %v4313_v62 = vpack.c.bf16 %v4257_v57, %v4253_v56  ;;  %v4070_v63 = vpop.f32.mrb[200].mxu0  ;;  %v4183_v1 = vpop.f32.mrb[200].mxu1 }
 0x439   : > { %v4071_v2 = vadd.f32 %v4070_v63, %v3879_v36  ;;  %v4184_v3 = vadd.f32 %v4183_v1, %v3879_v36  ;;  %v4072_v4 = vpop.f32.mrb[201].mxu0  ;;  %v4185_v5 = vpop.f32.mrb[201].mxu1 }
 0x43a   : > { %v4073_v6 = vadd.f32 %v4072_v4, %v3879_v36  ;;  %v4186_v7 = vadd.f32 %v4185_v5, %v3879_v36  ;;  %v4074_v18 = vpop.f32.mrb[202].mxu0  ;;  %v4187_v9 = vpop.f32.mrb[202].mxu1  ;;  %4347 = vmatprep.subr.bf16.mxu0 %v4311_v61  ;;  %4388 = vmatprep.subr.bf16.mxu1 %v4313_v62 }
 0x43b   : > { %v4075_v41 = vadd.f32 %v4074_v18, %v3884_v58  ;;  %v4188_v10 = vadd.f32 %v4187_v9, %v3884_v58  ;;  %v4076_v30 = vpop.f32.mrb[203].mxu0  ;;  %v4189_v12 = vpop.f32.mrb[203].mxu1  ;;  %4348 = vmatpush1.bf16.msra.mxu0 %v4310_v59  ;;  %4389 = vmatpush1.bf16.msra.mxu1 %v4312_v60  ;;  %v4258_v16 = vmax.f32 %v4071_v2, 0.0  ;;  %v4260_v11 = vmax.f32 %v4184_v3, 0.0 }
 0x43c   : > { %v4077_v14 = vadd.f32 %v4076_v30, %v3884_v58  ;;  %v4190_v15 = vadd.f32 %v4189_v12, %v3884_v58  ;;  %v4259_v21 = vmax.f32 %v4073_v6, 0.0  ;;  %v4261_v0 = vmax.f32 %v4186_v7, 0.0  ;;  %v3904_v55 = vpop.permute.xlu1 %3903  ;;  %v3899_v56 = vpop.permute.xlu0 %3898 }
 0x43d   : > { %v4262_v17 = vmax.f32 %v4075_v41, 0.0  ;;  %v4264_v20 = vmax.f32 %v4188_v10, 0.0 }
 0x43e   : > { %v4263_v22 = vmax.f32 %v4077_v14, 0.0  ;;  %v4265_v19 = vmax.f32 %v4190_v15, 0.0 }
 0x43f   : > { %v4314_v26 = vpack.c.bf16 %v4262_v17, %v4258_v16  ;;  %v4316_v27 = vpack.c.bf16 %v4264_v20, %v4260_v11 }
 0x440   : > { %v4315_v31 = vpack.c.bf16 %v4263_v22, %v4259_v21  ;;  %v4317_v28 = vpack.c.bf16 %v4265_v19, %v4261_v0  ;;  %v4080_v29 = vpop.f32.mrb[204].mxu0  ;;  %v4193_v32 = vpop.f32.mrb[204].mxu1 }
 0x441   : > { %v4081_v33 = vadd.f32 %v4080_v29, %v3889_v42  ;;  %v4194_v35 = vadd.f32 %v4193_v32, %v3889_v42  ;;  %v4082_v37 = vpop.f32.mrb[205].mxu0  ;;  %v4195_v38 = vpop.f32.mrb[205].mxu1 }
 0x442   : > { %v4083_v39 = vadd.f32 %v4082_v37, %v3889_v42  ;;  %v4196_v40 = vadd.f32 %v4195_v38, %v3889_v42  ;;  %v4084_v8 = vpop.f32.mrb[206].mxu0  ;;  %v4197_v43 = vpop.f32.mrb[206].mxu1  ;;  %4349 = vmatprep.subr.bf16.mxu0 %v4315_v31  ;;  %4390 = vmatprep.subr.bf16.mxu1 %v4317_v28 }
 0x443   : > { %v4085_v44 = vadd.f32 %v4084_v8, %v3894_v24  ;;  %v4198_v46 = vadd.f32 %v4197_v43, %v3894_v24  ;;  %v4086_v23 = vpop.f32.mrb[207].mxu0  ;;  %v4199_v47 = vpop.f32.mrb[207].mxu1  ;;  %4350 = vmatpush1.bf16.msra.mxu0 %v4314_v26  ;;  %4391 = vmatpush1.bf16.msra.mxu1 %v4316_v27  ;;  %v4266_v34 = vmax.f32 %v4081_v33, 0.0  ;;  %v4268_v49 = vmax.f32 %v4194_v35, 0.0 }
 0x444   : > { %v4087_v45 = vadd.f32 %v4086_v23, %v3894_v24  ;;  %v4200_v48 = vadd.f32 %v4199_v47, %v3894_v24  ;;  %v4267_v52 = vmax.f32 %v4083_v39, 0.0  ;;  %v4269_v53 = vmax.f32 %v4196_v40, 0.0  ;;  %v3914_v21 = vpop.permute.xlu1 %3913  ;;  %v3909_v0 = vpop.permute.xlu0 %3908 }
 0x445   : > { %v4270_v50 = vmax.f32 %v4085_v44, 0.0  ;;  %v4272_v51 = vmax.f32 %v4198_v46, 0.0 }
 0x446   : > { %v4271_v54 = vmax.f32 %v4087_v45, 0.0  ;;  %v4273_v13 = vmax.f32 %v4200_v48, 0.0 }
 0x447   : > { %v4318_v25 = vpack.c.bf16 %v4270_v50, %v4266_v34  ;;  %v4320_v57 = vpack.c.bf16 %v4272_v51, %v4268_v49 }
 0x448   : > { %v4319_v58 = vpack.c.bf16 %v4271_v54, %v4267_v52  ;;  %v4321_v36 = vpack.c.bf16 %v4273_v13, %v4269_v53  ;;  %v4090_v59 = vpop.f32.mrb[208].mxu0  ;;  %v4203_v60 = vpop.f32.mrb[208].mxu1 }
 0x449   : > { %v4091_v61 = vadd.f32 %v4090_v59, %v3899_v56  ;;  %v4204_v62 = vadd.f32 %v4203_v60, %v3899_v56  ;;  %v4092_v63 = vpop.f32.mrb[209].mxu0  ;;  %v4205_v1 = vpop.f32.mrb[209].mxu1 }
 0x44a   : > { %v4093_v2 = vadd.f32 %v4092_v63, %v3899_v56  ;;  %v4206_v3 = vadd.f32 %v4205_v1, %v3899_v56  ;;  %v4094_v4 = vpop.f32.mrb[210].mxu0  ;;  %v4207_v5 = vpop.f32.mrb[210].mxu1  ;;  %4351 = vmatprep.subr.bf16.mxu0 %v4319_v58  ;;  %4392 = vmatprep.subr.bf16.mxu1 %v4321_v36 }
 0x44b   : > { %v4095_v6 = vadd.f32 %v4094_v4, %v3904_v55  ;;  %v4208_v7 = vadd.f32 %v4207_v5, %v3904_v55  ;;  %v4096_v18 = vpop.f32.mrb[211].mxu0  ;;  %v4209_v9 = vpop.f32.mrb[211].mxu1  ;;  %4352 = vmatpush1.bf16.msra.mxu0 %v4318_v25  ;;  %4393 = vmatpush1.bf16.msra.mxu1 %v4320_v57  ;;  %v4274_v30 = vmax.f32 %v4091_v61, 0.0  ;;  %v4276_v12 = vmax.f32 %v4204_v62, 0.0 }
 0x44c   : > { %v4097_v41 = vadd.f32 %v4096_v18, %v3904_v55  ;;  %v4210_v10 = vadd.f32 %v4209_v9, %v3904_v55  ;;  %v4275_v16 = vmax.f32 %v4093_v2, 0.0  ;;  %v4277_v11 = vmax.f32 %v4206_v3, 0.0  ;;  %v3924_v52 = vpop.permute.xlu1 %3923  ;;  %v3919_v53 = vpop.permute.xlu0 %3918 }
 0x44d   : > { %v4278_v14 = vmax.f32 %v4095_v6, 0.0  ;;  %v4280_v15 = vmax.f32 %v4208_v7, 0.0 }
 0x44e   : > { %v4279_v17 = vmax.f32 %v4097_v41, 0.0  ;;  %v4281_v20 = vmax.f32 %v4210_v10, 0.0 }
 0x44f   : > { %v4322_v22 = vpack.c.bf16 %v4278_v14, %v4274_v30  ;;  %v4324_v19 = vpack.c.bf16 %v4280_v15, %v4276_v12 }
 0x450   : > { %v4323_v24 = vpack.c.bf16 %v4279_v17, %v4275_v16  ;;  %v4325_v42 = vpack.c.bf16 %v4281_v20, %v4277_v11  ;;  %v4100_v26 = vpop.f32.mrb[212].mxu0  ;;  %v4213_v27 = vpop.f32.mrb[212].mxu1 }
 0x451   : > { %v4101_v31 = vadd.f32 %v4100_v26, %v3909_v0  ;;  %v4214_v28 = vadd.f32 %v4213_v27, %v3909_v0  ;;  %v4102_v29 = vpop.f32.mrb[213].mxu0  ;;  %v4215_v32 = vpop.f32.mrb[213].mxu1 }
 0x452   : > { %v4103_v33 = vadd.f32 %v4102_v29, %v3909_v0  ;;  %v4216_v35 = vadd.f32 %v4215_v32, %v3909_v0  ;;  %v4104_v37 = vpop.f32.mrb[214].mxu0  ;;  %v4217_v38 = vpop.f32.mrb[214].mxu1  ;;  %4353 = vmatprep.subr.bf16.mxu0 %v4323_v24  ;;  %4394 = vmatprep.subr.bf16.mxu1 %v4325_v42 }
 0x453   : > { %v4105_v39 = vadd.f32 %v4104_v37, %v3914_v21  ;;  %v4218_v40 = vadd.f32 %v4217_v38, %v3914_v21  ;;  %v4106_v8 = vpop.f32.mrb[215].mxu0  ;;  %v4219_v43 = vpop.f32.mrb[215].mxu1  ;;  %4354 = vmatpush1.bf16.msra.mxu0 %v4322_v22  ;;  %4395 = vmatpush1.bf16.msra.mxu1 %v4324_v19  ;;  %v4282_v23 = vmax.f32 %v4101_v31, 0.0  ;;  %v4284_v47 = vmax.f32 %v4214_v28, 0.0 }
 0x454   : > { %v4107_v44 = vadd.f32 %v4106_v8, %v3914_v21  ;;  %v4220_v46 = vadd.f32 %v4219_v43, %v3914_v21  ;;  %v4283_v34 = vmax.f32 %v4103_v33, 0.0  ;;  %v4285_v49 = vmax.f32 %v4216_v35, 0.0  ;;  %v3934_v16 = vpop.permute.xlu1 %3933  ;;  %v3929_v11 = vpop.permute.xlu0 %3928 }
 0x455   : > { %v4286_v45 = vmax.f32 %v4105_v39, 0.0  ;;  %v4288_v48 = vmax.f32 %v4218_v40, 0.0 }
 0x456   : > { %v4287_v50 = vmax.f32 %v4107_v44, 0.0  ;;  %v4289_v51 = vmax.f32 %v4220_v46, 0.0 }
 0x457   : > { %v4326_v54 = vpack.c.bf16 %v4286_v45, %v4282_v23  ;;  %v4328_v13 = vpack.c.bf16 %v4288_v48, %v4284_v47 }
 0x458   : > { %v4327_v55 = vpack.c.bf16 %v4287_v50, %v4283_v34  ;;  %v4329_v56 = vpack.c.bf16 %v4289_v51, %v4285_v49  ;;  %v4110_v25 = vpop.f32.mrb[216].mxu0  ;;  %v4223_v57 = vpop.f32.mrb[216].mxu1 }
 0x459   : > { %v4111_v58 = vadd.f32 %v4110_v25, %v3919_v53  ;;  %v4224_v36 = vadd.f32 %v4223_v57, %v3919_v53  ;;  %v4112_v59 = vpop.f32.mrb[217].mxu0  ;;  %v4225_v60 = vpop.f32.mrb[217].mxu1 }
 0x45a   : > { %v4113_v61 = vadd.f32 %v4112_v59, %v3919_v53  ;;  %v4226_v62 = vadd.f32 %v4225_v60, %v3919_v53  ;;  %v4114_v63 = vpop.f32.mrb[218].mxu0  ;;  %v4227_v1 = vpop.f32.mrb[218].mxu1  ;;  %4355 = vmatprep.subr.bf16.mxu0 %v4327_v55  ;;  %4396 = vmatprep.subr.bf16.mxu1 %v4329_v56 }
 0x45b   : > { %v4115_v2 = vadd.f32 %v4114_v63, %v3924_v52  ;;  %v4228_v3 = vadd.f32 %v4227_v1, %v3924_v52  ;;  %v4116_v4 = vpop.f32.mrb[219].mxu0  ;;  %v4229_v5 = vpop.f32.mrb[219].mxu1  ;;  %4356 = vmatpush1.bf16.msra.mxu0 %v4326_v54  ;;  %4397 = vmatpush1.bf16.msra.mxu1 %v4328_v13  ;;  %v4290_v18 = vmax.f32 %v4111_v58, 0.0  ;;  %v4292_v9 = vmax.f32 %v4224_v36, 0.0 }
 0x45c   : > { %v4117_v6 = vadd.f32 %v4116_v4, %v3924_v52  ;;  %v4230_v7 = vadd.f32 %v4229_v5, %v3924_v52  ;;  %v4291_v30 = vmax.f32 %v4113_v61, 0.0  ;;  %v4293_v12 = vmax.f32 %v4226_v62, 0.0  ;;  %v4338_v52 = vld [vmem:[%s6112_s7] sm:$0xf]  ;;  %v4343_v53 = vpop.permute.xlu0 %4342 }
 0x45d   : > { %v4294_v41 = vmax.f32 %v4115_v2, 0.0  ;;  %v4296_v10 = vmax.f32 %v4228_v3, 0.0 }
 0x45e   : > { %v4295_v14 = vmax.f32 %v4117_v6, 0.0  ;;  %v4297_v15 = vmax.f32 %v4230_v7, 0.0 }
 0x45f   : > { %v4330_v17 = vpack.c.bf16 %v4294_v41, %v4290_v18  ;;  %v4332_v20 = vpack.c.bf16 %v4296_v10, %v4292_v9 }
 0x460   : > { %v4331_v21 = vpack.c.bf16 %v4295_v14, %v4291_v30  ;;  %v4333_v0 = vpack.c.bf16 %v4297_v15, %v4293_v12  ;;  %v4120_v22 = vpop.f32.mrb[220].mxu0  ;;  %v4233_v19 = vpop.f32.mrb[220].mxu1 }
 0x461   : > { %v4121_v24 = vadd.f32 %v4120_v22, %v3929_v11  ;;  %v4234_v42 = vadd.f32 %v4233_v19, %v3929_v11  ;;  %v4122_v26 = vpop.f32.mrb[221].mxu0  ;;  %v4235_v27 = vpop.f32.mrb[221].mxu1 }
 0x462   : > { %v4123_v31 = vadd.f32 %v4122_v26, %v3929_v11  ;;  %v4236_v28 = vadd.f32 %v4235_v27, %v3929_v11  ;;  %v4124_v29 = vpop.f32.mrb[222].mxu0  ;;  %v4237_v32 = vpop.f32.mrb[222].mxu1  ;;  %4357 = vmatprep.subr.bf16.mxu0 %v4331_v21  ;;  %4398 = vmatprep.subr.bf16.mxu1 %v4333_v0 }
 0x463   : > { %v4125_v33 = vadd.f32 %v4124_v29, %v3934_v16  ;;  %v4238_v35 = vadd.f32 %v4237_v32, %v3934_v16  ;;  %v4126_v37 = vpop.f32.mrb[223].mxu0  ;;  %v4239_v38 = vpop.f32.mrb[223].mxu1  ;;  %4358 = vmatpush1.bf16.msra.mxu0 %v4330_v17  ;;  %4399 = vmatpush1.bf16.msra.mxu1 %v4332_v20  ;;  %v4298_v8 = vmax.f32 %v4121_v24, 0.0  ;;  %v4300_v43 = vmax.f32 %v4234_v42, 0.0 }
 0x464   : > { %v4127_v39 = vadd.f32 %v4126_v37, %v3934_v16  ;;  %v4240_v40 = vadd.f32 %v4239_v38, %v3934_v16  ;;  %v4299_v23 = vmax.f32 %v4123_v31, 0.0  ;;  %v4301_v47 = vmax.f32 %v4236_v28, 0.0 }
 0x465   : > { %v4302_v44 = vmax.f32 %v4125_v33, 0.0  ;;  %v4304_v46 = vmax.f32 %v4238_v35, 0.0 }
 0x466   : > { %v4303_v45 = vmax.f32 %v4127_v39, 0.0  ;;  %v4305_v48 = vmax.f32 %v4240_v40, 0.0 }
 0x467   : > { %v4334_v34 = vpack.c.bf16 %v4302_v44, %v4298_v8  ;;  %v4336_v49 = vpack.c.bf16 %v4304_v46, %v4300_v43 }
 0x468   : > { %v4335_v50 = vpack.c.bf16 %v4303_v45, %v4299_v23  ;;  %v4337_v51 = vpack.c.bf16 %v4305_v48, %v4301_v47 }
 0x46a   : > { %4359 = vmatprep.subr.bf16.mxu0 %v4335_v50  ;;  %4400 = vmatprep.subr.bf16.mxu1 %v4337_v51 }
 0x46b   : > { %4360 = vmatpush1.bf16.msra.mxu0 %v4334_v34  ;;  %4401 = vmatpush1.bf16.msra.mxu1 %v4336_v49 }
 0x46e   : > { %4378 = vmatmul.mubr.bf16.vlgmr.msra.gmra.mrb[224].mxu0 %v4338_v52  ;;  %4419 = vmatmul.mubr.bf16.vlgmr.msra.gmra.mrb[224].mxu1 %v4338_v52 }
 0x541   : > { %v4379_v54 = vpop.f32.mrb[224].mxu0  ;;  %v4420_v13 = vpop.f32.mrb[224].mxu1 }
 0x542   : > { %v4380_v55 = vadd.f32 %v4379_v54, %v4343_v53  ;;  %v4421_v56 = vadd.f32 %v4420_v13, %v4343_v53  ;;  %v4381_v25 = vpop.f32.mrb[225].mxu0  ;;  %v4422_v57 = vpop.f32.mrb[225].mxu1 }
 0x543   : > { %v4382_v58 = vadd.f32 %v4381_v25, %v4343_v53  ;;  %v4423_v36 = vadd.f32 %v4422_v57, %v4343_v53  ;;  %v4383_v59 = vpop.f32.mrb[226].mxu0  ;;  %v4424_v60 = vpop.f32.mrb[226].mxu1 }
 0x544   : > { %4427 = vst [vmem:[%s390_s26] sm:$0xff] %v4380_v55  ;;  %4429 = vst [vmem:[%s390_s26 + $0x10] sm:$0xff] %v4421_v56  ;;  %v4384_v61 = vpop.f32.mrb[227].mxu0  ;;  %v4425_v62 = vpop.f32.mrb[227].mxu1 }
 0x545   : > { %4428 = vst [vmem:[%s390_s26 + $0x8] sm:$0xff] %v4382_v58  ;;  %4430 = vst [vmem:[%s390_s26 + $0x18] sm:$0xff] %v4423_v36 }
 0x546 PF: > { %s19_s11 = sadd.s32 1, %s5219_s11   ;;  %s6115_s30 = smov %s5215_s10 }
 0x547   : > { %p16_p5 = scmp.ge.s32.totalorder %s19_s11, 4   ;;  %s6116_s10 = smov %s6118_s12 }
 0x549   :  { %18 = sbr.rel (!%p16_p5) target bundleno = 2 (0x2), region = 89 }

</bundles_post_ra>
